<compile_context>
chip_gen: v7x
topology: tpu7x:2x2x1
jax: 0.10.0
libtpu: 0.0.40
codegen_flags: <defaults>
</compile_context>

<pallas_src>
import jax
import jax.numpy as jnp
from jax import lax
from jax.experimental import pallas as pl
from jax.experimental.pallas import tpu as pltpu

KW = 4             # conv kernel size
PAD = 1            # conv padding
EPS = 1e-5         # BatchNorm eps
NEG_SLOPE = 0.2    # LeakyReLU slope
LANE = 128         # TPU lane width
VMEM_LIMIT = 32 * 1024 * 1024     # safe on v5e/v6e (128 MiB) and v7x (64 MiB)
VMEM_BUDGET = 24 * 1024 * 1024    # working-set target for tile selection


# ------------------------------ tiling helpers ------------------------------ #

def _round_up(x, m):
    return (x + m - 1) // m * m


def _pick_tm(m):
    # Large M tiles (per-grid-step overhead ~0.35us; 512-row tiles ~85% of the
    # HBM roofline).  Round to 16 so bf16 sublane packing is never ragged.
    return 512 if m >= 512 else _round_up(m, 16)


def _pick_tn(cp):
    # Full (padded) cout up to 512 => gn == 1, patches streamed exactly once.
    d = min(cp, 512)
    while cp % d:
        d -= LANE
    return d


def _pick_tk(kp, tm, tn, in_item, out_item):
    # Largest multiple-of-128 divisor of K whose working set (double-buffered
    # patches + weights + output, f32 accumulator) fits the VMEM budget.
    d = kp
    while d >= LANE:
        if kp % d == 0:
            need = 2 * (tm * d + d * tn) * in_item + tm * tn * (4 + 2 * out_item)
            if need <= VMEM_BUDGET:
                return d
        d -= LANE
    return LANE


# ------------------------------ Pallas kernels ------------------------------ #

def _make_conv_kernel(nk, has_bn, apply_act):
    """Tiled matmul with fused epilogue (bias, LeakyReLU, BN partial stats).

    refs: patches (tm, tk), w (tk, tn), bias (1, tn),
          outputs: y (tm, tn) [, sum (1, 1, tn), ssq (1, 1, tn)],
          scratch: acc (tm, tn) f32.
    """
    def kernel(p_ref, w_ref, b_ref, *refs):
        if has_bn:
            o_ref, sum_ref, ssq_ref, acc_ref = refs
        else:
            o_ref, acc_ref = refs

        # program_id only at kernel top level (never inside pl.when bodies).
        k = pl.program_id(2)

        @pl.when(k == 0)
        def _init():
            acc_ref[...] = jnp.zeros_like(acc_ref)

        acc_ref[...] += jnp.dot(p_ref[...], w_ref[...],
                                preferred_element_type=jnp.float32)

        @pl.when(k == nk - 1)
        def _finalize():
            y = acc_ref[...] + b_ref[...]
            if apply_act and not has_bn:
                y = jnp.where(y >= 0.0, y, NEG_SLOPE * y)
            if has_bn:
                # BN layers have no conv bias and zero-padded patch rows give
                # exactly-zero y, so unmasked per-tile sums are exact; the
                # host divides by the real (unpadded) row count.
                sum_ref[...] = jnp.sum(y, axis=0).reshape(1, 1, -1)
                ssq_ref[...] = jnp.sum(y * y, axis=0).reshape(1, 1, -1)
            o_ref[...] = y.astype(o_ref.dtype)

    return kernel


def _conv2d_fused(patches, w_mat, bias, *, has_bn, apply_act, out_dtype):
    """[Mp, Kp] @ [Kp, Cp] + bias (+ LeakyReLU | BN partial stats), tiled."""
    mp, kp = patches.shape
    kp2, cp = w_mat.shape
    assert kp == kp2, (kp, kp2)
    tm = _pick_tm(mp)
    tn = _pick_tn(cp)
    tk = _pick_tk(kp, tm, tn, patches.dtype.itemsize,
                  jnp.dtype(out_dtype).itemsize)
    assert mp % tm == 0 and kp % tk == 0 and cp % tn == 0, (mp, kp, cp, tm, tk, tn)
    gm, gn, gk = mp // tm, cp // tn, kp // tk

    kernel = _make_conv_kernel(gk, has_bn, apply_act)

    y_spec = pl.BlockSpec((tm, tn), lambda i, j, k: (i, j))
    if has_bn:
        st_spec = pl.BlockSpec((1, 1, tn), lambda i, j, k: (i, 0, j))
        out_shape = (jax.ShapeDtypeStruct((mp, cp), out_dtype),
                     jax.ShapeDtypeStruct((gm, 1, cp), jnp.float32),
                     jax.ShapeDtypeStruct((gm, 1, cp), jnp.float32))
        out_specs = (y_spec, st_spec, st_spec)
    else:
        out_shape = jax.ShapeDtypeStruct((mp, cp), out_dtype)
        out_specs = y_spec

    return pl.pallas_call(
        kernel,
        out_shape=out_shape,
        grid=(gm, gn, gk),
        in_specs=[
            pl.BlockSpec((tm, tk), lambda i, j, k: (i, k)),
            pl.BlockSpec((tk, tn), lambda i, j, k: (k, j)),
            pl.BlockSpec((1, tn), lambda i, j, k: (0, j)),
        ],
        out_specs=out_specs,
        scratch_shapes=[pltpu.VMEM((tm, tn), jnp.float32)],
        compiler_params=pltpu.CompilerParams(
            dimension_semantics=("parallel", "parallel", "arbitrary"),
            vmem_limit_bytes=VMEM_LIMIT,
        ),
    )(patches, w_mat, bias.reshape(1, cp))


def _make_bn_act_kernel(apply_act):
    def kernel(x_ref, s_ref, t_ref, o_ref):
        y = x_ref[...].astype(jnp.float32) * s_ref[...] + t_ref[...]
        if apply_act:
            y = jnp.where(y >= 0.0, y, NEG_SLOPE * y)
        o_ref[...] = y.astype(o_ref.dtype)
    return kernel


def _bn_act(y, scale, shift, apply_act):
    """Per-channel scale/shift (+ LeakyReLU): compute-dtype in/out, f32 math."""
    mp, cp = y.shape
    tm = _pick_tm(mp)
    assert mp % tm == 0
    return pl.pallas_call(
        _make_bn_act_kernel(apply_act),
        out_shape=jax.ShapeDtypeStruct((mp, cp), y.dtype),
        grid=(mp // tm,),
        in_specs=[
            pl.BlockSpec((tm, cp), lambda i: (i, 0)),
            pl.BlockSpec((1, cp), lambda i: (0, 0)),
            pl.BlockSpec((1, cp), lambda i: (0, 0)),
        ],
        out_specs=pl.BlockSpec((tm, cp), lambda i: (i, 0)),
        compiler_params=pltpu.CompilerParams(
            dimension_semantics=("parallel",),
            vmem_limit_bytes=VMEM_LIMIT,
        ),
    )(y, scale.reshape(1, cp).astype(jnp.float32),
      shift.reshape(1, cp).astype(jnp.float32))


# -------------------------------- JAX glue ---------------------------------- #

def _im2col(x_nhwc, stride):
    """[N, H, W, C] -> patch matrix [Mp, Kp]; K order (kh, kw, c), real C only.

    Single concatenate pass (K zero-fill folded in); only M is padded after.
    """
    x = jnp.pad(x_nhwc, ((0, 0), (PAD, PAD), (PAD, PAD), (0, 0)))
    n, hp, wp, c = x.shape
    ho = (hp - KW) // stride + 1
    wo = (wp - KW) // stride + 1
    k = KW * KW * c
    kp = _round_up(k, LANE)
    cols = [x[:, i:i + stride * ho:stride, j:j + stride * wo:stride, :]
            for i in range(KW) for j in range(KW)]
    if kp > k:
        cols.append(jnp.zeros((n, ho, wo, kp - k), x.dtype))
    m = n * ho * wo
    patches = jnp.concatenate(cols, axis=-1).reshape(m, kp)
    mp = _round_up(m, _pick_tm(m))
    if mp > m:
        patches = jnp.pad(patches, ((0, mp - m), (0, 0)))
    return patches, (n, ho, wo, m)


def nlayer_discriminator_forward(x_nchw, layers):
    """Forward pass of NLayerDiscriminator (use_actnorm=False, train-mode BN)."""
    compute_dtype = layers[0]["w_mat"].dtype
    x = jnp.transpose(x_nchw, (0, 2, 3, 1)).astype(compute_dtype)   # NCHW->NHWC
    for lyr in layers:
        patches, (n, ho, wo, m) = _im2col(x, lyr["stride"])
        assert patches.shape[1] == lyr["w_mat"].shape[0], \
            (patches.shape, lyr["w_mat"].shape)
        res = _conv2d_fused(patches, lyr["w_mat"], lyr["bias"],
                            has_bn=lyr["bn"], apply_act=lyr["act"],
                            out_dtype=compute_dtype)
        if lyr["bn"]:
            y, sums, ssqs = res
            total = jnp.sum(sums, axis=(0, 1))          # (cp,) f32
            total_sq = jnp.sum(ssqs, axis=(0, 1))
            mean = total / m
            # NOTE: E[x^2]-E[x]^2 in f32; fine at these scales (review concern).
            var = total_sq / m - mean * mean             # biased (train-mode)
            scale = lyr["gamma"] / jnp.sqrt(var + EPS)
            shift = lyr["beta"] - mean * scale
            y = _bn_act(y, scale, shift, lyr["act"])
        else:
            y = res
        # Slice off padded rows and padded channels before the next im2col so
        # K never carries the cout->128 padding into the next layer.
        x = y[:m, :lyr["cout"]].reshape(n, ho, wo, lyr["cout"])
    return jnp.transpose(x, (0, 3, 1, 2)).astype(jnp.float32)       # NHWC->NCHW


# ------------------------------ parameters ---------------------------------- #

def _layer_cfgs(input_nc, output_nc, ndf, n_layers):
    cfgs = [dict(cin=input_nc, cout=ndf, stride=2, use_bias=True, bn=False, act=True)]
    nf_mult = 1
    for n in range(1, n_layers):
        prev, nf_mult = nf_mult, min(2 ** n, 8)
        cfgs.append(dict(cin=ndf * prev, cout=ndf * nf_mult, stride=2,
                         use_bias=False, bn=True, act=True))
    prev, nf_mult = nf_mult, min(2 ** n_layers, 8)
    cfgs.append(dict(cin=ndf * prev, cout=ndf * nf_mult, stride=1,
                     use_bias=False, bn=True, act=True))
    cfgs.append(dict(cin=ndf * nf_mult, cout=output_nc, stride=1,
                     use_bias=True, bn=False, act=False))
    return cfgs


def init_params(key, input_nc=1, output_nc=1, ndf=8, n_layers=3,
                compute_dtype=jnp.float32):
    """Synthetic NLayerDiscriminator params, pre-packed for the Pallas kernels.

    Weight transpose/reshape, cout->128 padding, total-K->128 padding and the
    optional bf16 cast are all hoisted here (no per-call repacking).
    """
    layers = []
    for cfg in _layer_cfgs(input_nc, output_nc, ndf, n_layers):
        # The maskless BN-stats epilogue relies on BN layers having no bias.
        assert not (cfg["bn"] and cfg["use_bias"])
        key, kw_, kb_, kg_, kbt_ = jax.random.split(key, 5)
        cin, cout = cfg["cin"], cfg["cout"]
        w = 0.05 * jax.random.normal(kw_, (cout, cin, KW, KW), jnp.float32)
        b = (0.01 * jax.random.normal(kb_, (cout,), jnp.float32)
             if cfg["use_bias"] else None)
        gamma = (1.0 + 0.1 * jax.random.normal(kg_, (cout,), jnp.float32)
                 if cfg["bn"] else None)
        beta = (0.1 * jax.random.normal(kbt_, (cout,), jnp.float32)
                if cfg["bn"] else None)

        cp = _round_up(cout, LANE)
        k = KW * KW * cin                  # real input channels only
        kp = _round_up(k, LANE)
        # [cout, cin, kh, kw] -> [kh, kw, cin, cout]; pad cout; flatten; pad K.
        w_mat = jnp.transpose(w, (2, 3, 1, 0))
        w_mat = jnp.pad(w_mat, ((0, 0), (0, 0), (0, 0), (0, cp - cout)))
        w_mat = jnp.pad(w_mat.reshape(k, cp), ((0, kp - k), (0, 0)))

        bias_p = jnp.zeros((cp,), jnp.float32)
        if b is not None:
            bias_p = bias_p.at[:cout].set(b)

        layers.append(dict(
            stride=cfg["stride"], bn=cfg["bn"], act=cfg["act"], cout=cout,
            w_mat=w_mat.astype(compute_dtype),
            bias=bias_p,
            gamma=(jnp.pad(gamma, (0, cp - cout), constant_values=1.0)
                   if cfg["bn"] else None),
            beta=(jnp.pad(beta, (0, cp - cout)) if cfg["bn"] else None),
            raw=dict(w=w, b=b, gamma=gamma, beta=beta, stride=cfg["stride"],
                     bn=cfg["bn"], act=cfg["act"]),
        ))
    return layers


def _reference_forward(x_nchw, layers):
    """Pure-JAX reference (lax conv, NCHW, f32, HIGHEST precision)."""
    y = x_nchw.astype(jnp.float32)
    for lyr in layers:
        r = lyr["raw"]
        y = lax.conv_general_dilated(
            y, r["w"], window_strides=(r["stride"], r["stride"]),
            padding=((PAD, PAD), (PAD, PAD)),
            dimension_numbers=("NCHW", "OIHW", "NCHW"),
            precision=lax.Precision.HIGHEST)
        if r["b"] is not None:
            y = y + r["b"][None, :, None, None]
        if r["bn"]:
            mean = jnp.mean(y, axis=(0, 2, 3), keepdims=True)
            var = jnp.mean((y - mean) ** 2, axis=(0, 2, 3), keepdims=True)
            y = (y - mean) / jnp.sqrt(var + EPS)
            y = y * r["gamma"][None, :, None, None] + r["beta"][None, :, None, None]
        if r["act"]:
            y = jnp.where(y >= 0, y, NEG_SLOPE * y)
    return y


if __name__ == "__main__":
    key = jax.random.PRNGKey(0)
    kx, kparam = jax.random.split(key)
    # input_nc=1, small ndf=8, n_layers=3; 32x32 keeps every layer valid.
    x = jax.random.normal(kx, (2, 1, 32, 32), jnp.float32)   # NCHW like PyTorch

    ref_layers = init_params(kparam, input_nc=1, output_nc=1, ndf=8, n_layers=3,
                             compute_dtype=jnp.float32)
    ref = _reference_forward(x, ref_layers)

    # f32 matmul operands / f32 activations.  Tolerance covers MXU default-
    # precision matmul on real hardware while still catching structural bugs.
    fwd_f32 = jax.jit(lambda inp: nlayer_discriminator_forward(inp, ref_layers))
    out_f32 = jax.block_until_ready(fwd_f32(x))
    assert out_f32.shape == ref.shape == (2, 1, 2, 2), (out_f32.shape, ref.shape)
    err_f32 = float(jnp.max(jnp.abs(out_f32 - ref)))
    assert jnp.allclose(out_f32, ref, atol=2e-2, rtol=2e-2), f"f32 max_err={err_f32}"

    # bf16 matmul operands AND bf16 inter-layer activations (f32 accumulation,
    # f32 BN statistics): looser tolerance.
    layers_bf16 = init_params(kparam, input_nc=1, output_nc=1, ndf=8, n_layers=3,
                              compute_dtype=jnp.bfloat16)
    fwd_bf16 = jax.jit(lambda inp: nlayer_discriminator_forward(inp, layers_bf16))
    out_bf16 = jax.block_until_ready(fwd_bf16(x))
    err_bf16 = float(jnp.max(jnp.abs(out_bf16 - ref)))
    assert jnp.allclose(out_bf16, ref, atol=1e-1, rtol=1e-1), f"bf16 max_err={err_bf16}"

    print("KERNEL_OK")
</pallas_src>

<mosaic_0001>
module attributes {stable_mosaic.version = 11 : i64} {
  func.func @kernel(%arg0: i32, %arg1: i32, %arg2: i32, %arg3: memref<512x128xf32, #tpu.memory_space<vmem>>, %arg4: memref<128x128xf32, #tpu.memory_space<vmem>>, %arg5: memref<1x128xf32, #tpu.memory_space<vmem>>, %arg6: memref<512x128xf32, #tpu.memory_space<vmem>>, %arg7: memref<512x128xf32, #tpu.memory_space<vmem>>) attributes {dimension_semantics = [#tpu.dimension_semantics<parallel>, #tpu.dimension_semantics<parallel>, #tpu.dimension_semantics<arbitrary>], iteration_bounds = array<i64: 1, 1, 1>, scalar_prefetch = 0 : i64, scratch_operands = 1 : i64, tpu.core_type = #tpu.core_type<tc>, window_params = [{transform_indices = @transform_0, window_bounds = array<i64: 512, 128>}, {transform_indices = @transform_1, window_bounds = array<i64: 128, 128>}, {transform_indices = @transform_2, window_bounds = array<i64: 1, 128>}, {transform_indices = @transform_3, window_bounds = array<i64: 512, 128>}]} {
    %c0_i32 = arith.constant 0 : i32
    %0 = arith.cmpi eq, %arg2, %c0_i32 : i32
    %1 = arith.extui %0 : i1 to i32
    %c0_i32_0 = arith.constant 0 : i32
    %2 = arith.cmpi ne, %1, %c0_i32_0 : i32
    scf.if %2 {
      %cst_10 = arith.constant 0.000000e+00 : f32
      %12 = vector.broadcast %cst_10 : f32 to vector<512x128xf32>
      %c0_11 = arith.constant 0 : index
      %c0_12 = arith.constant 0 : index
      %13 = vector.load %arg7[%c0_11, %c0_12] : memref<512x128xf32, #tpu.memory_space<vmem>>, vector<512x128xf32>
      tpu.vector_store %arg7[%c0_11, %c0_12], %12 {strides = array<i32>} : memref<512x128xf32, #tpu.memory_space<vmem>>, vector<512x128xf32>,
    } else {
    }
    %c0 = arith.constant 0 : index
    %c0_1 = arith.constant 0 : index
    %3 = vector.load %arg7[%c0, %c0_1] : memref<512x128xf32, #tpu.memory_space<vmem>>, vector<512x128xf32>
    %c0_2 = arith.constant 0 : index
    %c0_3 = arith.constant 0 : index
    %4 = vector.load %arg3[%c0_2, %c0_3] : memref<512x128xf32, #tpu.memory_space<vmem>>, vector<512x128xf32>
    %c0_4 = arith.constant 0 : index
    %c0_5 = arith.constant 0 : index
    %5 = vector.load %arg4[%c0_4, %c0_5] : memref<128x128xf32, #tpu.memory_space<vmem>>, vector<128x128xf32>
    %cst = arith.constant dense<0.000000e+00> : vector<512x128xf32>
    %6 = tpu.matmul %4, %5, %cst {dimension_numbers = #tpu.dot_dimension_numbers<[1], [0], [0], [1], [0, 0, 1, 1], [], []>} : vector<512x128xf32>, vector<128x128xf32>, vector<512x128xf32> -> vector<512x128xf32>
    %7 = arith.addf %3, %6 : vector<512x128xf32>
    %c0_6 = arith.constant 0 : index
    %c0_7 = arith.constant 0 : index
    %8 = vector.load %arg7[%c0_6, %c0_7] : memref<512x128xf32, #tpu.memory_space<vmem>>, vector<512x128xf32>
    tpu.vector_store %arg7[%c0_6, %c0_7], %7 {strides = array<i32>} : memref<512x128xf32, #tpu.memory_space<vmem>>, vector<512x128xf32>,
    %c0_i32_8 = arith.constant 0 : i32
    %9 = arith.cmpi eq, %arg2, %c0_i32_8 : i32
    %10 = arith.extui %9 : i1 to i32
    %c0_i32_9 = arith.constant 0 : i32
    %11 = arith.cmpi ne, %10, %c0_i32_9 : i32
    scf.if %11 {
      %c0_10 = arith.constant 0 : index
      %c0_11 = arith.constant 0 : index
      %12 = vector.load %arg7[%c0_10, %c0_11] : memref<512x128xf32, #tpu.memory_space<vmem>>, vector<512x128xf32>
      %c0_12 = arith.constant 0 : index
      %c0_13 = arith.constant 0 : index
      %13 = vector.load %arg5[%c0_12, %c0_13] : memref<1x128xf32, #tpu.memory_space<vmem>>, vector<1x128xf32>
      %14 = vector.broadcast %13 : vector<1x128xf32> to vector<512x128xf32>
      %15 = arith.addf %12, %14 : vector<512x128xf32>
      %cst_14 = arith.constant 0.000000e+00 : f32
      %16 = vector.broadcast %cst_14 : f32 to vector<512x128xf32>
      %17 = arith.cmpf oge, %15, %16 : vector<512x128xf32>
      %cst_15 = arith.constant 2.000000e-01 : f32
      %18 = vector.broadcast %cst_15 : f32 to vector<512x128xf32>
      %19 = arith.mulf %18, %15 : vector<512x128xf32>
      %20 = arith.select %17, %15, %19 : vector<512x128xi1>, vector<512x128xf32>
      %c0_16 = arith.constant 0 : index
      %c0_17 = arith.constant 0 : index
      %21 = vector.load %arg6[%c0_16, %c0_17] : memref<512x128xf32, #tpu.memory_space<vmem>>, vector<512x128xf32>
      tpu.vector_store %arg6[%c0_16, %c0_17], %20 {strides = array<i32>} : memref<512x128xf32, #tpu.memory_space<vmem>>, vector<512x128xf32>,
    } else {
    }
    return
  }
  func.func @transform_0(%arg0: i32, %arg1: i32, %arg2: i32) -> (i32, i32) {
    %c0_i32 = arith.constant 0 : i32
    return %arg0, %arg2 : i32, i32
  }
  func.func @transform_1(%arg0: i32, %arg1: i32, %arg2: i32) -> (i32, i32) {
    %c0_i32 = arith.constant 0 : i32
    return %arg2, %arg1 : i32, i32
  }
  func.func @transform_2(%arg0: i32, %arg1: i32, %arg2: i32) -> (i32, i32) {
    %c0_i32 = arith.constant 0 : i32
    %c0_i32_0 = arith.constant 0 : i32
    return %c0_i32, %arg1 : i32, i32
  }
  func.func @transform_3(%arg0: i32, %arg1: i32, %arg2: i32) -> (i32, i32) {
    %c0_i32 = arith.constant 0 : i32
    return %arg0, %arg1 : i32, i32
  }
}

module attributes {stable_mosaic.version = 11 : i64} {
  func.func @kernel(%arg0: i32, %arg1: i32, %arg2: i32, %arg3: memref<128x128xf32, #tpu.memory_space<vmem>>, %arg4: memref<128x128xf32, #tpu.memory_space<vmem>>, %arg5: memref<1x128xf32, #tpu.memory_space<vmem>>, %arg6: memref<128x128xf32, #tpu.memory_space<vmem>>, %arg7: memref<1x1x128xf32, #tpu.memory_space<vmem>>, %arg8: memref<1x1x128xf32, #tpu.memory_space<vmem>>, %arg9: memref<128x128xf32, #tpu.memory_space<vmem>>) attributes {dimension_semantics = [#tpu.dimension_semantics<parallel>, #tpu.dimension_semantics<parallel>, #tpu.dimension_semantics<arbitrary>], iteration_bounds = array<i64: 1, 1, 1>, scalar_prefetch = 0 : i64, scratch_operands = 1 : i64, tpu.core_type = #tpu.core_type<tc>, window_params = [{transform_indices = @transform_0, window_bounds = array<i64: 128, 128>}, {transform_indices = @transform_1, window_bounds = array<i64: 128, 128>}, {transform_indices = @transform_2, window_bounds = array<i64: 1, 128>}, {transform_indices = @transform_3, window_bounds = array<i64: 128, 128>}, {transform_indices = @transform_4, window_bounds = array<i64: 1, 1, 128>}, {transform_indices = @transform_5, window_bounds = array<i64: 1, 1, 128>}]} {
    %c0_i32 = arith.constant 0 : i32
    %0 = arith.cmpi eq, %arg2, %c0_i32 : i32
    %1 = arith.extui %0 : i1 to i32
    %c0_i32_0 = arith.constant 0 : i32
    %2 = arith.cmpi ne, %1, %c0_i32_0 : i32
    scf.if %2 {
      %cst_10 = arith.constant 0.000000e+00 : f32
      %12 = vector.broadcast %cst_10 : f32 to vector<128x128xf32>
      %c0_11 = arith.constant 0 : index
      %c0_12 = arith.constant 0 : index
      %13 = vector.load %arg9[%c0_11, %c0_12] : memref<128x128xf32, #tpu.memory_space<vmem>>, vector<128x128xf32>
      tpu.vector_store %arg9[%c0_11, %c0_12], %12 {strides = array<i32>} : memref<128x128xf32, #tpu.memory_space<vmem>>, vector<128x128xf32>,
    } else {
    }
    %c0 = arith.constant 0 : index
    %c0_1 = arith.constant 0 : index
    %3 = vector.load %arg9[%c0, %c0_1] : memref<128x128xf32, #tpu.memory_space<vmem>>, vector<128x128xf32>
    %c0_2 = arith.constant 0 : index
    %c0_3 = arith.constant 0 : index
    %4 = vector.load %arg3[%c0_2, %c0_3] : memref<128x128xf32, #tpu.memory_space<vmem>>, vector<128x128xf32>
    %c0_4 = arith.constant 0 : index
    %c0_5 = arith.constant 0 : index
    %5 = vector.load %arg4[%c0_4, %c0_5] : memref<128x128xf32, #tpu.memory_space<vmem>>, vector<128x128xf32>
    %cst = arith.constant dense<0.000000e+00> : vector<128x128xf32>
    %6 = tpu.matmul %4, %5, %cst {dimension_numbers = #tpu.dot_dimension_numbers<[1], [0], [0], [1], [0, 0, 1, 1], [], []>} : vector<128x128xf32>, vector<128x128xf32>, vector<128x128xf32> -> vector<128x128xf32>
    %7 = arith.addf %3, %6 : vector<128x128xf32>
    %c0_6 = arith.constant 0 : index
    %c0_7 = arith.constant 0 : index
    %8 = vector.load %arg9[%c0_6, %c0_7] : memref<128x128xf32, #tpu.memory_space<vmem>>, vector<128x128xf32>
    tpu.vector_store %arg9[%c0_6, %c0_7], %7 {strides = array<i32>} : memref<128x128xf32, #tpu.memory_space<vmem>>, vector<128x128xf32>,
    %c0_i32_8 = arith.constant 0 : i32
    %9 = arith.cmpi eq, %arg2, %c0_i32_8 : i32
    %10 = arith.extui %9 : i1 to i32
    %c0_i32_9 = arith.constant 0 : i32
    %11 = arith.cmpi ne, %10, %c0_i32_9 : i32
    scf.if %11 {
      %c0_10 = arith.constant 0 : index
      %c0_11 = arith.constant 0 : index
      %12 = vector.load %arg9[%c0_10, %c0_11] : memref<128x128xf32, #tpu.memory_space<vmem>>, vector<128x128xf32>
      %c0_12 = arith.constant 0 : index
      %c0_13 = arith.constant 0 : index
      %13 = vector.load %arg5[%c0_12, %c0_13] : memref<1x128xf32, #tpu.memory_space<vmem>>, vector<1x128xf32>
      %14 = vector.broadcast %13 : vector<1x128xf32> to vector<128x128xf32>
      %15 = arith.addf %12, %14 : vector<128x128xf32>
      %cst_14 = arith.constant dense<0.000000e+00> : vector<128xf32>
      %16 = vector.multi_reduction <add>, %15, %cst_14 [0] : vector<128x128xf32> to vector<128xf32>
      %17 = vector.shape_cast %16 : vector<128xf32> to vector<1x1x128xf32>
      %c0_15 = arith.constant 0 : index
      %c0_16 = arith.constant 0 : index
      %c0_17 = arith.constant 0 : index
      %18 = vector.load %arg7[%c0_15, %c0_16, %c0_17] : memref<1x1x128xf32, #tpu.memory_space<vmem>>, vector<1x1x128xf32>
      tpu.vector_store %arg7[%c0_15, %c0_16, %c0_17], %17 {strides = array<i32>} : memref<1x1x128xf32, #tpu.memory_space<vmem>>, vector<1x1x128xf32>,
      %19 = arith.mulf %15, %15 : vector<128x128xf32>
      %cst_18 = arith.constant dense<0.000000e+00> : vector<128xf32>
      %20 = vector.multi_reduction <add>, %19, %cst_18 [0] : vector<128x128xf32> to vector<128xf32>
      %21 = vector.shape_cast %20 : vector<128xf32> to vector<1x1x128xf32>
      %c0_19 = arith.constant 0 : index
      %c0_20 = arith.constant 0 : index
      %c0_21 = arith.constant 0 : index
      %22 = vector.load %arg8[%c0_19, %c0_20, %c0_21] : memref<1x1x128xf32, #tpu.memory_space<vmem>>, vector<1x1x128xf32>
      tpu.vector_store %arg8[%c0_19, %c0_20, %c0_21], %21 {strides = array<i32>} : memref<1x1x128xf32, #tpu.memory_space<vmem>>, vector<1x1x128xf32>,
      %c0_22 = arith.constant 0 : index
      %c0_23 = arith.constant 0 : index
      %23 = vector.load %arg6[%c0_22, %c0_23] : memref<128x128xf32, #tpu.memory_space<vmem>>, vector<128x128xf32>
      tpu.vector_store %arg6[%c0_22, %c0_23], %15 {strides = array<i32>} : memref<128x128xf32, #tpu.memory_space<vmem>>, vector<128x128xf32>,
    } else {
    }
    return
  }
  func.func @transform_0(%arg0: i32, %arg1: i32, %arg2: i32) -> (i32, i32) {
    %c0_i32 = arith.constant 0 : i32
    return %arg0, %arg2 : i32, i32
  }
  func.func @transform_1(%arg0: i32, %arg1: i32, %arg2: i32) -> (i32, i32) {
    %c0_i32 = arith.constant 0 : i32
    return %arg2, %arg1 : i32, i32
  }
  func.func @transform_2(%arg0: i32, %arg1: i32, %arg2: i32) -> (i32, i32) {
    %c0_i32 = arith.constant 0 : i32
    %c0_i32_0 = arith.constant 0 : i32
    return %c0_i32, %arg1 : i32, i32
  }
  func.func @transform_3(%arg0: i32, %arg1: i32, %arg2: i32) -> (i32, i32) {
    %c0_i32 = arith.constant 0 : i32
    return %arg0, %arg1 : i32, i32
  }
  func.func @transform_4(%arg0: i32, %arg1: i32, %arg2: i32) -> (i32, i32, i32) {
    %c0_i32 = arith.constant 0 : i32
    %c0_i32_0 = arith.constant 0 : i32
    return %arg0, %c0_i32, %arg1 : i32, i32, i32
  }
  func.func @transform_5(%arg0: i32, %arg1: i32, %arg2: i32) -> (i32, i32, i32) {
    %c0_i32 = arith.constant 0 : i32
    %c0_i32_0 = arith.constant 0 : i32
    return %arg0, %c0_i32, %arg1 : i32, i32, i32
  }
}

module attributes {stable_mosaic.version = 11 : i64} {
  func.func @kernel(%arg0: i32, %arg1: memref<128x128xf32, #tpu.memory_space<vmem>>, %arg2: memref<1x128xf32, #tpu.memory_space<vmem>>, %arg3: memref<1x128xf32, #tpu.memory_space<vmem>>, %arg4: memref<128x128xf32, #tpu.memory_space<vmem>>) attributes {dimension_semantics = [#tpu.dimension_semantics<parallel>], iteration_bounds = array<i64: 1>, scalar_prefetch = 0 : i64, scratch_operands = 0 : i64, tpu.core_type = #tpu.core_type<tc>, window_params = [{transform_indices = @transform_0, window_bounds = array<i64: 128, 128>}, {pipeline_mode = #tpu.pipeline_mode<synchronous>, transform_indices = @transform_1, window_bounds = array<i64: 1, 128>}, {pipeline_mode = #tpu.pipeline_mode<synchronous>, transform_indices = @transform_2, window_bounds = array<i64: 1, 128>}, {transform_indices = @transform_3, window_bounds = array<i64: 128, 128>}]} {
    %c0 = arith.constant 0 : index
    %c0_0 = arith.constant 0 : index
    %0 = vector.load %arg1[%c0, %c0_0] : memref<128x128xf32, #tpu.memory_space<vmem>>, vector<128x128xf32>
    %c0_1 = arith.constant 0 : index
    %c0_2 = arith.constant 0 : index
    %1 = vector.load %arg2[%c0_1, %c0_2] : memref<1x128xf32, #tpu.memory_space<vmem>>, vector<1x128xf32>
    %2 = vector.broadcast %1 : vector<1x128xf32> to vector<128x128xf32>
    %3 = arith.mulf %0, %2 : vector<128x128xf32>
    %c0_3 = arith.constant 0 : index
    %c0_4 = arith.constant 0 : index
    %4 = vector.load %arg3[%c0_3, %c0_4] : memref<1x128xf32, #tpu.memory_space<vmem>>, vector<1x128xf32>
    %5 = vector.broadcast %4 : vector<1x128xf32> to vector<128x128xf32>
    %6 = arith.addf %3, %5 : vector<128x128xf32>
    %cst = arith.constant 0.000000e+00 : f32
    %7 = vector.broadcast %cst : f32 to vector<128x128xf32>
    %8 = arith.cmpf oge, %6, %7 : vector<128x128xf32>
    %cst_5 = arith.constant 2.000000e-01 : f32
    %9 = vector.broadcast %cst_5 : f32 to vector<128x128xf32>
    %10 = arith.mulf %9, %6 : vector<128x128xf32>
    %11 = arith.select %8, %6, %10 : vector<128x128xi1>, vector<128x128xf32>
    %c0_6 = arith.constant 0 : index
    %c0_7 = arith.constant 0 : index
    %12 = vector.load %arg4[%c0_6, %c0_7] : memref<128x128xf32, #tpu.memory_space<vmem>>, vector<128x128xf32>
    tpu.vector_store %arg4[%c0_6, %c0_7], %11 {strides = array<i32>} : memref<128x128xf32, #tpu.memory_space<vmem>>, vector<128x128xf32>,
    return
  }
  func.func @transform_0(%arg0: i32) -> (i32, i32) {
    %c0_i32 = arith.constant 0 : i32
    %c0_i32_0 = arith.constant 0 : i32
    return %arg0, %c0_i32 : i32, i32
  }
  func.func @transform_1(%arg0: i32) -> (i32, i32) {
    %c0_i32 = arith.constant 0 : i32
    %c0_i32_0 = arith.constant 0 : i32
    %c0_i32_1 = arith.constant 0 : i32
    return %c0_i32, %c0_i32_0 : i32, i32
  }
  func.func @transform_2(%arg0: i32) -> (i32, i32) {
    %c0_i32 = arith.constant 0 : i32
    %c0_i32_0 = arith.constant 0 : i32
    %c0_i32_1 = arith.constant 0 : i32
    return %c0_i32, %c0_i32_0 : i32, i32
  }
  func.func @transform_3(%arg0: i32) -> (i32, i32) {
    %c0_i32 = arith.constant 0 : i32
    %c0_i32_0 = arith.constant 0 : i32
    return %arg0, %c0_i32 : i32, i32
  }
}

module attributes {stable_mosaic.version = 11 : i64} {
  func.func @kernel(%arg0: i32, %arg1: i32, %arg2: i32, %arg3: memref<32x256xf32, #tpu.memory_space<vmem>>, %arg4: memref<256x128xf32, #tpu.memory_space<vmem>>, %arg5: memref<1x128xf32, #tpu.memory_space<vmem>>, %arg6: memref<32x128xf32, #tpu.memory_space<vmem>>, %arg7: memref<1x1x128xf32, #tpu.memory_space<vmem>>, %arg8: memref<1x1x128xf32, #tpu.memory_space<vmem>>, %arg9: memref<32x128xf32, #tpu.memory_space<vmem>>) attributes {dimension_semantics = [#tpu.dimension_semantics<parallel>, #tpu.dimension_semantics<parallel>, #tpu.dimension_semantics<arbitrary>], iteration_bounds = array<i64: 1, 1, 1>, scalar_prefetch = 0 : i64, scratch_operands = 1 : i64, tpu.core_type = #tpu.core_type<tc>, window_params = [{transform_indices = @transform_0, window_bounds = array<i64: 32, 256>}, {transform_indices = @transform_1, window_bounds = array<i64: 256, 128>}, {transform_indices = @transform_2, window_bounds = array<i64: 1, 128>}, {transform_indices = @transform_3, window_bounds = array<i64: 32, 128>}, {transform_indices = @transform_4, window_bounds = array<i64: 1, 1, 128>}, {transform_indices = @transform_5, window_bounds = array<i64: 1, 1, 128>}]} {
    %c0_i32 = arith.constant 0 : i32
    %0 = arith.cmpi eq, %arg2, %c0_i32 : i32
    %1 = arith.extui %0 : i1 to i32
    %c0_i32_0 = arith.constant 0 : i32
    %2 = arith.cmpi ne, %1, %c0_i32_0 : i32
    scf.if %2 {
      %cst_10 = arith.constant 0.000000e+00 : f32
      %12 = vector.broadcast %cst_10 : f32 to vector<32x128xf32>
      %c0_11 = arith.constant 0 : index
      %c0_12 = arith.constant 0 : index
      %13 = vector.load %arg9[%c0_11, %c0_12] : memref<32x128xf32, #tpu.memory_space<vmem>>, vector<32x128xf32>
      tpu.vector_store %arg9[%c0_11, %c0_12], %12 {strides = array<i32>} : memref<32x128xf32, #tpu.memory_space<vmem>>, vector<32x128xf32>,
    } else {
    }
    %c0 = arith.constant 0 : index
    %c0_1 = arith.constant 0 : index
    %3 = vector.load %arg9[%c0, %c0_1] : memref<32x128xf32, #tpu.memory_space<vmem>>, vector<32x128xf32>
    %c0_2 = arith.constant 0 : index
    %c0_3 = arith.constant 0 : index
    %4 = vector.load %arg3[%c0_2, %c0_3] : memref<32x256xf32, #tpu.memory_space<vmem>>, vector<32x256xf32>
    %c0_4 = arith.constant 0 : index
    %c0_5 = arith.constant 0 : index
    %5 = vector.load %arg4[%c0_4, %c0_5] : memref<256x128xf32, #tpu.memory_space<vmem>>, vector<256x128xf32>
    %cst = arith.constant dense<0.000000e+00> : vector<32x128xf32>
    %6 = tpu.matmul %4, %5, %cst {dimension_numbers = #tpu.dot_dimension_numbers<[1], [0], [0], [1], [0, 0, 1, 1], [], []>} : vector<32x256xf32>, vector<256x128xf32>, vector<32x128xf32> -> vector<32x128xf32>
    %7 = arith.addf %3, %6 : vector<32x128xf32>
    %c0_6 = arith.constant 0 : index
    %c0_7 = arith.constant 0 : index
    %8 = vector.load %arg9[%c0_6, %c0_7] : memref<32x128xf32, #tpu.memory_space<vmem>>, vector<32x128xf32>
    tpu.vector_store %arg9[%c0_6, %c0_7], %7 {strides = array<i32>} : memref<32x128xf32, #tpu.memory_space<vmem>>, vector<32x128xf32>,
    %c0_i32_8 = arith.constant 0 : i32
    %9 = arith.cmpi eq, %arg2, %c0_i32_8 : i32
    %10 = arith.extui %9 : i1 to i32
    %c0_i32_9 = arith.constant 0 : i32
    %11 = arith.cmpi ne, %10, %c0_i32_9 : i32
    scf.if %11 {
      %c0_10 = arith.constant 0 : index
      %c0_11 = arith.constant 0 : index
      %12 = vector.load %arg9[%c0_10, %c0_11] : memref<32x128xf32, #tpu.memory_space<vmem>>, vector<32x128xf32>
      %c0_12 = arith.constant 0 : index
      %c0_13 = arith.constant 0 : index
      %13 = vector.load %arg5[%c0_12, %c0_13] : memref<1x128xf32, #tpu.memory_space<vmem>>, vector<1x128xf32>
      %14 = vector.broadcast %13 : vector<1x128xf32> to vector<32x128xf32>
      %15 = arith.addf %12, %14 : vector<32x128xf32>
      %cst_14 = arith.constant dense<0.000000e+00> : vector<128xf32>
      %16 = vector.multi_reduction <add>, %15, %cst_14 [0] : vector<32x128xf32> to vector<128xf32>
      %17 = vector.shape_cast %16 : vector<128xf32> to vector<1x1x128xf32>
      %c0_15 = arith.constant 0 : index
      %c0_16 = arith.constant 0 : index
      %c0_17 = arith.constant 0 : index
      %18 = vector.load %arg7[%c0_15, %c0_16, %c0_17] : memref<1x1x128xf32, #tpu.memory_space<vmem>>, vector<1x1x128xf32>
      tpu.vector_store %arg7[%c0_15, %c0_16, %c0_17], %17 {strides = array<i32>} : memref<1x1x128xf32, #tpu.memory_space<vmem>>, vector<1x1x128xf32>,
      %19 = arith.mulf %15, %15 : vector<32x128xf32>
      %cst_18 = arith.constant dense<0.000000e+00> : vector<128xf32>
      %20 = vector.multi_reduction <add>, %19, %cst_18 [0] : vector<32x128xf32> to vector<128xf32>
      %21 = vector.shape_cast %20 : vector<128xf32> to vector<1x1x128xf32>
      %c0_19 = arith.constant 0 : index
      %c0_20 = arith.constant 0 : index
      %c0_21 = arith.constant 0 : index
      %22 = vector.load %arg8[%c0_19, %c0_20, %c0_21] : memref<1x1x128xf32, #tpu.memory_space<vmem>>, vector<1x1x128xf32>
      tpu.vector_store %arg8[%c0_19, %c0_20, %c0_21], %21 {strides = array<i32>} : memref<1x1x128xf32, #tpu.memory_space<vmem>>, vector<1x1x128xf32>,
      %c0_22 = arith.constant 0 : index
      %c0_23 = arith.constant 0 : index
      %23 = vector.load %arg6[%c0_22, %c0_23] : memref<32x128xf32, #tpu.memory_space<vmem>>, vector<32x128xf32>
      tpu.vector_store %arg6[%c0_22, %c0_23], %15 {strides = array<i32>} : memref<32x128xf32, #tpu.memory_space<vmem>>, vector<32x128xf32>,
    } else {
    }
    return
  }
  func.func @transform_0(%arg0: i32, %arg1: i32, %arg2: i32) -> (i32, i32) {
    %c0_i32 = arith.constant 0 : i32
    return %arg0, %arg2 : i32, i32
  }
  func.func @transform_1(%arg0: i32, %arg1: i32, %arg2: i32) -> (i32, i32) {
    %c0_i32 = arith.constant 0 : i32
    return %arg2, %arg1 : i32, i32
  }
  func.func @transform_2(%arg0: i32, %arg1: i32, %arg2: i32) -> (i32, i32) {
    %c0_i32 = arith.constant 0 : i32
    %c0_i32_0 = arith.constant 0 : i32
    return %c0_i32, %arg1 : i32, i32
  }
  func.func @transform_3(%arg0: i32, %arg1: i32, %arg2: i32) -> (i32, i32) {
    %c0_i32 = arith.constant 0 : i32
    return %arg0, %arg1 : i32, i32
  }
  func.func @transform_4(%arg0: i32, %arg1: i32, %arg2: i32) -> (i32, i32, i32) {
    %c0_i32 = arith.constant 0 : i32
    %c0_i32_0 = arith.constant 0 : i32
    return %arg0, %c0_i32, %arg1 : i32, i32, i32
  }
  func.func @transform_5(%arg0: i32, %arg1: i32, %arg2: i32) -> (i32, i32, i32) {
    %c0_i32 = arith.constant 0 : i32
    %c0_i32_0 = arith.constant 0 : i32
    return %arg0, %c0_i32, %arg1 : i32, i32, i32
  }
}

module attributes {stable_mosaic.version = 11 : i64} {
  func.func @kernel(%arg0: i32, %arg1: memref<32x128xf32, #tpu.memory_space<vmem>>, %arg2: memref<1x128xf32, #tpu.memory_space<vmem>>, %arg3: memref<1x128xf32, #tpu.memory_space<vmem>>, %arg4: memref<32x128xf32, #tpu.memory_space<vmem>>) attributes {dimension_semantics = [#tpu.dimension_semantics<parallel>], iteration_bounds = array<i64: 1>, scalar_prefetch = 0 : i64, scratch_operands = 0 : i64, tpu.core_type = #tpu.core_type<tc>, window_params = [{transform_indices = @transform_0, window_bounds = array<i64: 32, 128>}, {pipeline_mode = #tpu.pipeline_mode<synchronous>, transform_indices = @transform_1, window_bounds = array<i64: 1, 128>}, {pipeline_mode = #tpu.pipeline_mode<synchronous>, transform_indices = @transform_2, window_bounds = array<i64: 1, 128>}, {transform_indices = @transform_3, window_bounds = array<i64: 32, 128>}]} {
    %c0 = arith.constant 0 : index
    %c0_0 = arith.constant 0 : index
    %0 = vector.load %arg1[%c0, %c0_0] : memref<32x128xf32, #tpu.memory_space<vmem>>, vector<32x128xf32>
    %c0_1 = arith.constant 0 : index
    %c0_2 = arith.constant 0 : index
    %1 = vector.load %arg2[%c0_1, %c0_2] : memref<1x128xf32, #tpu.memory_space<vmem>>, vector<1x128xf32>
    %2 = vector.broadcast %1 : vector<1x128xf32> to vector<32x128xf32>
    %3 = arith.mulf %0, %2 : vector<32x128xf32>
    %c0_3 = arith.constant 0 : index
    %c0_4 = arith.constant 0 : index
    %4 = vector.load %arg3[%c0_3, %c0_4] : memref<1x128xf32, #tpu.memory_space<vmem>>, vector<1x128xf32>
    %5 = vector.broadcast %4 : vector<1x128xf32> to vector<32x128xf32>
    %6 = arith.addf %3, %5 : vector<32x128xf32>
    %cst = arith.constant 0.000000e+00 : f32
    %7 = vector.broadcast %cst : f32 to vector<32x128xf32>
    %8 = arith.cmpf oge, %6, %7 : vector<32x128xf32>
    %cst_5 = arith.constant 2.000000e-01 : f32
    %9 = vector.broadcast %cst_5 : f32 to vector<32x128xf32>
    %10 = arith.mulf %9, %6 : vector<32x128xf32>
    %11 = arith.select %8, %6, %10 : vector<32x128xi1>, vector<32x128xf32>
    %c0_6 = arith.constant 0 : index
    %c0_7 = arith.constant 0 : index
    %12 = vector.load %arg4[%c0_6, %c0_7] : memref<32x128xf32, #tpu.memory_space<vmem>>, vector<32x128xf32>
    tpu.vector_store %arg4[%c0_6, %c0_7], %11 {strides = array<i32>} : memref<32x128xf32, #tpu.memory_space<vmem>>, vector<32x128xf32>,
    return
  }
  func.func @transform_0(%arg0: i32) -> (i32, i32) {
    %c0_i32 = arith.constant 0 : i32
    %c0_i32_0 = arith.constant 0 : i32
    return %arg0, %c0_i32 : i32, i32
  }
  func.func @transform_1(%arg0: i32) -> (i32, i32) {
    %c0_i32 = arith.constant 0 : i32
    %c0_i32_0 = arith.constant 0 : i32
    %c0_i32_1 = arith.constant 0 : i32
    return %c0_i32, %c0_i32_0 : i32, i32
  }
  func.func @transform_2(%arg0: i32) -> (i32, i32) {
    %c0_i32 = arith.constant 0 : i32
    %c0_i32_0 = arith.constant 0 : i32
    %c0_i32_1 = arith.constant 0 : i32
    return %c0_i32, %c0_i32_0 : i32, i32
  }
  func.func @transform_3(%arg0: i32) -> (i32, i32) {
    %c0_i32 = arith.constant 0 : i32
    %c0_i32_0 = arith.constant 0 : i32
    return %arg0, %c0_i32 : i32, i32
  }
}

module attributes {stable_mosaic.version = 11 : i64} {
  func.func @kernel(%arg0: i32, %arg1: i32, %arg2: i32, %arg3: memref<32x512xf32, #tpu.memory_space<vmem>>, %arg4: memref<512x128xf32, #tpu.memory_space<vmem>>, %arg5: memref<1x128xf32, #tpu.memory_space<vmem>>, %arg6: memref<32x128xf32, #tpu.memory_space<vmem>>, %arg7: memref<1x1x128xf32, #tpu.memory_space<vmem>>, %arg8: memref<1x1x128xf32, #tpu.memory_space<vmem>>, %arg9: memref<32x128xf32, #tpu.memory_space<vmem>>) attributes {dimension_semantics = [#tpu.dimension_semantics<parallel>, #tpu.dimension_semantics<parallel>, #tpu.dimension_semantics<arbitrary>], iteration_bounds = array<i64: 1, 1, 1>, scalar_prefetch = 0 : i64, scratch_operands = 1 : i64, tpu.core_type = #tpu.core_type<tc>, window_params = [{transform_indices = @transform_0, window_bounds = array<i64: 32, 512>}, {transform_indices = @transform_1, window_bounds = array<i64: 512, 128>}, {transform_indices = @transform_2, window_bounds = array<i64: 1, 128>}, {transform_indices = @transform_3, window_bounds = array<i64: 32, 128>}, {transform_indices = @transform_4, window_bounds = array<i64: 1, 1, 128>}, {transform_indices = @transform_5, window_bounds = array<i64: 1, 1, 128>}]} {
    %c0_i32 = arith.constant 0 : i32
    %0 = arith.cmpi eq, %arg2, %c0_i32 : i32
    %1 = arith.extui %0 : i1 to i32
    %c0_i32_0 = arith.constant 0 : i32
    %2 = arith.cmpi ne, %1, %c0_i32_0 : i32
    scf.if %2 {
      %cst_10 = arith.constant 0.000000e+00 : f32
      %12 = vector.broadcast %cst_10 : f32 to vector<32x128xf32>
      %c0_11 = arith.constant 0 : index
      %c0_12 = arith.constant 0 : index
      %13 = vector.load %arg9[%c0_11, %c0_12] : memref<32x128xf32, #tpu.memory_space<vmem>>, vector<32x128xf32>
      tpu.vector_store %arg9[%c0_11, %c0_12], %12 {strides = array<i32>} : memref<32x128xf32, #tpu.memory_space<vmem>>, vector<32x128xf32>,
    } else {
    }
    %c0 = arith.constant 0 : index
    %c0_1 = arith.constant 0 : index
    %3 = vector.load %arg9[%c0, %c0_1] : memref<32x128xf32, #tpu.memory_space<vmem>>, vector<32x128xf32>
    %c0_2 = arith.constant 0 : index
    %c0_3 = arith.constant 0 : index
    %4 = vector.load %arg3[%c0_2, %c0_3] : memref<32x512xf32, #tpu.memory_space<vmem>>, vector<32x512xf32>
    %c0_4 = arith.constant 0 : index
    %c0_5 = arith.constant 0 : index
    %5 = vector.load %arg4[%c0_4, %c0_5] : memref<512x128xf32, #tpu.memory_space<vmem>>, vector<512x128xf32>
    %cst = arith.constant dense<0.000000e+00> : vector<32x128xf32>
    %6 = tpu.matmul %4, %5, %cst {dimension_numbers = #tpu.dot_dimension_numbers<[1], [0], [0], [1], [0, 0, 1, 1], [], []>} : vector<32x512xf32>, vector<512x128xf32>, vector<32x128xf32> -> vector<32x128xf32>
    %7 = arith.addf %3, %6 : vector<32x128xf32>
    %c0_6 = arith.constant 0 : index
    %c0_7 = arith.constant 0 : index
    %8 = vector.load %arg9[%c0_6, %c0_7] : memref<32x128xf32, #tpu.memory_space<vmem>>, vector<32x128xf32>
    tpu.vector_store %arg9[%c0_6, %c0_7], %7 {strides = array<i32>} : memref<32x128xf32, #tpu.memory_space<vmem>>, vector<32x128xf32>,
    %c0_i32_8 = arith.constant 0 : i32
    %9 = arith.cmpi eq, %arg2, %c0_i32_8 : i32
    %10 = arith.extui %9 : i1 to i32
    %c0_i32_9 = arith.constant 0 : i32
    %11 = arith.cmpi ne, %10, %c0_i32_9 : i32
    scf.if %11 {
      %c0_10 = arith.constant 0 : index
      %c0_11 = arith.constant 0 : index
      %12 = vector.load %arg9[%c0_10, %c0_11] : memref<32x128xf32, #tpu.memory_space<vmem>>, vector<32x128xf32>
      %c0_12 = arith.constant 0 : index
      %c0_13 = arith.constant 0 : index
      %13 = vector.load %arg5[%c0_12, %c0_13] : memref<1x128xf32, #tpu.memory_space<vmem>>, vector<1x128xf32>
      %14 = vector.broadcast %13 : vector<1x128xf32> to vector<32x128xf32>
      %15 = arith.addf %12, %14 : vector<32x128xf32>
      %cst_14 = arith.constant dense<0.000000e+00> : vector<128xf32>
      %16 = vector.multi_reduction <add>, %15, %cst_14 [0] : vector<32x128xf32> to vector<128xf32>
      %17 = vector.shape_cast %16 : vector<128xf32> to vector<1x1x128xf32>
      %c0_15 = arith.constant 0 : index
      %c0_16 = arith.constant 0 : index
      %c0_17 = arith.constant 0 : index
      %18 = vector.load %arg7[%c0_15, %c0_16, %c0_17] : memref<1x1x128xf32, #tpu.memory_space<vmem>>, vector<1x1x128xf32>
      tpu.vector_store %arg7[%c0_15, %c0_16, %c0_17], %17 {strides = array<i32>} : memref<1x1x128xf32, #tpu.memory_space<vmem>>, vector<1x1x128xf32>,
      %19 = arith.mulf %15, %15 : vector<32x128xf32>
      %cst_18 = arith.constant dense<0.000000e+00> : vector<128xf32>
      %20 = vector.multi_reduction <add>, %19, %cst_18 [0] : vector<32x128xf32> to vector<128xf32>
      %21 = vector.shape_cast %20 : vector<128xf32> to vector<1x1x128xf32>
      %c0_19 = arith.constant 0 : index
      %c0_20 = arith.constant 0 : index
      %c0_21 = arith.constant 0 : index
      %22 = vector.load %arg8[%c0_19, %c0_20, %c0_21] : memref<1x1x128xf32, #tpu.memory_space<vmem>>, vector<1x1x128xf32>
      tpu.vector_store %arg8[%c0_19, %c0_20, %c0_21], %21 {strides = array<i32>} : memref<1x1x128xf32, #tpu.memory_space<vmem>>, vector<1x1x128xf32>,
      %c0_22 = arith.constant 0 : index
      %c0_23 = arith.constant 0 : index
      %23 = vector.load %arg6[%c0_22, %c0_23] : memref<32x128xf32, #tpu.memory_space<vmem>>, vector<32x128xf32>
      tpu.vector_store %arg6[%c0_22, %c0_23], %15 {strides = array<i32>} : memref<32x128xf32, #tpu.memory_space<vmem>>, vector<32x128xf32>,
    } else {
    }
    return
  }
  func.func @transform_0(%arg0: i32, %arg1: i32, %arg2: i32) -> (i32, i32) {
    %c0_i32 = arith.constant 0 : i32
    return %arg0, %arg2 : i32, i32
  }
  func.func @transform_1(%arg0: i32, %arg1: i32, %arg2: i32) -> (i32, i32) {
    %c0_i32 = arith.constant 0 : i32
    return %arg2, %arg1 : i32, i32
  }
  func.func @transform_2(%arg0: i32, %arg1: i32, %arg2: i32) -> (i32, i32) {
    %c0_i32 = arith.constant 0 : i32
    %c0_i32_0 = arith.constant 0 : i32
    return %c0_i32, %arg1 : i32, i32
  }
  func.func @transform_3(%arg0: i32, %arg1: i32, %arg2: i32) -> (i32, i32) {
    %c0_i32 = arith.constant 0 : i32
    return %arg0, %arg1 : i32, i32
  }
  func.func @transform_4(%arg0: i32, %arg1: i32, %arg2: i32) -> (i32, i32, i32) {
    %c0_i32 = arith.constant 0 : i32
    %c0_i32_0 = arith.constant 0 : i32
    return %arg0, %c0_i32, %arg1 : i32, i32, i32
  }
  func.func @transform_5(%arg0: i32, %arg1: i32, %arg2: i32) -> (i32, i32, i32) {
    %c0_i32 = arith.constant 0 : i32
    %c0_i32_0 = arith.constant 0 : i32
    return %arg0, %c0_i32, %arg1 : i32, i32, i32
  }
}

module attributes {stable_mosaic.version = 11 : i64} {
  func.func @kernel(%arg0: i32, %arg1: i32, %arg2: i32, %arg3: memref<16x1024xf32, #tpu.memory_space<vmem>>, %arg4: memref<1024x128xf32, #tpu.memory_space<vmem>>, %arg5: memref<1x128xf32, #tpu.memory_space<vmem>>, %arg6: memref<16x128xf32, #tpu.memory_space<vmem>>, %arg7: memref<16x128xf32, #tpu.memory_space<vmem>>) attributes {dimension_semantics = [#tpu.dimension_semantics<parallel>, #tpu.dimension_semantics<parallel>, #tpu.dimension_semantics<arbitrary>], iteration_bounds = array<i64: 1, 1, 1>, scalar_prefetch = 0 : i64, scratch_operands = 1 : i64, tpu.core_type = #tpu.core_type<tc>, window_params = [{transform_indices = @transform_0, window_bounds = array<i64: 16, 1024>}, {transform_indices = @transform_1, window_bounds = array<i64: 1024, 128>}, {transform_indices = @transform_2, window_bounds = array<i64: 1, 128>}, {transform_indices = @transform_3, window_bounds = array<i64: 16, 128>}]} {
    %c0_i32 = arith.constant 0 : i32
    %0 = arith.cmpi eq, %arg2, %c0_i32 : i32
    %1 = arith.extui %0 : i1 to i32
    %c0_i32_0 = arith.constant 0 : i32
    %2 = arith.cmpi ne, %1, %c0_i32_0 : i32
    scf.if %2 {
      %cst_10 = arith.constant 0.000000e+00 : f32
      %12 = vector.broadcast %cst_10 : f32 to vector<16x128xf32>
      %c0_11 = arith.constant 0 : index
      %c0_12 = arith.constant 0 : index
      %13 = vector.load %arg7[%c0_11, %c0_12] : memref<16x128xf32, #tpu.memory_space<vmem>>, vector<16x128xf32>
      tpu.vector_store %arg7[%c0_11, %c0_12], %12 {strides = array<i32>} : memref<16x128xf32, #tpu.memory_space<vmem>>, vector<16x128xf32>,
    } else {
    }
    %c0 = arith.constant 0 : index
    %c0_1 = arith.constant 0 : index
    %3 = vector.load %arg7[%c0, %c0_1] : memref<16x128xf32, #tpu.memory_space<vmem>>, vector<16x128xf32>
    %c0_2 = arith.constant 0 : index
    %c0_3 = arith.constant 0 : index
    %4 = vector.load %arg3[%c0_2, %c0_3] : memref<16x1024xf32, #tpu.memory_space<vmem>>, vector<16x1024xf32>
    %c0_4 = arith.constant 0 : index
    %c0_5 = arith.constant 0 : index
    %5 = vector.load %arg4[%c0_4, %c0_5] : memref<1024x128xf32, #tpu.memory_space<vmem>>, vector<1024x128xf32>
    %cst = arith.constant dense<0.000000e+00> : vector<16x128xf32>
    %6 = tpu.matmul %4, %5, %cst {dimension_numbers = #tpu.dot_dimension_numbers<[1], [0], [0], [1], [0, 0, 1, 1], [], []>} : vector<16x1024xf32>, vector<1024x128xf32>, vector<16x128xf32> -> vector<16x128xf32>
    %7 = arith.addf %3, %6 : vector<16x128xf32>
    %c0_6 = arith.constant 0 : index
    %c0_7 = arith.constant 0 : index
    %8 = vector.load %arg7[%c0_6, %c0_7] : memref<16x128xf32, #tpu.memory_space<vmem>>, vector<16x128xf32>
    tpu.vector_store %arg7[%c0_6, %c0_7], %7 {strides = array<i32>} : memref<16x128xf32, #tpu.memory_space<vmem>>, vector<16x128xf32>,
    %c0_i32_8 = arith.constant 0 : i32
    %9 = arith.cmpi eq, %arg2, %c0_i32_8 : i32
    %10 = arith.extui %9 : i1 to i32
    %c0_i32_9 = arith.constant 0 : i32
    %11 = arith.cmpi ne, %10, %c0_i32_9 : i32
    scf.if %11 {
      %c0_10 = arith.constant 0 : index
      %c0_11 = arith.constant 0 : index
      %12 = vector.load %arg7[%c0_10, %c0_11] : memref<16x128xf32, #tpu.memory_space<vmem>>, vector<16x128xf32>
      %c0_12 = arith.constant 0 : index
      %c0_13 = arith.constant 0 : index
      %13 = vector.load %arg5[%c0_12, %c0_13] : memref<1x128xf32, #tpu.memory_space<vmem>>, vector<1x128xf32>
      %14 = vector.broadcast %13 : vector<1x128xf32> to vector<16x128xf32>
      %15 = arith.addf %12, %14 : vector<16x128xf32>
      %c0_14 = arith.constant 0 : index
      %c0_15 = arith.constant 0 : index
      %16 = vector.load %arg6[%c0_14, %c0_15] : memref<16x128xf32, #tpu.memory_space<vmem>>, vector<16x128xf32>
      tpu.vector_store %arg6[%c0_14, %c0_15], %15 {strides = array<i32>} : memref<16x128xf32, #tpu.memory_space<vmem>>, vector<16x128xf32>,
    } else {
    }
    return
  }
  func.func @transform_0(%arg0: i32, %arg1: i32, %arg2: i32) -> (i32, i32) {
    %c0_i32 = arith.constant 0 : i32
    return %arg0, %arg2 : i32, i32
  }
  func.func @transform_1(%arg0: i32, %arg1: i32, %arg2: i32) -> (i32, i32) {
    %c0_i32 = arith.constant 0 : i32
    return %arg2, %arg1 : i32, i32
  }
  func.func @transform_2(%arg0: i32, %arg1: i32, %arg2: i32) -> (i32, i32) {
    %c0_i32 = arith.constant 0 : i32
    %c0_i32_0 = arith.constant 0 : i32
    return %c0_i32, %arg1 : i32, i32
  }
  func.func @transform_3(%arg0: i32, %arg1: i32, %arg2: i32) -> (i32, i32) {
    %c0_i32 = arith.constant 0 : i32
    return %arg0, %arg1 : i32, i32
  }
}

</mosaic_0001>

<bundles_post_ra>
// kernel: _lambda_.8
= control target key start
LH: loop header
LB: loop body
LE: loop exit
PB: predicated region body
PF: predicated region fallthrough
CT: control target
= control target key end

     0   :  { %s1915_s1 = inlined_call_operand.vmem [shape: f32[128,128], index: 1, kind: input, shape index: {}]   ;;  %s1916_s0 = inlined_call_operand.vmem [shape: f32[512,128], index: 0, kind: input, shape index: {}]   ;;  %s1917_s2 = inlined_call_operand.vmem [shape: f32[1,128], index: 2, kind: input, shape index: {}]   ;;  %s1918_s3 = inlined_call_operand.vmem [shape: f32[512,128], index: 3, kind: output, shape index: {}]  }
   0x1   :  { %v210_v0 = vld [vmem:[%s1915_s1] sm:$0xff]  ;;  %v211_v1 = vld [vmem:[%s1915_s1 + $0x8] sm:$0xff]  ;;  %v212_v2 = vld [vmem:[%s1915_s1 + $0x10] sm:$0xff] }
   0x2   :  { %v1346_v3 = vpack.c.bf16 %v211_v1, %v210_v0  ;;  %v213_v4 = vld [vmem:[%s1915_s1 + $0x18] sm:$0xff]  ;;  %v214_v6 = vld [vmem:[%s1915_s1 + $0x20] sm:$0xff]  ;;  %v215_v7 = vld [vmem:[%s1915_s1 + $0x28] sm:$0xff] }
   0x3   :  { %v1350_v5 = vpack.c.bf16 %v213_v4, %v212_v2  ;;  %v1354_v8 = vpack.c.bf16 %v215_v7, %v214_v6  ;;  %v146_v9 = vld [vmem:[%s1916_s0] sm:$0xff]  ;;  %v216_v11 = vld [vmem:[%s1915_s1 + $0x30] sm:$0xff]  ;;  %v217_v12 = vld [vmem:[%s1915_s1 + $0x38] sm:$0xff] }
   0x4   :  { %1347 = vmatprep.subr.bf16.mxu0 %v1346_v3  ;;  %1378 = vmatprep.subr.bf16.mxu1 %v1346_v3  ;;  %v178_v10 = vld [vmem:[%s1916_s0 + $0x100] sm:$0xff]  ;;  %v1358_v13 = vpack.c.bf16 %v217_v12, %v216_v11  ;;  %v219_v15 = vld [vmem:[%s1915_s1 + $0x48] sm:$0xff]  ;;  %v220_v17 = vld [vmem:[%s1915_s1 + $0x50] sm:$0xff] }
   0x5   :  { %1349 = vmatpush3.bf16.msra.mxu0 %v1346_v3  ;;  %1386 = vmatpush3.bf16.msra.mxu1 %v1346_v3  ;;  %v218_v14 = vld [vmem:[%s1915_s1 + $0x40] sm:$0xff]  ;;  %v221_v18 = vld [vmem:[%s1915_s1 + $0x58] sm:$0xff]  ;;  %v223_v21 = vld [vmem:[%s1915_s1 + $0x68] sm:$0xff] }
   0x6   :  { %1351 = vmatprep.subr.bf16.mxu0 %v1350_v5  ;;  %1379 = vmatprep.subr.bf16.mxu1 %v1350_v5  ;;  %v1362_v16 = vpack.c.bf16 %v219_v15, %v218_v14  ;;  %v1366_v19 = vpack.c.bf16 %v221_v18, %v220_v17  ;;  %v222_v20 = vld [vmem:[%s1915_s1 + $0x60] sm:$0xff]  ;;  %v224_v23 = vld [vmem:[%s1915_s1 + $0x70] sm:$0xff]  ;;  %v225_v24 = vld [vmem:[%s1915_s1 + $0x78] sm:$0xff] }
   0x7   :  { %1250 = vmatprep.mubr.f32.mxu0 %v146_v9  ;;  %1298 = vmatprep.mubr.f32.mxu1 %v178_v10  ;;  %v1370_v22 = vpack.c.bf16 %v223_v21, %v222_v20  ;;  %v1374_v25 = vpack.c.bf16 %v225_v24, %v224_v23  ;;  %v147_v26 = vld [vmem:[%s1916_s0 + $0x8] sm:$0xff]  ;;  %v148_v28 = vld [vmem:[%s1916_s0 + $0x10] sm:$0xff]  ;;  %v149_v30 = vld [vmem:[%s1916_s0 + $0x18] sm:$0xff] }
   0x8   :  { %v179_v27 = vld [vmem:[%s1916_s0 + $0x108] sm:$0xff]  ;;  %v180_v29 = vld [vmem:[%s1916_s0 + $0x110] sm:$0xff]  ;;  %v181_v31 = vld [vmem:[%s1916_s0 + $0x118] sm:$0xff] }
   0x9   :  { %1353 = vmatpush3.bf16.msra.mxu0 %v1350_v5  ;;  %1387 = vmatpush3.bf16.msra.mxu1 %v1350_v5  ;;  %v150_v32 = vld [vmem:[%s1916_s0 + $0x20] sm:$0xff]  ;;  %v151_v34 = vld [vmem:[%s1916_s0 + $0x28] sm:$0xff]  ;;  %v152_v36 = vld [vmem:[%s1916_s0 + $0x30] sm:$0xff] }
   0xa   :  { %1355 = vmatprep.subr.bf16.mxu0 %v1354_v8  ;;  %1380 = vmatprep.subr.bf16.mxu1 %v1354_v8  ;;  %v182_v33 = vld [vmem:[%s1916_s0 + $0x120] sm:$0xff]  ;;  %v183_v35 = vld [vmem:[%s1916_s0 + $0x128] sm:$0xff]  ;;  %v184_v37 = vld [vmem:[%s1916_s0 + $0x130] sm:$0xff] }
   0xb   :  { %v153_v38 = vld [vmem:[%s1916_s0 + $0x38] sm:$0xff]  ;;  %v154_v40 = vld [vmem:[%s1916_s0 + $0x40] sm:$0xff]  ;;  %v155_v42 = vld [vmem:[%s1916_s0 + $0x48] sm:$0xff] }
   0xc   :  { %v185_v39 = vld [vmem:[%s1916_s0 + $0x138] sm:$0xff]  ;;  %v186_v41 = vld [vmem:[%s1916_s0 + $0x140] sm:$0xff]  ;;  %v187_v43 = vld [vmem:[%s1916_s0 + $0x148] sm:$0xff] }
   0xd   :  { %1357 = vmatpush3.bf16.msra.mxu0 %v1354_v8  ;;  %1388 = vmatpush3.bf16.msra.mxu1 %v1354_v8  ;;  %v156_v44 = vld [vmem:[%s1916_s0 + $0x50] sm:$0xff]  ;;  %v157_v46 = vld [vmem:[%s1916_s0 + $0x58] sm:$0xff]  ;;  %v158_v48 = vld [vmem:[%s1916_s0 + $0x60] sm:$0xff] }
   0xe   :  { %1359 = vmatprep.subr.bf16.mxu0 %v1358_v13  ;;  %1381 = vmatprep.subr.bf16.mxu1 %v1358_v13  ;;  %v188_v45 = vld [vmem:[%s1916_s0 + $0x150] sm:$0xff]  ;;  %v189_v47 = vld [vmem:[%s1916_s0 + $0x158] sm:$0xff]  ;;  %v190_v49 = vld [vmem:[%s1916_s0 + $0x160] sm:$0xff] }
   0xf   :  { %v159_v50 = vld [vmem:[%s1916_s0 + $0x68] sm:$0xff]  ;;  %v160_v52 = vld [vmem:[%s1916_s0 + $0x70] sm:$0xff]  ;;  %v161_v54 = vld [vmem:[%s1916_s0 + $0x78] sm:$0xff] }
  0x10   :  { %v191_v51 = vld [vmem:[%s1916_s0 + $0x168] sm:$0xff]  ;;  %v192_v53 = vld [vmem:[%s1916_s0 + $0x170] sm:$0xff]  ;;  %v193_v55 = vld [vmem:[%s1916_s0 + $0x178] sm:$0xff] }
  0x11   :  { %1361 = vmatpush3.bf16.msra.mxu0 %v1358_v13  ;;  %1389 = vmatpush3.bf16.msra.mxu1 %v1358_v13  ;;  %v162_v56 = vld [vmem:[%s1916_s0 + $0x80] sm:$0xff]  ;;  %v163_v58 = vld [vmem:[%s1916_s0 + $0x88] sm:$0xff]  ;;  %v164_v60 = vld [vmem:[%s1916_s0 + $0x90] sm:$0xff] }
  0x12   :  { %1363 = vmatprep.subr.bf16.mxu0 %v1362_v16  ;;  %1382 = vmatprep.subr.bf16.mxu1 %v1362_v16  ;;  %v194_v57 = vld [vmem:[%s1916_s0 + $0x180] sm:$0xff]  ;;  %v195_v59 = vld [vmem:[%s1916_s0 + $0x188] sm:$0xff]  ;;  %v196_v61 = vld [vmem:[%s1916_s0 + $0x190] sm:$0xff] }
  0x13   :  { %v165_v62 = vld [vmem:[%s1916_s0 + $0x98] sm:$0xff]  ;;  %v166_v0 = vld [vmem:[%s1916_s0 + $0xa0] sm:$0xff]  ;;  %v167_v2 = vld [vmem:[%s1916_s0 + $0xa8] sm:$0xff] }
  0x14   :  { %v197_v63 = vld [vmem:[%s1916_s0 + $0x198] sm:$0xff]  ;;  %v198_v1 = vld [vmem:[%s1916_s0 + $0x1a0] sm:$0xff]  ;;  %v199_v3 = vld [vmem:[%s1916_s0 + $0x1a8] sm:$0xff] }
  0x15   :  { %1365 = vmatpush3.bf16.msra.mxu0 %v1362_v16  ;;  %1390 = vmatpush3.bf16.msra.mxu1 %v1362_v16  ;;  %v168_v4 = vld [vmem:[%s1916_s0 + $0xb0] sm:$0xff]  ;;  %v169_v6 = vld [vmem:[%s1916_s0 + $0xb8] sm:$0xff]  ;;  %v170_v8 = vld [vmem:[%s1916_s0 + $0xc0] sm:$0xff] }
  0x16   :  { %1367 = vmatprep.subr.bf16.mxu0 %v1366_v19  ;;  %1383 = vmatprep.subr.bf16.mxu1 %v1366_v19  ;;  %v200_v5 = vld [vmem:[%s1916_s0 + $0x1b0] sm:$0xff]  ;;  %v201_v7 = vld [vmem:[%s1916_s0 + $0x1b8] sm:$0xff]  ;;  %v202_v9 = vld [vmem:[%s1916_s0 + $0x1c0] sm:$0xff] }
  0x17   :  { %v171_v10 = vld [vmem:[%s1916_s0 + $0xc8] sm:$0xff]  ;;  %v172_v12 = vld [vmem:[%s1916_s0 + $0xd0] sm:$0xff]  ;;  %v173_v14 = vld [vmem:[%s1916_s0 + $0xd8] sm:$0xff] }
  0x18   :  { %v203_v11 = vld [vmem:[%s1916_s0 + $0x1c8] sm:$0xff]  ;;  %v204_v13 = vld [vmem:[%s1916_s0 + $0x1d0] sm:$0xff]  ;;  %v205_v15 = vld [vmem:[%s1916_s0 + $0x1d8] sm:$0xff] }
  0x19   :  { %1369 = vmatpush3.bf16.msra.mxu0 %v1366_v19  ;;  %1391 = vmatpush3.bf16.msra.mxu1 %v1366_v19  ;;  %v174_v16 = vld [vmem:[%s1916_s0 + $0xe0] sm:$0xff]  ;;  %v175_v18 = vld [vmem:[%s1916_s0 + $0xe8] sm:$0xff]  ;;  %v176_v20 = vld [vmem:[%s1916_s0 + $0xf0] sm:$0xff] }
  0x1a   :  { %1371 = vmatprep.subr.bf16.mxu0 %v1370_v22  ;;  %1384 = vmatprep.subr.bf16.mxu1 %v1370_v22  ;;  %v206_v17 = vld [vmem:[%s1916_s0 + $0x1e0] sm:$0xff]  ;;  %v207_v19 = vld [vmem:[%s1916_s0 + $0x1e8] sm:$0xff]  ;;  %v208_v21 = vld [vmem:[%s1916_s0 + $0x1f0] sm:$0xff] }
  0x1b   :  { %v209_v23 = vld [vmem:[%s1916_s0 + $0x1f8] sm:$0xff]  ;;  %v1657_v24 = vld [vmem:[%s1917_s2] ss:$0 sm:$0xff] }
  0x1d   :  { %1373 = vmatpush3.bf16.msra.mxu0 %v1370_v22  ;;  %1392 = vmatpush3.bf16.msra.mxu1 %v1370_v22  ;;  %v177_v22 = vld [vmem:[%s1916_s0 + $0xf8] sm:$0xff] }
  0x1e   :  { %1375 = vmatprep.subr.bf16.mxu0 %v1374_v25  ;;  %1385 = vmatprep.subr.bf16.mxu1 %v1374_v25 }
  0x21   :  { %1377 = vmatpush3.bf16.msra.mxu0 %v1374_v25  ;;  %1393 = vmatpush3.bf16.msra.mxu1 %v1374_v25 }
  0x24   :  { %1251 = vmatmul.mubr.f32.vlgmr.msra.gmra.mrb[0].mxu0 %v147_v26  ;;  %1299 = vmatmul.mubr.f32.vlgmr.msra.gmra.mrb[0].mxu1 %v179_v27 }
  0x25   :  { %1253 = vmatprep.mubr.f32.mxu0 %v148_v28  ;;  %1301 = vmatprep.mubr.f32.mxu1 %v180_v29 }
  0x28   :  { %1254 = vmatmul.mubr.f32.gmra.mrb[2].mxu0 %v149_v30  ;;  %1302 = vmatmul.mubr.f32.gmra.mrb[2].mxu1 %v181_v31 }
  0x29   :  { %1256 = vmatprep.mubr.f32.mxu0 %v150_v32  ;;  %1304 = vmatprep.mubr.f32.mxu1 %v182_v33 }
  0x2c   :  { %1257 = vmatmul.mubr.f32.gmra.mrb[4].mxu0 %v151_v34  ;;  %1305 = vmatmul.mubr.f32.gmra.mrb[4].mxu1 %v183_v35 }
  0x2d   :  { %1259 = vmatprep.mubr.f32.mxu0 %v152_v36  ;;  %1307 = vmatprep.mubr.f32.mxu1 %v184_v37 }
  0x30   :  { %1260 = vmatmul.mubr.f32.gmra.mrb[6].mxu0 %v153_v38  ;;  %1308 = vmatmul.mubr.f32.gmra.mrb[6].mxu1 %v185_v39 }
  0x31   :  { %1262 = vmatprep.mubr.f32.mxu0 %v154_v40  ;;  %1310 = vmatprep.mubr.f32.mxu1 %v186_v41 }
  0x34   :  { %1263 = vmatmul.mubr.f32.gmra.mrb[8].mxu0 %v155_v42  ;;  %1311 = vmatmul.mubr.f32.gmra.mrb[8].mxu1 %v187_v43 }
  0x35   :  { %1265 = vmatprep.mubr.f32.mxu0 %v156_v44  ;;  %1313 = vmatprep.mubr.f32.mxu1 %v188_v45 }
  0x38   :  { %1266 = vmatmul.mubr.f32.gmra.mrb[10].mxu0 %v157_v46  ;;  %1314 = vmatmul.mubr.f32.gmra.mrb[10].mxu1 %v189_v47 }
  0x39   :  { %1268 = vmatprep.mubr.f32.mxu0 %v158_v48  ;;  %1316 = vmatprep.mubr.f32.mxu1 %v190_v49 }
  0x3c   :  { %1269 = vmatmul.mubr.f32.gmra.mrb[12].mxu0 %v159_v50  ;;  %1317 = vmatmul.mubr.f32.gmra.mrb[12].mxu1 %v191_v51 }
  0x3d   :  { %1271 = vmatprep.mubr.f32.mxu0 %v160_v52  ;;  %1319 = vmatprep.mubr.f32.mxu1 %v192_v53 }
  0x40   :  { %1272 = vmatmul.mubr.f32.gmra.mrb[14].mxu0 %v161_v54  ;;  %1320 = vmatmul.mubr.f32.gmra.mrb[14].mxu1 %v193_v55 }
  0x41   :  { %1274 = vmatprep.mubr.f32.mxu0 %v162_v56  ;;  %1322 = vmatprep.mubr.f32.mxu1 %v194_v57 }
  0x44   :  { %1275 = vmatmul.mubr.f32.gmra.mrb[16].mxu0 %v163_v58  ;;  %1323 = vmatmul.mubr.f32.gmra.mrb[16].mxu1 %v195_v59 }
  0x45   :  { %1277 = vmatprep.mubr.f32.mxu0 %v164_v60  ;;  %1325 = vmatprep.mubr.f32.mxu1 %v196_v61 }
  0x48   :  { %1278 = vmatmul.mubr.f32.gmra.mrb[18].mxu0 %v165_v62  ;;  %1326 = vmatmul.mubr.f32.gmra.mrb[18].mxu1 %v197_v63 }
  0x49   :  { %1280 = vmatprep.mubr.f32.mxu0 %v166_v0  ;;  %1328 = vmatprep.mubr.f32.mxu1 %v198_v1 }
  0x4c   :  { %1281 = vmatmul.mubr.f32.gmra.mrb[20].mxu0 %v167_v2  ;;  %1329 = vmatmul.mubr.f32.gmra.mrb[20].mxu1 %v199_v3 }
  0x4d   :  { %1283 = vmatprep.mubr.f32.mxu0 %v168_v4  ;;  %1331 = vmatprep.mubr.f32.mxu1 %v200_v5 }
  0x50   :  { %1284 = vmatmul.mubr.f32.gmra.mrb[22].mxu0 %v169_v6  ;;  %1332 = vmatmul.mubr.f32.gmra.mrb[22].mxu1 %v201_v7 }
  0x51   :  { %1286 = vmatprep.mubr.f32.mxu0 %v170_v8  ;;  %1334 = vmatprep.mubr.f32.mxu1 %v202_v9 }
  0x54   :  { %1287 = vmatmul.mubr.f32.gmra.mrb[24].mxu0 %v171_v10  ;;  %1335 = vmatmul.mubr.f32.gmra.mrb[24].mxu1 %v203_v11 }
  0x55   :  { %1289 = vmatprep.mubr.f32.mxu0 %v172_v12  ;;  %1337 = vmatprep.mubr.f32.mxu1 %v204_v13 }
  0x58   :  { %1290 = vmatmul.mubr.f32.gmra.mrb[26].mxu0 %v173_v14  ;;  %1338 = vmatmul.mubr.f32.gmra.mrb[26].mxu1 %v205_v15 }
  0x59   :  { %1292 = vmatprep.mubr.f32.mxu0 %v174_v16  ;;  %1340 = vmatprep.mubr.f32.mxu1 %v206_v17 }
  0x5c   :  { %1293 = vmatmul.mubr.f32.gmra.mrb[28].mxu0 %v175_v18  ;;  %1341 = vmatmul.mubr.f32.gmra.mrb[28].mxu1 %v207_v19 }
  0x5d   :  { %1295 = vmatprep.mubr.f32.mxu0 %v176_v20  ;;  %1343 = vmatprep.mubr.f32.mxu1 %v208_v21 }
  0x60   :  { %1296 = vmatmul.mubr.f32.gmra.mrb[30].mxu0 %v177_v22  ;;  %1344 = vmatmul.mubr.f32.gmra.mrb[30].mxu1 %v209_v23 }
  0xf7   :  { %v1252_v25 = vpop.f32.mrb[0].mxu0  ;;  %v1300_v26 = vpop.f32.mrb[0].mxu1 }
  0xf8   :  { %v814_v27 = vadd.f32 %v1252_v25, %v1657_v24  ;;  %v846_v28 = vadd.f32 %v1300_v26, %v1657_v24  ;;  %v292_v29 = vpop.f32.mrb[1].mxu0  ;;  %v452_v30 = vpop.f32.mrb[1].mxu1 }
  0xf9   :  { %v813_v31 = vadd.f32 %v1657_v24, %v292_v29  ;;  %v845_v32 = vadd.f32 %v1657_v24, %v452_v30 }
  0xfa   :  { %vm878_vm0 = vcmp.ge.f32.partialorder %v814_v27, 0.0  ;;  %v942_v33 = vmul.f32 0.2, %v814_v27  ;;  %vm910_vm1 = vcmp.ge.f32.partialorder %v846_v28, 0.0  ;;  %v974_v34 = vmul.f32 0.2, %v846_v28 }
  0xfb   :  { %vm877_vm2 = vcmp.ge.f32.partialorder %v813_v31, 0.0  ;;  %v941_v35 = vmul.f32 0.2, %v813_v31  ;;  %vm909_vm3 = vcmp.ge.f32.partialorder %v845_v32, 0.0  ;;  %v973_v36 = vmul.f32 0.2, %v845_v32 }
  0xfc   :  { %v1006_v37 = vsel %vm878_vm0, %v814_v27, %v942_v33  ;;  %v1038_v38 = vsel %vm910_vm1, %v846_v28, %v974_v34  ;;  %v1255_v39 = vpop.f32.mrb[2].mxu0  ;;  %v1303_v40 = vpop.f32.mrb[2].mxu1 }
  0xfd   :  { %1070 = vst [vmem:[%s1918_s3 + $0x8] sm:$0xff] %v1006_v37  ;;  %1102 = vst [vmem:[%s1918_s3 + $0x108] sm:$0xff] %v1038_v38  ;;  %v1005_v41 = vsel %vm877_vm2, %v813_v31, %v941_v35  ;;  %v1037_v42 = vsel %vm909_vm3, %v845_v32, %v973_v36  ;;  %v816_v43 = vadd.f32 %v1255_v39, %v1657_v24  ;;  %v302_v45 = vpop.f32.mrb[3].mxu0  ;;  %v462_v46 = vpop.f32.mrb[3].mxu1 }
  0xfe   :  { %v848_v44 = vadd.f32 %v1303_v40, %v1657_v24  ;;  %1069 = vst [vmem:[%s1918_s3] sm:$0xff] %v1005_v41  ;;  %1101 = vst [vmem:[%s1918_s3 + $0x100] sm:$0xff] %v1037_v42  ;;  %v815_v47 = vadd.f32 %v1657_v24, %v302_v45  ;;  %v847_v48 = vadd.f32 %v1657_v24, %v462_v46 }
  0xff   :  { %vm880_vm4 = vcmp.ge.f32.partialorder %v816_v43, 0.0  ;;  %v944_v49 = vmul.f32 0.2, %v816_v43  ;;  %v1258_v55 = vpop.f32.mrb[4].mxu0  ;;  %v1306_v56 = vpop.f32.mrb[4].mxu1 }
 0x100   :  { %vm912_vm5 = vcmp.ge.f32.partialorder %v848_v44, 0.0  ;;  %v976_v50 = vmul.f32 0.2, %v848_v44  ;;  %vm879_vm6 = vcmp.ge.f32.partialorder %v815_v47, 0.0  ;;  %v943_v51 = vmul.f32 0.2, %v815_v47 }
 0x101   :  { %vm911_vm7 = vcmp.ge.f32.partialorder %v847_v48, 0.0  ;;  %v975_v52 = vmul.f32 0.2, %v847_v48  ;;  %v1008_v53 = vsel %vm880_vm4, %v816_v43, %v944_v49  ;;  %v818_v59 = vadd.f32 %v1258_v55, %v1657_v24  ;;  %v312_v61 = vpop.f32.mrb[5].mxu0  ;;  %v472_v62 = vpop.f32.mrb[5].mxu1 }
 0x102   :  { %v1040_v54 = vsel %vm912_vm5, %v848_v44, %v976_v50  ;;  %1072 = vst [vmem:[%s1918_s3 + $0x18] sm:$0xff] %v1008_v53  ;;  %v1007_v57 = vsel %vm879_vm6, %v815_v47, %v943_v51  ;;  %v850_v60 = vadd.f32 %v1306_v56, %v1657_v24  ;;  %v817_v63 = vadd.f32 %v1657_v24, %v312_v61 }
 0x103   :  { %1104 = vst [vmem:[%s1918_s3 + $0x118] sm:$0xff] %v1040_v54  ;;  %v1039_v58 = vsel %vm911_vm7, %v847_v48, %v975_v52  ;;  %1071 = vst [vmem:[%s1918_s3 + $0x10] sm:$0xff] %v1007_v57  ;;  %v849_v0 = vadd.f32 %v1657_v24, %v472_v62  ;;  %v1261_v1 = vpop.f32.mrb[6].mxu0  ;;  %v1309_v2 = vpop.f32.mrb[6].mxu1  ;;  %vm882_vm8 = vcmp.ge.f32.partialorder %v818_v59, 0.0 }
 0x104   :  { %1103 = vst [vmem:[%s1918_s3 + $0x110] sm:$0xff] %v1039_v58  ;;  %v946_v3 = vmul.f32 0.2, %v818_v59  ;;  %vm914_vm9 = vcmp.ge.f32.partialorder %v850_v60, 0.0  ;;  %v978_v4 = vmul.f32 0.2, %v850_v60  ;;  %v820_v9 = vadd.f32 %v1261_v1, %v1657_v24 }
 0x105   :  { %vm881_vm10 = vcmp.ge.f32.partialorder %v817_v63, 0.0  ;;  %v945_v5 = vmul.f32 0.2, %v817_v63  ;;  %vm913_vm11 = vcmp.ge.f32.partialorder %v849_v0, 0.0  ;;  %v977_v6 = vmul.f32 0.2, %v849_v0 }
 0x106   :  { %v1010_v7 = vsel %vm882_vm8, %v818_v59, %v946_v3  ;;  %v1042_v8 = vsel %vm914_vm9, %v850_v60, %v978_v4  ;;  %v852_v10 = vadd.f32 %v1309_v2, %v1657_v24  ;;  %v322_v11 = vpop.f32.mrb[7].mxu0  ;;  %v482_v12 = vpop.f32.mrb[7].mxu1  ;;  %vm884_vm12 = vcmp.ge.f32.partialorder %v820_v9, 0.0 }
 0x107   :  { %1074 = vst [vmem:[%s1918_s3 + $0x28] sm:$0xff] %v1010_v7  ;;  %1106 = vst [vmem:[%s1918_s3 + $0x128] sm:$0xff] %v1042_v8  ;;  %v1009_v13 = vsel %vm881_vm10, %v817_v63, %v945_v5  ;;  %v1041_v14 = vsel %vm913_vm11, %v849_v0, %v977_v6  ;;  %v819_v15 = vadd.f32 %v1657_v24, %v322_v11  ;;  %v1264_v17 = vpop.f32.mrb[8].mxu0  ;;  %v1312_v18 = vpop.f32.mrb[8].mxu1  ;;  %v948_v19 = vmul.f32 0.2, %v820_v9 }
 0x108   :  { %v851_v16 = vadd.f32 %v1657_v24, %v482_v12  ;;  %1073 = vst [vmem:[%s1918_s3 + $0x20] sm:$0xff] %v1009_v13  ;;  %1105 = vst [vmem:[%s1918_s3 + $0x120] sm:$0xff] %v1041_v14  ;;  %vm916_vm13 = vcmp.ge.f32.partialorder %v852_v10, 0.0  ;;  %v980_v20 = vmul.f32 0.2, %v852_v10  ;;  %v822_v26 = vadd.f32 %v1264_v17, %v1657_v24  ;;  %v332_v28 = vpop.f32.mrb[9].mxu0 }
 0x109   :  { %vm883_vm14 = vcmp.ge.f32.partialorder %v819_v15, 0.0  ;;  %v947_v21 = vmul.f32 0.2, %v819_v15  ;;  %v1012_v23 = vsel %vm884_vm12, %v820_v9, %v948_v19  ;;  %v854_v27 = vadd.f32 %v1312_v18, %v1657_v24  ;;  %v492_v29 = vpop.f32.mrb[9].mxu1 }
 0x10a   :  { %vm915_vm15 = vcmp.ge.f32.partialorder %v851_v16, 0.0  ;;  %v979_v22 = vmul.f32 0.2, %v851_v16  ;;  %v1044_v25 = vsel %vm916_vm13, %v852_v10, %v980_v20  ;;  %1076 = vst [vmem:[%s1918_s3 + $0x38] sm:$0xff] %v1012_v23  ;;  %v821_v32 = vadd.f32 %v1657_v24, %v332_v28 }
 0x10b   :  { %1108 = vst [vmem:[%s1918_s3 + $0x138] sm:$0xff] %v1044_v25  ;;  %v1011_v30 = vsel %vm883_vm14, %v819_v15, %v947_v21  ;;  %v853_v33 = vadd.f32 %v1657_v24, %v492_v29  ;;  %v1267_v34 = vpop.f32.mrb[10].mxu0  ;;  %v1315_v35 = vpop.f32.mrb[10].mxu1  ;;  %vm886_vm0 = vcmp.ge.f32.partialorder %v822_v26, 0.0  ;;  %v950_v36 = vmul.f32 0.2, %v822_v26 }
 0x10c   :  { %v1043_v31 = vsel %vm915_vm15, %v851_v16, %v979_v22  ;;  %1075 = vst [vmem:[%s1918_s3 + $0x30] sm:$0xff] %v1011_v30  ;;  %vm918_vm1 = vcmp.ge.f32.partialorder %v854_v27, 0.0  ;;  %v982_v37 = vmul.f32 0.2, %v854_v27  ;;  %vm885_vm2 = vcmp.ge.f32.partialorder %v821_v32, 0.0  ;;  %v342_v44 = vpop.f32.mrb[11].mxu0 }
 0x10d   :  { %1107 = vst [vmem:[%s1918_s3 + $0x130] sm:$0xff] %v1043_v31  ;;  %v949_v38 = vmul.f32 0.2, %v821_v32  ;;  %vm917_vm3 = vcmp.ge.f32.partialorder %v853_v33, 0.0  ;;  %v981_v39 = vmul.f32 0.2, %v853_v33  ;;  %v1014_v40 = vsel %vm886_vm0, %v822_v26, %v950_v36 }
 0x10e   :  { %v1046_v41 = vsel %vm918_vm1, %v854_v27, %v982_v37  ;;  %v824_v42 = vadd.f32 %v1267_v34, %v1657_v24  ;;  %v856_v43 = vadd.f32 %v1315_v35, %v1657_v24  ;;  %v502_v45 = vpop.f32.mrb[11].mxu1  ;;  %1078 = vst [vmem:[%s1918_s3 + $0x48] sm:$0xff] %v1014_v40  ;;  %v823_v48 = vadd.f32 %v1657_v24, %v342_v44 }
 0x10f   :  { %1110 = vst [vmem:[%s1918_s3 + $0x148] sm:$0xff] %v1046_v41  ;;  %v1013_v46 = vsel %vm885_vm2, %v821_v32, %v949_v38  ;;  %v1045_v47 = vsel %vm917_vm3, %v853_v33, %v981_v39  ;;  %v855_v49 = vadd.f32 %v1657_v24, %v502_v45  ;;  %v1270_v50 = vpop.f32.mrb[12].mxu0  ;;  %v1318_v51 = vpop.f32.mrb[12].mxu1 }
 0x110   :  { %1077 = vst [vmem:[%s1918_s3 + $0x40] sm:$0xff] %v1013_v46  ;;  %1109 = vst [vmem:[%s1918_s3 + $0x140] sm:$0xff] %v1045_v47  ;;  %vm888_vm4 = vcmp.ge.f32.partialorder %v824_v42, 0.0  ;;  %v952_v52 = vmul.f32 0.2, %v824_v42  ;;  %vm920_vm5 = vcmp.ge.f32.partialorder %v856_v43, 0.0  ;;  %v826_v58 = vadd.f32 %v1270_v50, %v1657_v24 }
 0x111   :  { %v984_v53 = vmul.f32 0.2, %v856_v43  ;;  %vm887_vm6 = vcmp.ge.f32.partialorder %v823_v48, 0.0  ;;  %v951_v54 = vmul.f32 0.2, %v823_v48  ;;  %vm919_vm7 = vcmp.ge.f32.partialorder %v855_v49, 0.0 }
 0x112   :  { %v983_v55 = vmul.f32 0.2, %v855_v49  ;;  %v1016_v56 = vsel %vm888_vm4, %v824_v42, %v952_v52  ;;  %v858_v59 = vadd.f32 %v1318_v51, %v1657_v24  ;;  %v352_v60 = vpop.f32.mrb[13].mxu0  ;;  %v512_v61 = vpop.f32.mrb[13].mxu1  ;;  %vm890_vm8 = vcmp.ge.f32.partialorder %v826_v58, 0.0 }
 0x113   :  { %v1048_v57 = vsel %vm920_vm5, %v856_v43, %v984_v53  ;;  %1080 = vst [vmem:[%s1918_s3 + $0x58] sm:$0xff] %v1016_v56  ;;  %v1015_v62 = vsel %vm887_vm6, %v823_v48, %v951_v54  ;;  %v825_v0 = vadd.f32 %v1657_v24, %v352_v60  ;;  %v857_v1 = vadd.f32 %v1657_v24, %v512_v61  ;;  %v1273_v2 = vpop.f32.mrb[14].mxu0  ;;  %v1321_v3 = vpop.f32.mrb[14].mxu1 }
 0x114   :  { %1112 = vst [vmem:[%s1918_s3 + $0x158] sm:$0xff] %v1048_v57  ;;  %v1047_v63 = vsel %vm919_vm7, %v855_v49, %v983_v55  ;;  %1079 = vst [vmem:[%s1918_s3 + $0x50] sm:$0xff] %v1015_v62  ;;  %v954_v4 = vmul.f32 0.2, %v826_v58  ;;  %vm922_vm9 = vcmp.ge.f32.partialorder %v858_v59, 0.0  ;;  %v828_v10 = vadd.f32 %v1273_v2, %v1657_v24  ;;  %v362_v12 = vpop.f32.mrb[15].mxu0 }
 0x115   :  { %1111 = vst [vmem:[%s1918_s3 + $0x150] sm:$0xff] %v1047_v63  ;;  %v986_v5 = vmul.f32 0.2, %v858_v59  ;;  %vm889_vm10 = vcmp.ge.f32.partialorder %v825_v0, 0.0  ;;  %v953_v6 = vmul.f32 0.2, %v825_v0  ;;  %v860_v11 = vadd.f32 %v1321_v3, %v1657_v24 }
 0x116   :  { %vm921_vm11 = vcmp.ge.f32.partialorder %v857_v1, 0.0  ;;  %v985_v7 = vmul.f32 0.2, %v857_v1  ;;  %v1018_v8 = vsel %vm890_vm8, %v826_v58, %v954_v4  ;;  %v522_v13 = vpop.f32.mrb[15].mxu1  ;;  %v827_v16 = vadd.f32 %v1657_v24, %v362_v12 }
 0x117   :  { %v1050_v9 = vsel %vm922_vm9, %v858_v59, %v986_v5  ;;  %1082 = vst [vmem:[%s1918_s3 + $0x68] sm:$0xff] %v1018_v8  ;;  %v1017_v14 = vsel %vm889_vm10, %v825_v0, %v953_v6  ;;  %v859_v17 = vadd.f32 %v1657_v24, %v522_v13  ;;  %v1276_v18 = vpop.f32.mrb[16].mxu0  ;;  %v1324_v19 = vpop.f32.mrb[16].mxu1  ;;  %vm892_vm12 = vcmp.ge.f32.partialorder %v828_v10, 0.0 }
 0x118   :  { %1114 = vst [vmem:[%s1918_s3 + $0x168] sm:$0xff] %v1050_v9  ;;  %v1049_v15 = vsel %vm921_vm11, %v857_v1, %v985_v7  ;;  %1081 = vst [vmem:[%s1918_s3 + $0x60] sm:$0xff] %v1017_v14  ;;  %v956_v20 = vmul.f32 0.2, %v828_v10  ;;  %vm924_vm13 = vcmp.ge.f32.partialorder %v860_v11, 0.0  ;;  %vm891_vm14 = vcmp.ge.f32.partialorder %v827_v16, 0.0 }
 0x119   :  { %1113 = vst [vmem:[%s1918_s3 + $0x160] sm:$0xff] %v1049_v15  ;;  %v988_v21 = vmul.f32 0.2, %v860_v11  ;;  %v955_v22 = vmul.f32 0.2, %v827_v16  ;;  %vm923_vm15 = vcmp.ge.f32.partialorder %v859_v17, 0.0  ;;  %v830_v27 = vadd.f32 %v1276_v18, %v1657_v24 }
 0x11a   :  { %v987_v23 = vmul.f32 0.2, %v859_v17  ;;  %v1020_v25 = vsel %vm892_vm12, %v828_v10, %v956_v20  ;;  %v862_v28 = vadd.f32 %v1324_v19, %v1657_v24  ;;  %v372_v29 = vpop.f32.mrb[17].mxu0  ;;  %v532_v30 = vpop.f32.mrb[17].mxu1 }
 0x11b   :  { %v1052_v26 = vsel %vm924_vm13, %v860_v11, %v988_v21  ;;  %1084 = vst [vmem:[%s1918_s3 + $0x78] sm:$0xff] %v1020_v25  ;;  %v1019_v31 = vsel %vm891_vm14, %v827_v16, %v955_v22  ;;  %v829_v33 = vadd.f32 %v1657_v24, %v372_v29  ;;  %v861_v34 = vadd.f32 %v1657_v24, %v532_v30  ;;  %v1279_v35 = vpop.f32.mrb[18].mxu0  ;;  %v1327_v36 = vpop.f32.mrb[18].mxu1 }
 0x11c   :  { %1116 = vst [vmem:[%s1918_s3 + $0x178] sm:$0xff] %v1052_v26  ;;  %v1051_v32 = vsel %vm923_vm15, %v859_v17, %v987_v23  ;;  %1083 = vst [vmem:[%s1918_s3 + $0x70] sm:$0xff] %v1019_v31  ;;  %vm894_vm0 = vcmp.ge.f32.partialorder %v830_v27, 0.0  ;;  %v958_v37 = vmul.f32 0.2, %v830_v27  ;;  %vm926_vm1 = vcmp.ge.f32.partialorder %v862_v28, 0.0 }
 0x11d   :  { %1115 = vst [vmem:[%s1918_s3 + $0x170] sm:$0xff] %v1051_v32  ;;  %v990_v38 = vmul.f32 0.2, %v862_v28  ;;  %vm893_vm2 = vcmp.ge.f32.partialorder %v829_v33, 0.0  ;;  %v957_v39 = vmul.f32 0.2, %v829_v33  ;;  %v832_v43 = vadd.f32 %v1279_v35, %v1657_v24 }
 0x11e   :  { %vm925_vm3 = vcmp.ge.f32.partialorder %v861_v34, 0.0  ;;  %v989_v40 = vmul.f32 0.2, %v861_v34  ;;  %v1022_v41 = vsel %vm894_vm0, %v830_v27, %v958_v37  ;;  %v864_v44 = vadd.f32 %v1327_v36, %v1657_v24  ;;  %v382_v45 = vpop.f32.mrb[19].mxu0  ;;  %v542_v46 = vpop.f32.mrb[19].mxu1 }
 0x11f   :  { %v1054_v42 = vsel %vm926_vm1, %v862_v28, %v990_v38  ;;  %1086 = vst [vmem:[%s1918_s3 + $0x88] sm:$0xff] %v1022_v41  ;;  %v1021_v47 = vsel %vm893_vm2, %v829_v33, %v957_v39  ;;  %v831_v49 = vadd.f32 %v1657_v24, %v382_v45  ;;  %v863_v50 = vadd.f32 %v1657_v24, %v542_v46  ;;  %v1282_v51 = vpop.f32.mrb[20].mxu0  ;;  %v1330_v52 = vpop.f32.mrb[20].mxu1 }
 0x120   :  { %1118 = vst [vmem:[%s1918_s3 + $0x188] sm:$0xff] %v1054_v42  ;;  %v1053_v48 = vsel %vm925_vm3, %v861_v34, %v989_v40  ;;  %1085 = vst [vmem:[%s1918_s3 + $0x80] sm:$0xff] %v1021_v47  ;;  %vm896_vm4 = vcmp.ge.f32.partialorder %v832_v43, 0.0  ;;  %v960_v53 = vmul.f32 0.2, %v832_v43  ;;  %vm928_vm5 = vcmp.ge.f32.partialorder %v864_v44, 0.0 }
 0x121   :  { %1117 = vst [vmem:[%s1918_s3 + $0x180] sm:$0xff] %v1053_v48  ;;  %v992_v54 = vmul.f32 0.2, %v864_v44  ;;  %vm895_vm6 = vcmp.ge.f32.partialorder %v831_v49, 0.0  ;;  %v959_v55 = vmul.f32 0.2, %v831_v49  ;;  %v834_v59 = vadd.f32 %v1282_v51, %v1657_v24 }
 0x122   :  { %vm927_vm7 = vcmp.ge.f32.partialorder %v863_v50, 0.0  ;;  %v991_v56 = vmul.f32 0.2, %v863_v50  ;;  %v1024_v57 = vsel %vm896_vm4, %v832_v43, %v960_v53  ;;  %v866_v60 = vadd.f32 %v1330_v52, %v1657_v24  ;;  %v392_v61 = vpop.f32.mrb[21].mxu0  ;;  %v552_v62 = vpop.f32.mrb[21].mxu1 }
 0x123   :  { %v1056_v58 = vsel %vm928_vm5, %v864_v44, %v992_v54  ;;  %1088 = vst [vmem:[%s1918_s3 + $0x98] sm:$0xff] %v1024_v57  ;;  %v1023_v63 = vsel %vm895_vm6, %v831_v49, %v959_v55  ;;  %v833_v1 = vadd.f32 %v1657_v24, %v392_v61  ;;  %v865_v2 = vadd.f32 %v1657_v24, %v552_v62  ;;  %v1285_v3 = vpop.f32.mrb[22].mxu0  ;;  %v1333_v4 = vpop.f32.mrb[22].mxu1 }
 0x124   :  { %1120 = vst [vmem:[%s1918_s3 + $0x198] sm:$0xff] %v1056_v58  ;;  %v1055_v0 = vsel %vm927_vm7, %v863_v50, %v991_v56  ;;  %1087 = vst [vmem:[%s1918_s3 + $0x90] sm:$0xff] %v1023_v63  ;;  %vm898_vm8 = vcmp.ge.f32.partialorder %v834_v59, 0.0  ;;  %v962_v5 = vmul.f32 0.2, %v834_v59  ;;  %vm930_vm9 = vcmp.ge.f32.partialorder %v866_v60, 0.0 }
 0x125   :  { %1119 = vst [vmem:[%s1918_s3 + $0x190] sm:$0xff] %v1055_v0  ;;  %v994_v6 = vmul.f32 0.2, %v866_v60  ;;  %vm897_vm10 = vcmp.ge.f32.partialorder %v833_v1, 0.0  ;;  %v961_v7 = vmul.f32 0.2, %v833_v1  ;;  %v836_v11 = vadd.f32 %v1285_v3, %v1657_v24 }
 0x126   :  { %vm929_vm11 = vcmp.ge.f32.partialorder %v865_v2, 0.0  ;;  %v993_v8 = vmul.f32 0.2, %v865_v2  ;;  %v1026_v9 = vsel %vm898_vm8, %v834_v59, %v962_v5  ;;  %v868_v12 = vadd.f32 %v1333_v4, %v1657_v24  ;;  %v402_v13 = vpop.f32.mrb[23].mxu0  ;;  %v562_v14 = vpop.f32.mrb[23].mxu1 }
 0x127   :  { %v1058_v10 = vsel %vm930_vm9, %v866_v60, %v994_v6  ;;  %1090 = vst [vmem:[%s1918_s3 + $0xa8] sm:$0xff] %v1026_v9  ;;  %v1025_v15 = vsel %vm897_vm10, %v833_v1, %v961_v7  ;;  %v835_v17 = vadd.f32 %v1657_v24, %v402_v13  ;;  %v867_v18 = vadd.f32 %v1657_v24, %v562_v14  ;;  %v1288_v19 = vpop.f32.mrb[24].mxu0  ;;  %v1336_v20 = vpop.f32.mrb[24].mxu1 }
 0x128   :  { %1122 = vst [vmem:[%s1918_s3 + $0x1a8] sm:$0xff] %v1058_v10  ;;  %v1057_v16 = vsel %vm929_vm11, %v865_v2, %v993_v8  ;;  %1089 = vst [vmem:[%s1918_s3 + $0xa0] sm:$0xff] %v1025_v15  ;;  %vm900_vm12 = vcmp.ge.f32.partialorder %v836_v11, 0.0  ;;  %v964_v21 = vmul.f32 0.2, %v836_v11  ;;  %vm932_vm13 = vcmp.ge.f32.partialorder %v868_v12, 0.0 }
 0x129   :  { %1121 = vst [vmem:[%s1918_s3 + $0x1a0] sm:$0xff] %v1057_v16  ;;  %v996_v22 = vmul.f32 0.2, %v868_v12  ;;  %vm899_vm14 = vcmp.ge.f32.partialorder %v835_v17, 0.0  ;;  %v963_v23 = vmul.f32 0.2, %v835_v17  ;;  %v838_v28 = vadd.f32 %v1288_v19, %v1657_v24 }
 0x12a   :  { %vm931_vm15 = vcmp.ge.f32.partialorder %v867_v18, 0.0  ;;  %v995_v25 = vmul.f32 0.2, %v867_v18  ;;  %v1028_v26 = vsel %vm900_vm12, %v836_v11, %v964_v21  ;;  %v870_v29 = vadd.f32 %v1336_v20, %v1657_v24  ;;  %v412_v30 = vpop.f32.mrb[25].mxu0  ;;  %v572_v31 = vpop.f32.mrb[25].mxu1 }
 0x12b   :  { %v1060_v27 = vsel %vm932_vm13, %v868_v12, %v996_v22  ;;  %1092 = vst [vmem:[%s1918_s3 + $0xb8] sm:$0xff] %v1028_v26  ;;  %v1027_v32 = vsel %vm899_vm14, %v835_v17, %v963_v23  ;;  %v837_v34 = vadd.f32 %v1657_v24, %v412_v30  ;;  %v869_v35 = vadd.f32 %v1657_v24, %v572_v31  ;;  %v1291_v36 = vpop.f32.mrb[26].mxu0  ;;  %v1339_v37 = vpop.f32.mrb[26].mxu1 }
 0x12c   :  { %1124 = vst [vmem:[%s1918_s3 + $0x1b8] sm:$0xff] %v1060_v27  ;;  %v1059_v33 = vsel %vm931_vm15, %v867_v18, %v995_v25  ;;  %1091 = vst [vmem:[%s1918_s3 + $0xb0] sm:$0xff] %v1027_v32  ;;  %vm902_vm0 = vcmp.ge.f32.partialorder %v838_v28, 0.0  ;;  %v966_v38 = vmul.f32 0.2, %v838_v28  ;;  %vm934_vm1 = vcmp.ge.f32.partialorder %v870_v29, 0.0 }
 0x12d   :  { %1123 = vst [vmem:[%s1918_s3 + $0x1b0] sm:$0xff] %v1059_v33  ;;  %v998_v39 = vmul.f32 0.2, %v870_v29  ;;  %vm901_vm2 = vcmp.ge.f32.partialorder %v837_v34, 0.0  ;;  %v965_v40 = vmul.f32 0.2, %v837_v34  ;;  %v840_v44 = vadd.f32 %v1291_v36, %v1657_v24 }
 0x12e   :  { %vm933_vm3 = vcmp.ge.f32.partialorder %v869_v35, 0.0  ;;  %v997_v41 = vmul.f32 0.2, %v869_v35  ;;  %v1030_v42 = vsel %vm902_vm0, %v838_v28, %v966_v38  ;;  %v872_v45 = vadd.f32 %v1339_v37, %v1657_v24  ;;  %v422_v46 = vpop.f32.mrb[27].mxu0  ;;  %v582_v47 = vpop.f32.mrb[27].mxu1 }
 0x12f   :  { %v1062_v43 = vsel %vm934_vm1, %v870_v29, %v998_v39  ;;  %1094 = vst [vmem:[%s1918_s3 + $0xc8] sm:$0xff] %v1030_v42  ;;  %v1029_v48 = vsel %vm901_vm2, %v837_v34, %v965_v40  ;;  %v839_v50 = vadd.f32 %v1657_v24, %v422_v46  ;;  %v871_v51 = vadd.f32 %v1657_v24, %v582_v47  ;;  %v1294_v52 = vpop.f32.mrb[28].mxu0  ;;  %v1342_v53 = vpop.f32.mrb[28].mxu1 }
 0x130   :  { %1126 = vst [vmem:[%s1918_s3 + $0x1c8] sm:$0xff] %v1062_v43  ;;  %v1061_v49 = vsel %vm933_vm3, %v869_v35, %v997_v41  ;;  %1093 = vst [vmem:[%s1918_s3 + $0xc0] sm:$0xff] %v1029_v48  ;;  %vm904_vm4 = vcmp.ge.f32.partialorder %v840_v44, 0.0  ;;  %v968_v54 = vmul.f32 0.2, %v840_v44  ;;  %vm936_vm5 = vcmp.ge.f32.partialorder %v872_v45, 0.0 }
 0x131   :  { %1125 = vst [vmem:[%s1918_s3 + $0x1c0] sm:$0xff] %v1061_v49  ;;  %v1000_v55 = vmul.f32 0.2, %v872_v45  ;;  %vm903_vm6 = vcmp.ge.f32.partialorder %v839_v50, 0.0  ;;  %v967_v56 = vmul.f32 0.2, %v839_v50  ;;  %v842_v60 = vadd.f32 %v1294_v52, %v1657_v24 }
 0x132   :  { %vm935_vm7 = vcmp.ge.f32.partialorder %v871_v51, 0.0  ;;  %v999_v57 = vmul.f32 0.2, %v871_v51  ;;  %v1032_v58 = vsel %vm904_vm4, %v840_v44, %v968_v54  ;;  %v874_v61 = vadd.f32 %v1342_v53, %v1657_v24  ;;  %v432_v62 = vpop.f32.mrb[29].mxu0  ;;  %v592_v63 = vpop.f32.mrb[29].mxu1 }
 0x133   :  { %v1064_v59 = vsel %vm936_vm5, %v872_v45, %v1000_v55  ;;  %1096 = vst [vmem:[%s1918_s3 + $0xd8] sm:$0xff] %v1032_v58  ;;  %v1031_v0 = vsel %vm903_vm6, %v839_v50, %v967_v56  ;;  %v841_v2 = vadd.f32 %v1657_v24, %v432_v62  ;;  %v873_v3 = vadd.f32 %v1657_v24, %v592_v63  ;;  %v1297_v4 = vpop.f32.mrb[30].mxu0  ;;  %v1345_v5 = vpop.f32.mrb[30].mxu1 }
 0x134   :  { %1128 = vst [vmem:[%s1918_s3 + $0x1d8] sm:$0xff] %v1064_v59  ;;  %v1063_v1 = vsel %vm935_vm7, %v871_v51, %v999_v57  ;;  %1095 = vst [vmem:[%s1918_s3 + $0xd0] sm:$0xff] %v1031_v0  ;;  %vm906_vm8 = vcmp.ge.f32.partialorder %v842_v60, 0.0  ;;  %v970_v6 = vmul.f32 0.2, %v842_v60  ;;  %vm938_vm9 = vcmp.ge.f32.partialorder %v874_v61, 0.0 }
 0x135   :  { %1127 = vst [vmem:[%s1918_s3 + $0x1d0] sm:$0xff] %v1063_v1  ;;  %v1002_v7 = vmul.f32 0.2, %v874_v61  ;;  %vm905_vm10 = vcmp.ge.f32.partialorder %v841_v2, 0.0  ;;  %v969_v8 = vmul.f32 0.2, %v841_v2  ;;  %v844_v12 = vadd.f32 %v1297_v4, %v1657_v24 }
 0x136   :  { %vm937_vm11 = vcmp.ge.f32.partialorder %v873_v3, 0.0  ;;  %v1001_v9 = vmul.f32 0.2, %v873_v3  ;;  %v1034_v10 = vsel %vm906_vm8, %v842_v60, %v970_v6  ;;  %v876_v13 = vadd.f32 %v1345_v5, %v1657_v24  ;;  %v442_v14 = vpop.f32.mrb[31].mxu0  ;;  %v602_v15 = vpop.f32.mrb[31].mxu1 }
 0x137   :  { %v1066_v11 = vsel %vm938_vm9, %v874_v61, %v1002_v7  ;;  %1098 = vst [vmem:[%s1918_s3 + $0xe8] sm:$0xff] %v1034_v10  ;;  %v1033_v16 = vsel %vm905_vm10, %v841_v2, %v969_v8  ;;  %v843_v18 = vadd.f32 %v1657_v24, %v442_v14  ;;  %v875_v19 = vadd.f32 %v1657_v24, %v602_v15 }
 0x138   :  { %1130 = vst [vmem:[%s1918_s3 + $0x1e8] sm:$0xff] %v1066_v11  ;;  %v1065_v17 = vsel %vm937_vm11, %v873_v3, %v1001_v9  ;;  %1097 = vst [vmem:[%s1918_s3 + $0xe0] sm:$0xff] %v1033_v16  ;;  %vm908_vm12 = vcmp.ge.f32.partialorder %v844_v12, 0.0  ;;  %v972_v20 = vmul.f32 0.2, %v844_v12  ;;  %vm940_vm13 = vcmp.ge.f32.partialorder %v876_v13, 0.0 }
 0x139   :  { %1129 = vst [vmem:[%s1918_s3 + $0x1e0] sm:$0xff] %v1065_v17  ;;  %v1004_v21 = vmul.f32 0.2, %v876_v13  ;;  %vm907_vm14 = vcmp.ge.f32.partialorder %v843_v18, 0.0  ;;  %v971_v22 = vmul.f32 0.2, %v843_v18 }
 0x13a   :  { %vm939_vm15 = vcmp.ge.f32.partialorder %v875_v19, 0.0  ;;  %v1003_v23 = vmul.f32 0.2, %v875_v19  ;;  %v1036_v25 = vsel %vm908_vm12, %v844_v12, %v972_v20 }
 0x13b   :  { %v1068_v26 = vsel %vm940_vm13, %v876_v13, %v1004_v21  ;;  %1100 = vst [vmem:[%s1918_s3 + $0xf8] sm:$0xff] %v1036_v25  ;;  %v1035_v24 = vsel %vm907_vm14, %v843_v18, %v971_v22 }
 0x13c   :  { %1132 = vst [vmem:[%s1918_s3 + $0x1f8] sm:$0xff] %v1068_v26  ;;  %v1067_v27 = vsel %vm939_vm15, %v875_v19, %v1003_v23  ;;  %1099 = vst [vmem:[%s1918_s3 + $0xf0] sm:$0xff] %v1035_v24 }
 0x13d   :  { %1131 = vst [vmem:[%s1918_s3 + $0x1f0] sm:$0xff] %v1067_v27 }

// kernel: _lambda_.9
= control target key start
LH: loop header
LB: loop body
LE: loop exit
PB: predicated region body
PF: predicated region fallthrough
CT: control target
= control target key end

     0   :  { %s724_s1 = inlined_call_operand.vmem [shape: f32[128,128], index: 1, kind: input, shape index: {}]   ;;  %s725_s0 = inlined_call_operand.vmem [shape: f32[128,128], index: 0, kind: input, shape index: {}]   ;;  %s726_s2 = inlined_call_operand.vmem [shape: f32[1,128], index: 2, kind: input, shape index: {}]   ;;  %s727_s3 = inlined_call_operand.vmem [shape: f32[128,128], index: 3, kind: output, shape index: {0}]   ;;  %s728_s4 = inlined_call_operand.vmem [shape: f32[1,1,128], index: 4, kind: output, shape index: {1}]   ;;  %s729_s5 = inlined_call_operand.vmem [shape: f32[1,1,128], index: 5, kind: output, shape index: {2}]  }
   0x1   :  { %v69_v0 = vld [vmem:[%s724_s1] sm:$0xff]  ;;  %v70_v1 = vld [vmem:[%s724_s1 + $0x8] sm:$0xff]  ;;  %v71_v2 = vld [vmem:[%s724_s1 + $0x10] sm:$0xff] }
   0x2   :  { %v481_v3 = vpack.c.bf16 %v70_v1, %v69_v0  ;;  %v72_v4 = vld [vmem:[%s724_s1 + $0x18] sm:$0xff]  ;;  %v73_v6 = vld [vmem:[%s724_s1 + $0x20] sm:$0xff]  ;;  %v74_v7 = vld [vmem:[%s724_s1 + $0x28] sm:$0xff] }
   0x3   :  { %v485_v5 = vpack.c.bf16 %v72_v4, %v71_v2  ;;  %v489_v8 = vpack.c.bf16 %v74_v7, %v73_v6  ;;  %v53_v9 = vld [vmem:[%s725_s0] sm:$0xff]  ;;  %v75_v10 = vld [vmem:[%s724_s1 + $0x30] sm:$0xff]  ;;  %v76_v11 = vld [vmem:[%s724_s1 + $0x38] sm:$0xff] }
   0x4   :  { %482 = vmatprep.subr.bf16.mxu0 %v481_v3  ;;  %513 = vmatprep.subr.bf16.mxu1 %v481_v3  ;;  %v61_v12 = vld [vmem:[%s725_s0 + $0x40] sm:$0xff]  ;;  %v493_v13 = vpack.c.bf16 %v76_v11, %v75_v10  ;;  %v78_v15 = vld [vmem:[%s724_s1 + $0x48] sm:$0xff]  ;;  %v79_v17 = vld [vmem:[%s724_s1 + $0x50] sm:$0xff] }
   0x5   :  { %484 = vmatpush3.bf16.msra.mxu0 %v481_v3  ;;  %521 = vmatpush3.bf16.msra.mxu1 %v481_v3  ;;  %v77_v14 = vld [vmem:[%s724_s1 + $0x40] sm:$0xff]  ;;  %v80_v18 = vld [vmem:[%s724_s1 + $0x58] sm:$0xff]  ;;  %v82_v21 = vld [vmem:[%s724_s1 + $0x68] sm:$0xff] }
   0x6   :  { %486 = vmatprep.subr.bf16.mxu0 %v485_v5  ;;  %514 = vmatprep.subr.bf16.mxu1 %v485_v5  ;;  %v497_v16 = vpack.c.bf16 %v78_v15, %v77_v14  ;;  %v501_v19 = vpack.c.bf16 %v80_v18, %v79_v17  ;;  %v81_v20 = vld [vmem:[%s724_s1 + $0x60] sm:$0xff]  ;;  %v83_v23 = vld [vmem:[%s724_s1 + $0x70] sm:$0xff]  ;;  %v84_v24 = vld [vmem:[%s724_s1 + $0x78] sm:$0xff] }
   0x7   :  { %457 = vmatprep.mubr.f32.mxu0 %v53_v9  ;;  %469 = vmatprep.mubr.f32.mxu1 %v61_v12  ;;  %v505_v22 = vpack.c.bf16 %v82_v21, %v81_v20  ;;  %v509_v25 = vpack.c.bf16 %v84_v24, %v83_v23  ;;  %v54_v26 = vld [vmem:[%s725_s0 + $0x8] sm:$0xff]  ;;  %v55_v28 = vld [vmem:[%s725_s0 + $0x10] sm:$0xff]  ;;  %v56_v30 = vld [vmem:[%s725_s0 + $0x18] sm:$0xff] }
   0x8   :  { %v62_v27 = vld [vmem:[%s725_s0 + $0x48] sm:$0xff]  ;;  %v63_v29 = vld [vmem:[%s725_s0 + $0x50] sm:$0xff]  ;;  %v64_v31 = vld [vmem:[%s725_s0 + $0x58] sm:$0xff] }
   0x9   :  { %488 = vmatpush3.bf16.msra.mxu0 %v485_v5  ;;  %522 = vmatpush3.bf16.msra.mxu1 %v485_v5  ;;  %v57_v32 = vld [vmem:[%s725_s0 + $0x20] sm:$0xff]  ;;  %v58_v34 = vld [vmem:[%s725_s0 + $0x28] sm:$0xff]  ;;  %v59_v36 = vld [vmem:[%s725_s0 + $0x30] sm:$0xff] }
   0xa   :  { %490 = vmatprep.subr.bf16.mxu0 %v489_v8  ;;  %515 = vmatprep.subr.bf16.mxu1 %v489_v8  ;;  %v65_v33 = vld [vmem:[%s725_s0 + $0x60] sm:$0xff]  ;;  %v66_v35 = vld [vmem:[%s725_s0 + $0x68] sm:$0xff]  ;;  %v67_v37 = vld [vmem:[%s725_s0 + $0x70] sm:$0xff] }
   0xb   :  { %v60_v38 = vld [vmem:[%s725_s0 + $0x38] sm:$0xff]  ;;  %v392_v40 = vld [vmem:[%s726_s2] ss:$0 sm:$0xff] }
   0xc   :  { %v68_v39 = vld [vmem:[%s725_s0 + $0x78] sm:$0xff] }
   0xd   :  { %492 = vmatpush3.bf16.msra.mxu0 %v489_v8  ;;  %523 = vmatpush3.bf16.msra.mxu1 %v489_v8 }
   0xe   :  { %494 = vmatprep.subr.bf16.mxu0 %v493_v13  ;;  %516 = vmatprep.subr.bf16.mxu1 %v493_v13 }
  0x11   :  { %496 = vmatpush3.bf16.msra.mxu0 %v493_v13  ;;  %524 = vmatpush3.bf16.msra.mxu1 %v493_v13 }
  0x12   :  { %498 = vmatprep.subr.bf16.mxu0 %v497_v16  ;;  %517 = vmatprep.subr.bf16.mxu1 %v497_v16 }
  0x15   :  { %500 = vmatpush3.bf16.msra.mxu0 %v497_v16  ;;  %525 = vmatpush3.bf16.msra.mxu1 %v497_v16 }
  0x16   :  { %502 = vmatprep.subr.bf16.mxu0 %v501_v19  ;;  %518 = vmatprep.subr.bf16.mxu1 %v501_v19 }
  0x19   :  { %504 = vmatpush3.bf16.msra.mxu0 %v501_v19  ;;  %526 = vmatpush3.bf16.msra.mxu1 %v501_v19 }
  0x1a   :  { %506 = vmatprep.subr.bf16.mxu0 %v505_v22  ;;  %519 = vmatprep.subr.bf16.mxu1 %v505_v22 }
  0x1d   :  { %508 = vmatpush3.bf16.msra.mxu0 %v505_v22  ;;  %527 = vmatpush3.bf16.msra.mxu1 %v505_v22 }
  0x1e   :  { %510 = vmatprep.subr.bf16.mxu0 %v509_v25  ;;  %520 = vmatprep.subr.bf16.mxu1 %v509_v25 }
  0x21   :  { %512 = vmatpush3.bf16.msra.mxu0 %v509_v25  ;;  %528 = vmatpush3.bf16.msra.mxu1 %v509_v25 }
  0x24   :  { %458 = vmatmul.mubr.f32.vlgmr.msra.gmra.mrb[0].mxu0 %v54_v26  ;;  %470 = vmatmul.mubr.f32.vlgmr.msra.gmra.mrb[0].mxu1 %v62_v27 }
  0x25   :  { %460 = vmatprep.mubr.f32.mxu0 %v55_v28  ;;  %472 = vmatprep.mubr.f32.mxu1 %v63_v29 }
  0x28   :  { %461 = vmatmul.mubr.f32.gmra.mrb[2].mxu0 %v56_v30  ;;  %473 = vmatmul.mubr.f32.gmra.mrb[2].mxu1 %v64_v31 }
  0x29   :  { %463 = vmatprep.mubr.f32.mxu0 %v57_v32  ;;  %475 = vmatprep.mubr.f32.mxu1 %v65_v33 }
  0x2c   :  { %464 = vmatmul.mubr.f32.gmra.mrb[4].mxu0 %v58_v34  ;;  %476 = vmatmul.mubr.f32.gmra.mrb[4].mxu1 %v66_v35 }
  0x2d   :  { %466 = vmatprep.mubr.f32.mxu0 %v59_v36  ;;  %478 = vmatprep.mubr.f32.mxu1 %v67_v37 }
  0x30   :  { %467 = vmatmul.mubr.f32.gmra.mrb[6].mxu0 %v60_v38  ;;  %479 = vmatmul.mubr.f32.gmra.mrb[6].mxu1 %v68_v39 }
  0xf7   :  { %v459_v41 = vpop.f32.mrb[0].mxu0  ;;  %v471_v42 = vpop.f32.mrb[0].mxu1 }
  0xf8   :  { %v289_v43 = vadd.f32 %v459_v41, %v392_v40  ;;  %v151_v44 = vpop.f32.mrb[1].mxu0  ;;  %v658_v45 = vadd.f32 %v471_v42, %v392_v40  ;;  %v191_v46 = vpop.f32.mrb[1].mxu1 }
  0xf9   :  { %v288_v47 = vadd.f32 %v392_v40, %v151_v44  ;;  %v660_v48 = vadd.f32 %v392_v40, %v191_v46 }
  0xfa   :  { %v327_v49 = vmul.f32 %v289_v43, %v289_v43  ;;  %365 = vst [vmem:[%s727_s3 + $0x8] sm:$0xff] %v289_v43  ;;  %373 = vst [vmem:[%s727_s3 + $0x48] sm:$0xff] %v658_v45  ;;  %v335_v33 = vmul.f32 %v658_v45, %v658_v45 }
  0xfb   :  { %v304_v50 = vadd.f32 %v289_v43, %v288_v47  ;;  %v326_v51 = vmul.f32 %v288_v47, %v288_v47  ;;  %364 = vst [vmem:[%s727_s3] sm:$0xff] %v288_v47  ;;  %v462_v52 = vpop.f32.mrb[2].mxu0  ;;  %372 = vst [vmem:[%s727_s3 + $0x40] sm:$0xff] %v660_v48  ;;  %v474_v53 = vpop.f32.mrb[2].mxu1  ;;  %v334_v30 = vmul.f32 %v660_v48, %v660_v48 }
  0xfc   :  { %v291_v54 = vadd.f32 %v462_v52, %v392_v40  ;;  %v161_v55 = vpop.f32.mrb[3].mxu0  ;;  %v299_v56 = vadd.f32 %v474_v53, %v392_v40  ;;  %v201_v57 = vpop.f32.mrb[3].mxu1 }
  0xfd   :  { %v342_v58 = vadd.f32 %v327_v49, %v326_v51  ;;  %v290_v59 = vadd.f32 %v392_v40, %v161_v55  ;;  %v298_v60 = vadd.f32 %v392_v40, %v201_v57 }
  0xfe   :  { %367 = vst [vmem:[%s727_s3 + $0x18] sm:$0xff] %v291_v54  ;;  %375 = vst [vmem:[%s727_s3 + $0x58] sm:$0xff] %v299_v56  ;;  %v329_v1 = vmul.f32 %v291_v54, %v291_v54  ;;  %v337_v39 = vmul.f32 %v299_v56, %v299_v56 }
  0xff   :  { %v305_v61 = vadd.f32 %v304_v50, %v290_v59  ;;  %v328_v62 = vmul.f32 %v290_v59, %v290_v59  ;;  %366 = vst [vmem:[%s727_s3 + $0x10] sm:$0xff] %v290_v59  ;;  %v465_v63 = vpop.f32.mrb[4].mxu0  ;;  %374 = vst [vmem:[%s727_s3 + $0x50] sm:$0xff] %v298_v60  ;;  %v477_v0 = vpop.f32.mrb[4].mxu1  ;;  %v336_v36 = vmul.f32 %v298_v60, %v298_v60 }
 0x100   :  { %v293_v2 = vadd.f32 %v465_v63, %v392_v40  ;;  %v171_v3 = vpop.f32.mrb[5].mxu0  ;;  %v301_v4 = vadd.f32 %v477_v0, %v392_v40  ;;  %v211_v5 = vpop.f32.mrb[5].mxu1 }
 0x101   :  { %v343_v6 = vadd.f32 %v342_v58, %v328_v62  ;;  %v292_v7 = vadd.f32 %v392_v40, %v171_v3  ;;  %v306_v8 = vadd.f32 %v305_v61, %v291_v54  ;;  %v300_v9 = vadd.f32 %v392_v40, %v211_v5 }
 0x102   :  { %369 = vst [vmem:[%s727_s3 + $0x28] sm:$0xff] %v293_v2  ;;  %377 = vst [vmem:[%s727_s3 + $0x68] sm:$0xff] %v301_v4  ;;  %v331_v15 = vmul.f32 %v293_v2, %v293_v2  ;;  %v339_v46 = vmul.f32 %v301_v4, %v301_v4 }
 0x103   :  { %v307_v10 = vadd.f32 %v306_v8, %v292_v7  ;;  %v330_v11 = vmul.f32 %v292_v7, %v292_v7  ;;  %v344_v12 = vadd.f32 %v343_v6, %v329_v1  ;;  %368 = vst [vmem:[%s727_s3 + $0x20] sm:$0xff] %v292_v7  ;;  %v468_v13 = vpop.f32.mrb[6].mxu0  ;;  %376 = vst [vmem:[%s727_s3 + $0x60] sm:$0xff] %v300_v9  ;;  %v480_v14 = vpop.f32.mrb[6].mxu1 }
 0x104   :  { %v295_v16 = vadd.f32 %v468_v13, %v392_v40  ;;  %v181_v17 = vpop.f32.mrb[7].mxu0  ;;  %v303_v18 = vadd.f32 %v480_v14, %v392_v40  ;;  %v221_v19 = vpop.f32.mrb[7].mxu1  ;;  %v338_v42 = vmul.f32 %v300_v9, %v300_v9 }
 0x105   :  { %v345_v20 = vadd.f32 %v344_v12, %v330_v11  ;;  %v294_v21 = vadd.f32 %v392_v40, %v181_v17  ;;  %v308_v22 = vadd.f32 %v307_v10, %v293_v2  ;;  %v302_v23 = vadd.f32 %v392_v40, %v221_v19 }
 0x106   :  { %371 = vst [vmem:[%s727_s3 + $0x38] sm:$0xff] %v295_v16  ;;  %379 = vst [vmem:[%s727_s3 + $0x78] sm:$0xff] %v303_v18  ;;  %v333_v27 = vmul.f32 %v295_v16, %v295_v16  ;;  %v341_v52 = vmul.f32 %v303_v18, %v303_v18 }
 0x107   :  { %v309_v24 = vadd.f32 %v308_v22, %v294_v21  ;;  %v332_v25 = vmul.f32 %v294_v21, %v294_v21  ;;  %v346_v26 = vadd.f32 %v345_v20, %v331_v15  ;;  %370 = vst [vmem:[%s727_s3 + $0x30] sm:$0xff] %v294_v21  ;;  %378 = vst [vmem:[%s727_s3 + $0x70] sm:$0xff] %v302_v23 }
 0x109   :  { %v347_v28 = vadd.f32 %v346_v26, %v332_v25  ;;  %v310_v29 = vadd.f32 %v309_v24, %v295_v16 }
 0x10b   :  { %v311_v31 = vadd.f32 %v310_v29, %v660_v48  ;;  %v348_v32 = vadd.f32 %v347_v28, %v333_v27  ;;  %v340_v48 = vmul.f32 %v302_v23, %v302_v23 }
 0x10d   :  { %v349_v34 = vadd.f32 %v348_v32, %v334_v30  ;;  %v312_v35 = vadd.f32 %v311_v31, %v658_v45 }
 0x10f   :  { %v313_v37 = vadd.f32 %v312_v35, %v298_v60  ;;  %v350_v38 = vadd.f32 %v349_v34, %v335_v33 }
 0x111   :  { %v351_v40 = vadd.f32 %v350_v38, %v336_v36  ;;  %v314_v41 = vadd.f32 %v313_v37, %v299_v56 }
 0x113   :  { %v315_v43 = vadd.f32 %v314_v41, %v300_v9  ;;  %v352_v44 = vadd.f32 %v351_v40, %v337_v39 }
 0x115   :  { %v353_v47 = vadd.f32 %v352_v44, %v338_v42  ;;  %v316_v49 = vadd.f32 %v315_v43, %v301_v4 }
 0x117   :  { %v317_v50 = vadd.f32 %v316_v49, %v302_v23  ;;  %v354_v51 = vadd.f32 %v353_v47, %v339_v46 }
 0x119   :  { %v318_v53 = vadd.f32 %v317_v50, %v303_v18  ;;  %v355_v54 = vadd.f32 %v354_v51, %v340_v48 }
 0x11b   :  { %v319_v55 = vrot.slane %v318_v53, 4  ;;  %v356_v45 = vadd.f32 %v355_v54, %v341_v52 }
 0x11d   :  { %v320_v57 = vadd.f32 %v319_v55, %v318_v53  ;;  %v357_v58 = vrot.slane %v356_v45, 4 }
 0x11f   :  { %v321_v59 = vrot.slane %v320_v57, 2  ;;  %v358_v60 = vadd.f32 %v357_v58, %v356_v45 }
 0x121   :  { %v322_v61 = vadd.f32 %v321_v59, %v320_v57  ;;  %v359_v56 = vrot.slane %v358_v60, 2 }
 0x123   :  { %v323_v62 = vrot.slane %v322_v61, 1  ;;  %v360_v63 = vadd.f32 %v359_v56, %v358_v60 }
 0x125   :  { %v324_v0 = vadd.f32 %v323_v62, %v322_v61  ;;  %v361_v1 = vrot.slane %v360_v63, 1 }
 0x127   :  { %325 = vst [vmem:[%s728_s4] sm:$0x1] %v324_v0  ;;  %v362_v2 = vadd.f32 %v361_v1, %v360_v63 }
 0x129   :  { %363 = vst [vmem:[%s729_s5] sm:$0x1] %v362_v2 }

// kernel: _lambda_.10
= control target key start
LH: loop header
LB: loop body
LE: loop exit
PB: predicated region body
PF: predicated region fallthrough
CT: control target
= control target key end

     0   :  { %s305_s0 = inlined_call_operand.vmem [shape: f32[128,128], index: 0, kind: input, shape index: {}]   ;;  %s306_s1 = inlined_call_operand.vmem [shape: f32[1,128], index: 1, kind: input, shape index: {}]   ;;  %s307_s2 = inlined_call_operand.vmem [shape: f32[1,128], index: 2, kind: input, shape index: {}]   ;;  %s308_s3 = inlined_call_operand.vmem [shape: f32[128,128], index: 3, kind: output, shape index: {}]  }
   0x1   :  { %v14_v0 = vld [vmem:[%s305_s0] sm:$0xff]  ;;  %v15_v4 = vld [vmem:[%s305_s0 + $0x8] sm:$0xff]  ;;  %v16_v5 = vld [vmem:[%s305_s0 + $0x10] sm:$0xff] }
   0x2   :  { %v172_v1 = vld [vmem:[%s306_s1] ss:$0 sm:$0xff]  ;;  %v17_v6 = vld [vmem:[%s305_s0 + $0x18] sm:$0xff]  ;;  %v19_v11 = vld [vmem:[%s305_s0 + $0x28] sm:$0xff] }
   0x3   :  { %v177_v2 = vld [vmem:[%s307_s2] ss:$0 sm:$0xff]  ;;  %v37_v3 = vmul.f32 %v172_v1, %v14_v0  ;;  %v38_v7 = vmul.f32 %v172_v1, %v15_v4  ;;  %v39_v8 = vmul.f32 %v172_v1, %v16_v5  ;;  %v40_v9 = vmul.f32 %v172_v1, %v17_v6  ;;  %v20_v12 = vld [vmem:[%s305_s0 + $0x30] sm:$0xff]  ;;  %v21_v17 = vld [vmem:[%s305_s0 + $0x38] sm:$0xff] }
   0x4   :  { %v18_v10 = vld [vmem:[%s305_s0 + $0x20] sm:$0xff]  ;;  %v42_v15 = vmul.f32 %v172_v1, %v19_v11  ;;  %v43_v16 = vmul.f32 %v172_v1, %v20_v12  ;;  %v44_v21 = vmul.f32 %v172_v1, %v21_v17  ;;  %v23_v30 = vld [vmem:[%s305_s0 + $0x48] sm:$0xff]  ;;  %v24_v31 = vld [vmem:[%s305_s0 + $0x50] sm:$0xff] }
   0x5   :  { %v60_v13 = vadd.f32 %v177_v2, %v37_v3  ;;  %v41_v14 = vmul.f32 %v172_v1, %v18_v10  ;;  %v61_v18 = vadd.f32 %v177_v2, %v38_v7  ;;  %v62_v19 = vadd.f32 %v177_v2, %v39_v8  ;;  %v22_v25 = vld [vmem:[%s305_s0 + $0x40] sm:$0xff]  ;;  %v25_v43 = vld [vmem:[%s305_s0 + $0x58] sm:$0xff]  ;;  %v27_v45 = vld [vmem:[%s305_s0 + $0x68] sm:$0xff] }
   0x6   :  { %v63_v20 = vadd.f32 %v177_v2, %v40_v9  ;;  %v65_v24 = vadd.f32 %v177_v2, %v42_v15  ;;  %v66_v37 = vadd.f32 %v177_v2, %v43_v16  ;;  %v67_v38 = vadd.f32 %v177_v2, %v44_v21  ;;  %v26_v44 = vld [vmem:[%s305_s0 + $0x60] sm:$0xff]  ;;  %v28_v56 = vld [vmem:[%s305_s0 + $0x70] sm:$0xff]  ;;  %v29_v4 = vld [vmem:[%s305_s0 + $0x78] sm:$0xff] }
   0x7   :  { %vm76_vm0 = vcmp.ge.f32.partialorder %v60_v13, 0.0  ;;  %v92_v22 = vmul.f32 0.2, %v60_v13  ;;  %v64_v23 = vadd.f32 %v177_v2, %v41_v14  ;;  %vm77_vm1 = vcmp.ge.f32.partialorder %v61_v18, 0.0 }
   0x8   :  { %v93_v26 = vmul.f32 0.2, %v61_v18  ;;  %vm78_vm2 = vcmp.ge.f32.partialorder %v62_v19, 0.0  ;;  %v94_v27 = vmul.f32 0.2, %v62_v19  ;;  %vm79_vm3 = vcmp.ge.f32.partialorder %v63_v20, 0.0 }
   0x9   :  { %v108_v28 = vsel %vm76_vm0, %v60_v13, %v92_v22  ;;  %v95_v29 = vmul.f32 0.2, %v63_v20  ;;  %vm80_vm4 = vcmp.ge.f32.partialorder %v64_v23, 0.0  ;;  %v96_v34 = vmul.f32 0.2, %v64_v23 }
   0xa   :  { %124 = vst [vmem:[%s308_s3] sm:$0xff] %v108_v28  ;;  %v109_v32 = vsel %vm77_vm1, %v61_v18, %v93_v26  ;;  %v110_v33 = vsel %vm78_vm2, %v62_v19, %v94_v27  ;;  %vm81_vm5 = vcmp.ge.f32.partialorder %v65_v24, 0.0  ;;  %v97_v36 = vmul.f32 0.2, %v65_v24 }
   0xb   :  { %125 = vst [vmem:[%s308_s3 + $0x8] sm:$0xff] %v109_v32  ;;  %126 = vst [vmem:[%s308_s3 + $0x10] sm:$0xff] %v110_v33  ;;  %v111_v35 = vsel %vm79_vm3, %v63_v20, %v95_v29  ;;  %v112_v39 = vsel %vm80_vm4, %v64_v23, %v96_v34  ;;  %v45_v40 = vmul.f32 %v172_v1, %v22_v25  ;;  %vm82_vm6 = vcmp.ge.f32.partialorder %v66_v37, 0.0 }
   0xc   :  { %127 = vst [vmem:[%s308_s3 + $0x18] sm:$0xff] %v111_v35  ;;  %v46_v41 = vmul.f32 %v172_v1, %v23_v30  ;;  %v47_v42 = vmul.f32 %v172_v1, %v24_v31  ;;  %128 = vst [vmem:[%s308_s3 + $0x20] sm:$0xff] %v112_v39  ;;  %v113_v46 = vsel %vm81_vm5, %v65_v24, %v97_v36  ;;  %v98_v47 = vmul.f32 0.2, %v66_v37 }
   0xd   :  { %vm83_vm7 = vcmp.ge.f32.partialorder %v67_v38, 0.0  ;;  %129 = vst [vmem:[%s308_s3 + $0x28] sm:$0xff] %v113_v46  ;;  %v99_v48 = vmul.f32 0.2, %v67_v38  ;;  %v68_v49 = vadd.f32 %v177_v2, %v45_v40  ;;  %v48_v53 = vmul.f32 %v172_v1, %v25_v43 }
   0xe   :  { %v69_v50 = vadd.f32 %v177_v2, %v46_v41  ;;  %v70_v51 = vadd.f32 %v177_v2, %v47_v42  ;;  %v114_v52 = vsel %vm82_vm6, %v66_v37, %v98_v47  ;;  %v49_v54 = vmul.f32 %v172_v1, %v26_v44 }
   0xf   :  { %v50_v55 = vmul.f32 %v172_v1, %v27_v45  ;;  %130 = vst [vmem:[%s308_s3 + $0x30] sm:$0xff] %v114_v52  ;;  %v115_v57 = vsel %vm83_vm7, %v67_v38, %v99_v48  ;;  %vm84_vm8 = vcmp.ge.f32.partialorder %v68_v49, 0.0  ;;  %v100_v58 = vmul.f32 0.2, %v68_v49 }
  0x10   :  { %vm85_vm9 = vcmp.ge.f32.partialorder %v69_v50, 0.0  ;;  %131 = vst [vmem:[%s308_s3 + $0x38] sm:$0xff] %v115_v57  ;;  %v101_v59 = vmul.f32 0.2, %v69_v50  ;;  %vm86_vm10 = vcmp.ge.f32.partialorder %v70_v51, 0.0  ;;  %v71_v61 = vadd.f32 %v177_v2, %v48_v53 }
  0x11   :  { %v102_v60 = vmul.f32 0.2, %v70_v51  ;;  %v116_v62 = vsel %vm84_vm8, %v68_v49, %v100_v58  ;;  %v72_v63 = vadd.f32 %v177_v2, %v49_v54  ;;  %v73_v0 = vadd.f32 %v177_v2, %v50_v55 }
  0x12   :  { %v51_v3 = vmul.f32 %v172_v1, %v28_v56  ;;  %132 = vst [vmem:[%s308_s3 + $0x40] sm:$0xff] %v116_v62  ;;  %v117_v5 = vsel %vm85_vm9, %v69_v50, %v101_v59  ;;  %vm87_vm11 = vcmp.ge.f32.partialorder %v71_v61, 0.0  ;;  %v103_v7 = vmul.f32 0.2, %v71_v61 }
  0x13   :  { %v118_v6 = vsel %vm86_vm10, %v70_v51, %v102_v60  ;;  %133 = vst [vmem:[%s308_s3 + $0x48] sm:$0xff] %v117_v5  ;;  %vm88_vm12 = vcmp.ge.f32.partialorder %v72_v63, 0.0  ;;  %v104_v8 = vmul.f32 0.2, %v72_v63  ;;  %vm89_vm13 = vcmp.ge.f32.partialorder %v73_v0, 0.0 }
  0x14   :  { %134 = vst [vmem:[%s308_s3 + $0x50] sm:$0xff] %v118_v6  ;;  %v105_v9 = vmul.f32 0.2, %v73_v0  ;;  %v119_v10 = vsel %vm87_vm11, %v71_v61, %v103_v7  ;;  %v74_v11 = vadd.f32 %v177_v2, %v51_v3  ;;  %v52_v12 = vmul.f32 %v172_v1, %v29_v4 }
  0x15   :  { %135 = vst [vmem:[%s308_s3 + $0x58] sm:$0xff] %v119_v10  ;;  %v120_v13 = vsel %vm88_vm12, %v72_v63, %v104_v8 }
  0x16   :  { %v121_v14 = vsel %vm89_vm13, %v73_v0, %v105_v9  ;;  %136 = vst [vmem:[%s308_s3 + $0x60] sm:$0xff] %v120_v13  ;;  %vm90_vm14 = vcmp.ge.f32.partialorder %v74_v11, 0.0  ;;  %v106_v15 = vmul.f32 0.2, %v74_v11  ;;  %v75_v16 = vadd.f32 %v177_v2, %v52_v12 }
  0x17   :  { %137 = vst [vmem:[%s308_s3 + $0x68] sm:$0xff] %v121_v14 }
  0x18   :  { %v122_v17 = vsel %vm90_vm14, %v74_v11, %v106_v15  ;;  %vm91_vm15 = vcmp.ge.f32.partialorder %v75_v16, 0.0  ;;  %v107_v1 = vmul.f32 0.2, %v75_v16 }
  0x19   :  { %138 = vst [vmem:[%s308_s3 + $0x70] sm:$0xff] %v122_v17 }
  0x1a   :  { %v123_v18 = vsel %vm91_vm15, %v75_v16, %v107_v1 }
  0x1b   :  { %139 = vst [vmem:[%s308_s3 + $0x78] sm:$0xff] %v123_v18 }

// kernel: _lambda_.11
= control target key start
LH: loop header
LB: loop body
LE: loop exit
PB: predicated region body
PF: predicated region fallthrough
CT: control target
= control target key end

     0   :  { %s484_s1 = inlined_call_operand.vmem [shape: f32[256,128], index: 1, kind: input, shape index: {}]   ;;  %s485_s0 = inlined_call_operand.vmem [shape: f32[32,256], index: 0, kind: input, shape index: {}]   ;;  %s486_s2 = inlined_call_operand.vmem [shape: f32[1,128], index: 2, kind: input, shape index: {}]   ;;  %s487_s3 = inlined_call_operand.vmem [shape: f32[32,128], index: 3, kind: output, shape index: {0}]   ;;  %s488_s4 = inlined_call_operand.vmem [shape: f32[1,1,128], index: 4, kind: output, shape index: {1}]   ;;  %s489_s5 = inlined_call_operand.vmem [shape: f32[1,1,128], index: 5, kind: output, shape index: {2}]  }
   0x1   :  { %v53_v0 = vld [vmem:[%s484_s1 + $0x80] sm:$0xff]  ;;  %v54_v1 = vld [vmem:[%s484_s1 + $0x88] sm:$0xff]  ;;  %v55_v5 = vld [vmem:[%s484_s1 + $0x90] sm:$0xff] }
   0x2   :  { %v37_v2 = vld [vmem:[%s484_s1] sm:$0xff]  ;;  %v265_v3 = vpack.c.bf16 %v54_v1, %v53_v0  ;;  %v38_v4 = vld [vmem:[%s484_s1 + $0x8] sm:$0xff]  ;;  %v56_v6 = vld [vmem:[%s484_s1 + $0x98] sm:$0xff] }
   0x3   :  { %v267_v7 = vpack.c.bf16 %v38_v4, %v37_v2  ;;  %v269_v8 = vpack.c.bf16 %v56_v6, %v55_v5  ;;  %v39_v9 = vld [vmem:[%s484_s1 + $0x10] sm:$0xff]  ;;  %v40_v10 = vld [vmem:[%s484_s1 + $0x18] sm:$0xff]  ;;  %v57_v11 = vld [vmem:[%s484_s1 + $0xa0] sm:$0xff] }
   0x4   :  { %266 = vmatprep.subr.bf16.mxu0 %v265_v3  ;;  %297 = vmatprep.subr.bf16.mxu1 %v265_v3  ;;  %v58_v12 = vld [vmem:[%s484_s1 + $0xa8] sm:$0xff]  ;;  %v271_v13 = vpack.c.bf16 %v40_v10, %v39_v9  ;;  %v41_v15 = vld [vmem:[%s484_s1 + $0x20] sm:$0xff]  ;;  %v59_v17 = vld [vmem:[%s484_s1 + $0xb0] sm:$0xff] }
   0x5   :  { %268 = vmatpush3.bf16.msra.mxu0 %v267_v7  ;;  %305 = vmatpush3.bf16.msra.mxu1 %v267_v7  ;;  %v273_v14 = vpack.c.bf16 %v58_v12, %v57_v11  ;;  %v42_v16 = vld [vmem:[%s484_s1 + $0x28] sm:$0xff]  ;;  %v60_v18 = vld [vmem:[%s484_s1 + $0xb8] sm:$0xff]  ;;  %v43_v21 = vld [vmem:[%s484_s1 + $0x30] sm:$0xff] }
   0x6   :  { %270 = vmatprep.subr.bf16.mxu0 %v269_v8  ;;  %298 = vmatprep.subr.bf16.mxu1 %v269_v8  ;;  %v275_v19 = vpack.c.bf16 %v42_v16, %v41_v15  ;;  %v277_v20 = vpack.c.bf16 %v60_v18, %v59_v17  ;;  %v44_v22 = vld [vmem:[%s484_s1 + $0x38] sm:$0xff]  ;;  %v61_v23 = vld [vmem:[%s484_s1 + $0xc0] sm:$0xff]  ;;  %v62_v24 = vld [vmem:[%s484_s1 + $0xc8] sm:$0xff] }
   0x7   :  { %v30_v25 = vld [vmem:[%s485_s0 + $0x8] sm:$0xff]  ;;  %v279_v27 = vpack.c.bf16 %v44_v22, %v43_v21  ;;  %v281_v28 = vpack.c.bf16 %v62_v24, %v61_v23  ;;  %v45_v29 = vld [vmem:[%s484_s1 + $0x40] sm:$0xff]  ;;  %v63_v31 = vld [vmem:[%s484_s1 + $0xd0] sm:$0xff] }
   0x8   :  { %133 = vmatprep.mubr.f32.mxu0 %v30_v25  ;;  %v34_v26 = vld [vmem:[%s485_s0 + $0x28] sm:$0xff]  ;;  %v64_v32 = vld [vmem:[%s484_s1 + $0xd8] sm:$0xff]  ;;  %v47_v35 = vld [vmem:[%s484_s1 + $0x50] sm:$0xff] }
   0x9   :  { %272 = vmatpush3.bf16.msra.mxu0 %v271_v13  ;;  %306 = vmatpush3.bf16.msra.mxu1 %v271_v13  ;;  %v46_v30 = vld [vmem:[%s484_s1 + $0x48] sm:$0xff]  ;;  %v285_v34 = vpack.c.bf16 %v64_v32, %v63_v31  ;;  %v48_v36 = vld [vmem:[%s484_s1 + $0x58] sm:$0xff]  ;;  %v65_v37 = vld [vmem:[%s484_s1 + $0xe0] sm:$0xff] }
   0xa   :  { %274 = vmatprep.subr.bf16.mxu0 %v273_v14  ;;  %299 = vmatprep.subr.bf16.mxu1 %v273_v14  ;;  %v283_v33 = vpack.c.bf16 %v46_v30, %v45_v29  ;;  %v66_v38 = vld [vmem:[%s484_s1 + $0xe8] sm:$0xff]  ;;  %v287_v39 = vpack.c.bf16 %v48_v36, %v47_v35  ;;  %v49_v41 = vld [vmem:[%s484_s1 + $0x60] sm:$0xff]  ;;  %v67_v43 = vld [vmem:[%s484_s1 + $0xf0] sm:$0xff] }
   0xb   :  { %143 = vmatprep.mubr.f32.mxu1 %v34_v26  ;;  %v289_v40 = vpack.c.bf16 %v66_v38, %v65_v37  ;;  %v50_v42 = vld [vmem:[%s484_s1 + $0x68] sm:$0xff]  ;;  %v68_v44 = vld [vmem:[%s484_s1 + $0xf8] sm:$0xff]  ;;  %v51_v47 = vld [vmem:[%s484_s1 + $0x70] sm:$0xff] }
   0xc   :  { %v291_v45 = vpack.c.bf16 %v50_v42, %v49_v41  ;;  %v293_v46 = vpack.c.bf16 %v68_v44, %v67_v43  ;;  %v52_v48 = vld [vmem:[%s484_s1 + $0x78] sm:$0xff]  ;;  %v29_v50 = vld [vmem:[%s485_s0] sm:$0xff]  ;;  %v31_v54 = vld [vmem:[%s485_s0 + $0x10] sm:$0xff] }
   0xd   :  { %276 = vmatpush3.bf16.msra.mxu0 %v275_v19  ;;  %307 = vmatpush3.bf16.msra.mxu1 %v275_v19  ;;  %v295_v49 = vpack.c.bf16 %v52_v48, %v51_v47  ;;  %v33_v51 = vld [vmem:[%s485_s0 + $0x20] sm:$0xff]  ;;  %v32_v52 = vld [vmem:[%s485_s0 + $0x18] sm:$0xff]  ;;  %v35_v55 = vld [vmem:[%s485_s0 + $0x30] sm:$0xff] }
   0xe   :  { %278 = vmatprep.subr.bf16.mxu0 %v277_v20  ;;  %300 = vmatprep.subr.bf16.mxu1 %v277_v20  ;;  %v36_v53 = vld [vmem:[%s485_s0 + $0x38] sm:$0xff]  ;;  %v220_v59 = vld [vmem:[%s486_s2] ss:$0 sm:$0xff] }
  0x11   :  { %280 = vmatpush3.bf16.msra.mxu0 %v279_v27  ;;  %308 = vmatpush3.bf16.msra.mxu1 %v279_v27 }
  0x12   :  { %282 = vmatprep.subr.bf16.mxu0 %v281_v28  ;;  %301 = vmatprep.subr.bf16.mxu1 %v281_v28 }
  0x15   :  { %284 = vmatpush3.bf16.msra.mxu0 %v283_v33  ;;  %309 = vmatpush3.bf16.msra.mxu1 %v283_v33 }
  0x16   :  { %286 = vmatprep.subr.bf16.mxu0 %v285_v34  ;;  %302 = vmatprep.subr.bf16.mxu1 %v285_v34 }
  0x19   :  { %288 = vmatpush3.bf16.msra.mxu0 %v287_v39  ;;  %310 = vmatpush3.bf16.msra.mxu1 %v287_v39 }
  0x1a   :  { %290 = vmatprep.subr.bf16.mxu0 %v289_v40  ;;  %303 = vmatprep.subr.bf16.mxu1 %v289_v40 }
  0x1d   :  { %292 = vmatpush3.bf16.msra.mxu0 %v291_v45  ;;  %311 = vmatpush3.bf16.msra.mxu1 %v291_v45 }
  0x1e   :  { %294 = vmatprep.subr.bf16.mxu0 %v293_v46  ;;  %304 = vmatprep.subr.bf16.mxu1 %v293_v46 }
  0x21   :  { %296 = vmatpush3.bf16.msra.mxu0 %v295_v49  ;;  %312 = vmatpush3.bf16.msra.mxu1 %v295_v49 }
  0x24   :  { %134 = vmatmul.mubr.f32.vlgmr.msra.gmra.mrb[0].mxu0 %v29_v50  ;;  %144 = vmatmul.mubr.f32.vlgmr.msra.gmra.mrb[0].mxu1 %v33_v51 }
  0x25   :  { %138 = vmatprep.mubr.f32.mxu0 %v32_v52  ;;  %148 = vmatprep.mubr.f32.mxu1 %v36_v53 }
  0x28   :  { %139 = vmatmul.mubr.f32.gmra.mrb[2].mxu0 %v31_v54  ;;  %149 = vmatmul.mubr.f32.gmra.mrb[2].mxu1 %v35_v55 }
  0xf7   :  { %v253_v56 = vpop.f32.mrb[0].mxu0  ;;  %v259_v57 = vpop.f32.mrb[0].mxu1 }
  0xf8   :  { %v254_v58 = vpop.f32.mrb[1].mxu0  ;;  %v260_v60 = vpop.f32.mrb[1].mxu1 }
  0xf9   :  { %v255_v61 = vadd.f32 %v254_v58, %v253_v56  ;;  %v261_v62 = vadd.f32 %v260_v60, %v259_v57 }
  0xfb   :  { %v176_v63 = vadd.f32 %v255_v61, %v220_v59  ;;  %v256_v0 = vpop.f32.mrb[2].mxu0  ;;  %v178_v1 = vadd.f32 %v261_v62, %v220_v59  ;;  %v262_v2 = vpop.f32.mrb[2].mxu1 }
  0xfc   :  { %v257_v3 = vpop.f32.mrb[3].mxu0  ;;  %v263_v4 = vpop.f32.mrb[3].mxu1 }
  0xfd   :  { %204 = vst [vmem:[%s487_s3] sm:$0xff] %v176_v63  ;;  %206 = vst [vmem:[%s487_s3 + $0x10] sm:$0xff] %v178_v1  ;;  %v258_v5 = vadd.f32 %v257_v3, %v256_v0  ;;  %v264_v6 = vadd.f32 %v263_v4, %v262_v2  ;;  %v190_v9 = vmul.f32 %v176_v63, %v176_v63 }
  0xfe   :  { %v192_v12 = vmul.f32 %v178_v1, %v178_v1 }
  0xff   :  { %v177_v7 = vadd.f32 %v258_v5, %v220_v59  ;;  %v179_v8 = vadd.f32 %v264_v6, %v220_v59 }
 0x101   :  { %v180_v10 = vadd.f32 %v177_v7, %v176_v63  ;;  %v191_v11 = vmul.f32 %v177_v7, %v177_v7  ;;  %205 = vst [vmem:[%s487_s3 + $0x8] sm:$0xff] %v177_v7  ;;  %207 = vst [vmem:[%s487_s3 + $0x18] sm:$0xff] %v179_v8  ;;  %v193_v15 = vmul.f32 %v179_v8, %v179_v8 }
 0x103   :  { %v194_v13 = vadd.f32 %v191_v11, %v190_v9  ;;  %v181_v14 = vadd.f32 %v180_v10, %v178_v1 }
 0x105   :  { %v182_v16 = vadd.f32 %v181_v14, %v179_v8  ;;  %v195_v17 = vadd.f32 %v194_v13, %v192_v12 }
 0x107   :  { %v183_v18 = vrot.slane %v182_v16, 4  ;;  %v196_v19 = vadd.f32 %v195_v17, %v193_v15 }
 0x109   :  { %v184_v20 = vadd.f32 %v183_v18, %v182_v16  ;;  %v197_v21 = vrot.slane %v196_v19, 4 }
 0x10b   :  { %v185_v22 = vrot.slane %v184_v20, 2  ;;  %v198_v23 = vadd.f32 %v197_v21, %v196_v19 }
 0x10d   :  { %v186_v24 = vadd.f32 %v185_v22, %v184_v20  ;;  %v199_v25 = vrot.slane %v198_v23, 2 }
 0x10f   :  { %v187_v26 = vrot.slane %v186_v24, 1  ;;  %v200_v27 = vadd.f32 %v199_v25, %v198_v23 }
 0x111   :  { %v188_v28 = vadd.f32 %v187_v26, %v186_v24  ;;  %v201_v29 = vrot.slane %v200_v27, 1 }
 0x113   :  { %189 = vst [vmem:[%s488_s4] sm:$0x1] %v188_v28  ;;  %v202_v30 = vadd.f32 %v201_v29, %v200_v27 }
 0x115   :  { %203 = vst [vmem:[%s489_s5] sm:$0x1] %v202_v30 }

// kernel: _lambda_.12
= control target key start
LH: loop header
LB: loop body
LE: loop exit
PB: predicated region body
PF: predicated region fallthrough
CT: control target
= control target key end

     0   :  { %s112_s0 = inlined_call_operand.vmem [shape: f32[32,128], index: 0, kind: input, shape index: {}]   ;;  %s113_s1 = inlined_call_operand.vmem [shape: f32[1,128], index: 1, kind: input, shape index: {}]   ;;  %s114_s2 = inlined_call_operand.vmem [shape: f32[1,128], index: 2, kind: input, shape index: {}]   ;;  %s115_s3 = inlined_call_operand.vmem [shape: f32[32,128], index: 3, kind: output, shape index: {}]  }
   0x1   :  { %v14_v0 = vld [vmem:[%s112_s0] sm:$0xff]  ;;  %v15_v4 = vld [vmem:[%s112_s0 + $0x8] sm:$0xff]  ;;  %v16_v5 = vld [vmem:[%s112_s0 + $0x10] sm:$0xff] }
   0x2   :  { %v60_v1 = vld [vmem:[%s113_s1] ss:$0 sm:$0xff]  ;;  %v17_v6 = vld [vmem:[%s112_s0 + $0x18] sm:$0xff] }
   0x3   :  { %v61_v2 = vld [vmem:[%s114_s2] ss:$0 sm:$0xff]  ;;  %v25_v3 = vmul.f32 %v60_v1, %v14_v0  ;;  %v26_v7 = vmul.f32 %v60_v1, %v15_v4  ;;  %v27_v8 = vmul.f32 %v60_v1, %v16_v5  ;;  %v28_v9 = vmul.f32 %v60_v1, %v17_v6 }
   0x5   :  { %v36_v10 = vadd.f32 %v61_v2, %v25_v3  ;;  %v37_v11 = vadd.f32 %v61_v2, %v26_v7  ;;  %v38_v12 = vadd.f32 %v61_v2, %v27_v8  ;;  %v39_v13 = vadd.f32 %v61_v2, %v28_v9 }
   0x7   :  { %vm40_vm0 = vcmp.ge.f32.partialorder %v36_v10, 0.0  ;;  %v44_v14 = vmul.f32 0.2, %v36_v10  ;;  %vm41_vm1 = vcmp.ge.f32.partialorder %v37_v11, 0.0  ;;  %v45_v15 = vmul.f32 0.2, %v37_v11 }
   0x8   :  { %vm42_vm2 = vcmp.ge.f32.partialorder %v38_v12, 0.0  ;;  %v46_v16 = vmul.f32 0.2, %v38_v12  ;;  %vm43_vm3 = vcmp.ge.f32.partialorder %v39_v13, 0.0  ;;  %v47_v18 = vmul.f32 0.2, %v39_v13 }
   0x9   :  { %v48_v17 = vsel %vm40_vm0, %v36_v10, %v44_v14  ;;  %v49_v19 = vsel %vm41_vm1, %v37_v11, %v45_v15 }
   0xa   :  { %52 = vst [vmem:[%s115_s3] sm:$0xff] %v48_v17  ;;  %v50_v20 = vsel %vm42_vm2, %v38_v12, %v46_v16  ;;  %53 = vst [vmem:[%s115_s3 + $0x8] sm:$0xff] %v49_v19  ;;  %v51_v21 = vsel %vm43_vm3, %v39_v13, %v47_v18 }
   0xb   :  { %54 = vst [vmem:[%s115_s3 + $0x10] sm:$0xff] %v50_v20  ;;  %55 = vst [vmem:[%s115_s3 + $0x18] sm:$0xff] %v51_v21 }

// kernel: _lambda_.13
= control target key start
LH: loop header
LB: loop body
LE: loop exit
PB: predicated region body
PF: predicated region fallthrough
CT: control target
= control target key end

     0   :  { %s789_s1 = inlined_call_operand.vmem [shape: f32[512,128], index: 1, kind: input, shape index: {}]   ;;  %s790_s0 = inlined_call_operand.vmem [shape: f32[32,512], index: 0, kind: input, shape index: {}]   ;;  %s791_s2 = inlined_call_operand.vmem [shape: f32[1,128], index: 2, kind: input, shape index: {}]   ;;  %s792_s3 = inlined_call_operand.vmem [shape: f32[32,128], index: 3, kind: output, shape index: {0}]   ;;  %s793_s4 = inlined_call_operand.vmem [shape: f32[1,1,128], index: 4, kind: output, shape index: {1}]   ;;  %s794_s5 = inlined_call_operand.vmem [shape: f32[1,1,128], index: 5, kind: output, shape index: {2}]  }
   0x1   :  { %v61_v0 = vld [vmem:[%s789_s1 + $0x80] sm:$0xff]  ;;  %v62_v1 = vld [vmem:[%s789_s1 + $0x88] sm:$0xff]  ;;  %v63_v11 = vld [vmem:[%s789_s1 + $0x90] sm:$0xff] }
   0x2   :  { %v93_v2 = vld [vmem:[%s789_s1 + $0x180] sm:$0xff]  ;;  %v434_v3 = vpack.c.bf16 %v62_v1, %v61_v0  ;;  %v94_v4 = vld [vmem:[%s789_s1 + $0x188] sm:$0xff]  ;;  %v64_v13 = vld [vmem:[%s789_s1 + $0x98] sm:$0xff] }
   0x3   :  { %v45_v5 = vld [vmem:[%s789_s1] sm:$0xff]  ;;  %v46_v6 = vld [vmem:[%s789_s1 + $0x8] sm:$0xff]  ;;  %v466_v7 = vpack.c.bf16 %v94_v4, %v93_v2  ;;  %v95_v14 = vld [vmem:[%s789_s1 + $0x190] sm:$0xff]  ;;  %v438_v16 = vpack.c.bf16 %v64_v13, %v63_v11 }
   0x4   :  { %v436_v8 = vpack.c.bf16 %v46_v6, %v45_v5  ;;  %v77_v9 = vld [vmem:[%s789_s1 + $0x100] sm:$0xff]  ;;  %v78_v10 = vld [vmem:[%s789_s1 + $0x108] sm:$0xff]  ;;  %435 = vmatprep.subr.bf16.mxu0 %v434_v3  ;;  %v96_v15 = vld [vmem:[%s789_s1 + $0x198] sm:$0xff] }
   0x5   :  { %v468_v12 = vpack.c.bf16 %v78_v10, %v77_v9  ;;  %467 = vmatprep.subr.bf16.mxu1 %v466_v7  ;;  %v470_v17 = vpack.c.bf16 %v96_v15, %v95_v14  ;;  %v47_v18 = vld [vmem:[%s789_s1 + $0x10] sm:$0xff]  ;;  %v48_v19 = vld [vmem:[%s789_s1 + $0x18] sm:$0xff]  ;;  %v65_v23 = vld [vmem:[%s789_s1 + $0xa0] sm:$0xff] }
   0x6   :  { %437 = vmatpush3.bf16.msra.mxu0 %v436_v8  ;;  %v79_v20 = vld [vmem:[%s789_s1 + $0x110] sm:$0xff]  ;;  %v440_v21 = vpack.c.bf16 %v48_v19, %v47_v18  ;;  %v80_v22 = vld [vmem:[%s789_s1 + $0x118] sm:$0xff]  ;;  %v66_v24 = vld [vmem:[%s789_s1 + $0xa8] sm:$0xff] }
   0x7   :  { %469 = vmatpush3.bf16.msra.mxu1 %v468_v12  ;;  %439 = vmatprep.subr.bf16.mxu0 %v438_v16  ;;  %v472_v25 = vpack.c.bf16 %v80_v22, %v79_v20  ;;  %v442_v26 = vpack.c.bf16 %v66_v24, %v65_v23  ;;  %v97_v27 = vld [vmem:[%s789_s1 + $0x1a0] sm:$0xff]  ;;  %v98_v28 = vld [vmem:[%s789_s1 + $0x1a8] sm:$0xff]  ;;  %v67_v35 = vld [vmem:[%s789_s1 + $0xb0] sm:$0xff] }
   0x8   :  { %471 = vmatprep.subr.bf16.mxu1 %v470_v17  ;;  %v49_v29 = vld [vmem:[%s789_s1 + $0x20] sm:$0xff]  ;;  %v474_v30 = vpack.c.bf16 %v98_v28, %v97_v27  ;;  %v50_v31 = vld [vmem:[%s789_s1 + $0x28] sm:$0xff]  ;;  %v68_v36 = vld [vmem:[%s789_s1 + $0xb8] sm:$0xff] }
   0x9   :  { %v81_v32 = vld [vmem:[%s789_s1 + $0x120] sm:$0xff]  ;;  %v82_v33 = vld [vmem:[%s789_s1 + $0x128] sm:$0xff]  ;;  %v444_v34 = vpack.c.bf16 %v50_v31, %v49_v29  ;;  %v99_v37 = vld [vmem:[%s789_s1 + $0x1b0] sm:$0xff]  ;;  %v446_v39 = vpack.c.bf16 %v68_v36, %v67_v35 }
   0xa   :  { %441 = vmatpush3.bf16.msra.mxu0 %v440_v21  ;;  %v476_v38 = vpack.c.bf16 %v82_v33, %v81_v32  ;;  %v100_v40 = vld [vmem:[%s789_s1 + $0x1b8] sm:$0xff]  ;;  %v51_v41 = vld [vmem:[%s789_s1 + $0x30] sm:$0xff]  ;;  %v69_v46 = vld [vmem:[%s789_s1 + $0xc0] sm:$0xff] }
   0xb   :  { %473 = vmatpush3.bf16.msra.mxu1 %v472_v25  ;;  %443 = vmatprep.subr.bf16.mxu0 %v442_v26  ;;  %v52_v42 = vld [vmem:[%s789_s1 + $0x38] sm:$0xff]  ;;  %v478_v43 = vpack.c.bf16 %v100_v40, %v99_v37  ;;  %v83_v44 = vld [vmem:[%s789_s1 + $0x130] sm:$0xff]  ;;  %v70_v47 = vld [vmem:[%s789_s1 + $0xc8] sm:$0xff] }
   0xc   :  { %475 = vmatprep.subr.bf16.mxu1 %v474_v30  ;;  %v84_v45 = vld [vmem:[%s789_s1 + $0x138] sm:$0xff]  ;;  %v101_v48 = vld [vmem:[%s789_s1 + $0x1c0] sm:$0xff]  ;;  %v102_v49 = vld [vmem:[%s789_s1 + $0x1c8] sm:$0xff]  ;;  %v448_v50 = vpack.c.bf16 %v52_v42, %v51_v41  ;;  %v450_v52 = vpack.c.bf16 %v70_v47, %v69_v46 }
   0xd   :  { %v480_v51 = vpack.c.bf16 %v84_v45, %v83_v44  ;;  %v53_v53 = vld [vmem:[%s789_s1 + $0x40] sm:$0xff]  ;;  %v54_v54 = vld [vmem:[%s789_s1 + $0x48] sm:$0xff]  ;;  %v482_v56 = vpack.c.bf16 %v102_v49, %v101_v48  ;;  %v71_v58 = vld [vmem:[%s789_s1 + $0xd0] sm:$0xff] }
   0xe   :  { %445 = vmatpush3.bf16.msra.mxu0 %v444_v34  ;;  %v85_v55 = vld [vmem:[%s789_s1 + $0x140] sm:$0xff]  ;;  %v86_v57 = vld [vmem:[%s789_s1 + $0x148] sm:$0xff]  ;;  %v72_v59 = vld [vmem:[%s789_s1 + $0xd8] sm:$0xff]  ;;  %v452_v62 = vpack.c.bf16 %v54_v54, %v53_v53 }
   0xf   :  { %477 = vmatpush3.bf16.msra.mxu1 %v476_v38  ;;  %447 = vmatprep.subr.bf16.mxu0 %v446_v39  ;;  %v103_v60 = vld [vmem:[%s789_s1 + $0x1d0] sm:$0xff]  ;;  %v104_v61 = vld [vmem:[%s789_s1 + $0x1d8] sm:$0xff]  ;;  %v484_v63 = vpack.c.bf16 %v86_v57, %v85_v55  ;;  %v454_v0 = vpack.c.bf16 %v72_v59, %v71_v58  ;;  %v73_v6 = vld [vmem:[%s789_s1 + $0xe0] sm:$0xff] }
  0x10   :  { %479 = vmatprep.subr.bf16.mxu1 %v478_v43  ;;  %v55_v1 = vld [vmem:[%s789_s1 + $0x50] sm:$0xff]  ;;  %v56_v2 = vld [vmem:[%s789_s1 + $0x58] sm:$0xff]  ;;  %v486_v4 = vpack.c.bf16 %v104_v61, %v103_v60  ;;  %v74_v7 = vld [vmem:[%s789_s1 + $0xe8] sm:$0xff] }
  0x11   :  { %v87_v3 = vld [vmem:[%s789_s1 + $0x150] sm:$0xff]  ;;  %v88_v5 = vld [vmem:[%s789_s1 + $0x158] sm:$0xff]  ;;  %v105_v8 = vld [vmem:[%s789_s1 + $0x1e0] sm:$0xff]  ;;  %v456_v10 = vpack.c.bf16 %v56_v2, %v55_v1  ;;  %v458_v14 = vpack.c.bf16 %v74_v7, %v73_v6 }
  0x12   :  { %449 = vmatpush3.bf16.msra.mxu0 %v448_v50  ;;  %v106_v9 = vld [vmem:[%s789_s1 + $0x1e8] sm:$0xff]  ;;  %v57_v11 = vld [vmem:[%s789_s1 + $0x60] sm:$0xff]  ;;  %v488_v13 = vpack.c.bf16 %v88_v5, %v87_v3  ;;  %v32_v17 = vld [vmem:[%s790_s0 + $0x18] sm:$0xff] }
  0x13   :  { %481 = vmatpush3.bf16.msra.mxu1 %v480_v51  ;;  %451 = vmatprep.subr.bf16.mxu0 %v450_v52  ;;  %v58_v12 = vld [vmem:[%s789_s1 + $0x68] sm:$0xff]  ;;  %v89_v15 = vld [vmem:[%s789_s1 + $0x160] sm:$0xff]  ;;  %v490_v18 = vpack.c.bf16 %v106_v9, %v105_v8  ;;  %v75_v20 = vld [vmem:[%s789_s1 + $0xf0] sm:$0xff] }
  0x14   :  { %483 = vmatprep.subr.bf16.mxu1 %v482_v56  ;;  %v30_v16 = vld [vmem:[%s790_s0 + $0x8] sm:$0xff]  ;;  %v76_v21 = vld [vmem:[%s789_s1 + $0xf8] sm:$0xff]  ;;  %v107_v22 = vld [vmem:[%s789_s1 + $0x1f0] sm:$0xff]  ;;  %258 = vmatprep.mubr.f32.mxu1 %v32_v17  ;;  %v460_v24 = vpack.c.bf16 %v58_v12, %v57_v11 }
  0x15   :  { %v90_v19 = vld [vmem:[%s789_s1 + $0x168] sm:$0xff]  ;;  %173 = vmatprep.mubr.f32.mxu0 %v30_v16  ;;  %v108_v23 = vld [vmem:[%s789_s1 + $0x1f8] sm:$0xff]  ;;  %v462_v26 = vpack.c.bf16 %v76_v21, %v75_v20  ;;  %v59_v27 = vld [vmem:[%s789_s1 + $0x70] sm:$0xff] }
  0x16   :  { %453 = vmatpush3.bf16.msra.mxu0 %v452_v62  ;;  %v492_v25 = vpack.c.bf16 %v90_v19, %v89_v15  ;;  %v60_v28 = vld [vmem:[%s789_s1 + $0x78] sm:$0xff]  ;;  %v494_v29 = vpack.c.bf16 %v108_v23, %v107_v22  ;;  %v91_v30 = vld [vmem:[%s789_s1 + $0x170] sm:$0xff]  ;;  %v29_v34 = vld [vmem:[%s790_s0] sm:$0xff] }
  0x17   :  { %485 = vmatpush3.bf16.msra.mxu1 %v484_v63  ;;  %455 = vmatprep.subr.bf16.mxu0 %v454_v0  ;;  %v92_v31 = vld [vmem:[%s789_s1 + $0x178] sm:$0xff]  ;;  %v464_v32 = vpack.c.bf16 %v60_v28, %v59_v27  ;;  %v31_v35 = vld [vmem:[%s790_s0 + $0x10] sm:$0xff]  ;;  %v34_v36 = vld [vmem:[%s790_s0 + $0x28] sm:$0xff] }
  0x18   :  { %487 = vmatprep.subr.bf16.mxu1 %v486_v4  ;;  %v496_v33 = vpack.c.bf16 %v92_v31, %v91_v30  ;;  %v36_v37 = vld [vmem:[%s790_s0 + $0x38] sm:$0xff]  ;;  %v33_v38 = vld [vmem:[%s790_s0 + $0x20] sm:$0xff]  ;;  %v35_v39 = vld [vmem:[%s790_s0 + $0x30] sm:$0xff] }
  0x19   :  { %v38_v40 = vld [vmem:[%s790_s0 + $0x48] sm:$0xff]  ;;  %v40_v41 = vld [vmem:[%s790_s0 + $0x58] sm:$0xff]  ;;  %v37_v42 = vld [vmem:[%s790_s0 + $0x40] sm:$0xff] }
  0x1a   :  { %457 = vmatpush3.bf16.msra.mxu0 %v456_v10  ;;  %v39_v43 = vld [vmem:[%s790_s0 + $0x50] sm:$0xff]  ;;  %v42_v44 = vld [vmem:[%s790_s0 + $0x68] sm:$0xff]  ;;  %v44_v45 = vld [vmem:[%s790_s0 + $0x78] sm:$0xff] }
  0x1b   :  { %489 = vmatpush3.bf16.msra.mxu1 %v488_v13  ;;  %459 = vmatprep.subr.bf16.mxu0 %v458_v14  ;;  %v41_v46 = vld [vmem:[%s790_s0 + $0x60] sm:$0xff]  ;;  %v43_v47 = vld [vmem:[%s790_s0 + $0x70] sm:$0xff] }
  0x1c   :  { %491 = vmatprep.subr.bf16.mxu1 %v490_v18  ;;  %v345_v54 = vld [vmem:[%s791_s2] ss:$0 sm:$0xff] }
  0x1e   :  { %461 = vmatpush3.bf16.msra.mxu0 %v460_v24 }
  0x1f   :  { %493 = vmatpush3.bf16.msra.mxu1 %v492_v25  ;;  %463 = vmatprep.subr.bf16.mxu0 %v462_v26 }
  0x20   :  { %495 = vmatprep.subr.bf16.mxu1 %v494_v29 }
  0x22   :  { %465 = vmatpush3.bf16.msra.mxu0 %v464_v32 }
  0x23   :  { %497 = vmatpush3.bf16.msra.mxu1 %v496_v33 }
  0x25   :  { %174 = vmatmul.mubr.f32.vlgmr.msra.gmra.mrb[0].mxu0 %v29_v34 }
  0x26   :  { %259 = vmatmul.mubr.f32.vlgmr.msra.gmra.mrb[0].mxu1 %v31_v35  ;;  %178 = vmatprep.mubr.f32.mxu0 %v34_v36 }
  0x27   :  { %263 = vmatprep.mubr.f32.mxu1 %v36_v37 }
  0x29   :  { %179 = vmatmul.mubr.f32.gmra.mrb[2].mxu0 %v33_v38 }
  0x2a   :  { %264 = vmatmul.mubr.f32.gmra.mrb[2].mxu1 %v35_v39  ;;  %183 = vmatprep.mubr.f32.mxu0 %v38_v40 }
  0x2b   :  { %268 = vmatprep.mubr.f32.mxu1 %v40_v41 }
  0x2d   :  { %184 = vmatmul.mubr.f32.gmra.mrb[4].mxu0 %v37_v42 }
  0x2e   :  { %269 = vmatmul.mubr.f32.gmra.mrb[4].mxu1 %v39_v43  ;;  %188 = vmatprep.mubr.f32.mxu0 %v42_v44 }
  0x2f   :  { %273 = vmatprep.mubr.f32.mxu1 %v44_v45 }
  0x31   :  { %189 = vmatmul.mubr.f32.gmra.mrb[6].mxu0 %v41_v46 }
  0x32   :  { %274 = vmatmul.mubr.f32.gmra.mrb[6].mxu1 %v43_v47 }
  0xf8   :  { %v378_v48 = vpop.f32.mrb[0].mxu0 }
  0xf9   :  { %v422_v49 = vpop.f32.mrb[0].mxu1  ;;  %v379_v50 = vpop.f32.mrb[1].mxu0 }
  0xfa   :  { %v380_v51 = vadd.f32 %v379_v50, %v378_v48  ;;  %v423_v52 = vpop.f32.mrb[1].mxu1 }
  0xfb   :  { %v424_v53 = vadd.f32 %v423_v52, %v422_v49 }
  0xfc   :  { %v381_v55 = vpop.f32.mrb[2].mxu0 }
  0xfd   :  { %v261_v56 = vadd.f32 %v424_v53, %v380_v51  ;;  %v425_v57 = vpop.f32.mrb[2].mxu1  ;;  %v382_v58 = vpop.f32.mrb[3].mxu0 }
  0xfe   :  { %v383_v59 = vadd.f32 %v382_v58, %v381_v55  ;;  %v426_v60 = vpop.f32.mrb[3].mxu1 }
  0xff   :  { %v301_v61 = vadd.f32 %v345_v54, %v261_v56  ;;  %v427_v62 = vadd.f32 %v426_v60, %v425_v57 }
 0x100   :  { %v384_v63 = vpop.f32.mrb[4].mxu0 }
 0x101   :  { %329 = vst [vmem:[%s792_s3] sm:$0xff] %v301_v61  ;;  %v266_v0 = vadd.f32 %v427_v62, %v383_v59  ;;  %v428_v1 = vpop.f32.mrb[4].mxu1  ;;  %v385_v2 = vpop.f32.mrb[5].mxu0  ;;  %v315_v8 = vmul.f32 %v301_v61, %v301_v61 }
 0x102   :  { %v386_v3 = vadd.f32 %v385_v2, %v384_v63  ;;  %v429_v4 = vpop.f32.mrb[5].mxu1 }
 0x103   :  { %v302_v5 = vadd.f32 %v345_v54, %v266_v0  ;;  %v430_v6 = vadd.f32 %v429_v4, %v428_v1 }
 0x104   :  { %v387_v7 = vpop.f32.mrb[6].mxu0 }
 0x105   :  { %v305_v9 = vadd.f32 %v302_v5, %v301_v61  ;;  %v316_v10 = vmul.f32 %v302_v5, %v302_v5  ;;  %330 = vst [vmem:[%s792_s3 + $0x8] sm:$0xff] %v302_v5  ;;  %v271_v11 = vadd.f32 %v430_v6, %v386_v3  ;;  %v431_v12 = vpop.f32.mrb[6].mxu1  ;;  %v388_v13 = vpop.f32.mrb[7].mxu0 }
 0x106   :  { %v389_v14 = vadd.f32 %v388_v13, %v387_v7  ;;  %v432_v15 = vpop.f32.mrb[7].mxu1 }
 0x107   :  { %v319_v16 = vadd.f32 %v316_v10, %v315_v8  ;;  %v303_v17 = vadd.f32 %v345_v54, %v271_v11  ;;  %v433_v18 = vadd.f32 %v432_v15, %v431_v12 }
 0x109   :  { %v306_v19 = vadd.f32 %v305_v9, %v303_v17  ;;  %v317_v20 = vmul.f32 %v303_v17, %v303_v17  ;;  %331 = vst [vmem:[%s792_s3 + $0x10] sm:$0xff] %v303_v17  ;;  %v276_v21 = vadd.f32 %v433_v18, %v389_v14 }
 0x10b   :  { %v320_v22 = vadd.f32 %v319_v16, %v317_v20  ;;  %v304_v23 = vadd.f32 %v345_v54, %v276_v21 }
 0x10d   :  { %v307_v24 = vadd.f32 %v306_v19, %v304_v23  ;;  %v318_v25 = vmul.f32 %v304_v23, %v304_v23  ;;  %332 = vst [vmem:[%s792_s3 + $0x18] sm:$0xff] %v304_v23 }
 0x10f   :  { %v308_v26 = vrot.slane %v307_v24, 4  ;;  %v321_v27 = vadd.f32 %v320_v22, %v318_v25 }
 0x111   :  { %v309_v28 = vadd.f32 %v308_v26, %v307_v24  ;;  %v322_v29 = vrot.slane %v321_v27, 4 }
 0x113   :  { %v310_v30 = vrot.slane %v309_v28, 2  ;;  %v323_v31 = vadd.f32 %v322_v29, %v321_v27 }
 0x115   :  { %v311_v32 = vadd.f32 %v310_v30, %v309_v28  ;;  %v324_v33 = vrot.slane %v323_v31, 2 }
 0x117   :  { %v312_v34 = vrot.slane %v311_v32, 1  ;;  %v325_v35 = vadd.f32 %v324_v33, %v323_v31 }
 0x119   :  { %v313_v36 = vadd.f32 %v312_v34, %v311_v32  ;;  %v326_v37 = vrot.slane %v325_v35, 1 }
 0x11b   :  { %314 = vst [vmem:[%s793_s4] sm:$0x1] %v313_v36  ;;  %v327_v38 = vadd.f32 %v326_v37, %v325_v35 }
 0x11d   :  { %328 = vst [vmem:[%s794_s5] sm:$0x1] %v327_v38 }

// kernel: _lambda_.15
= control target key start
LH: loop header
LB: loop body
LE: loop exit
PB: predicated region body
PF: predicated region fallthrough
CT: control target
= control target key end

     0   :  { %s1232_s1 = inlined_call_operand.vmem [shape: f32[1024,128], index: 1, kind: input, shape index: {}]   ;;  %s1233_s0 = inlined_call_operand.vmem [shape: f32[16,1024], index: 0, kind: input, shape index: {}]   ;;  %s1234_s2 = inlined_call_operand.vmem [shape: f32[1,128], index: 2, kind: input, shape index: {}]   ;;  %s1235_s3 = inlined_call_operand.vmem [shape: f32[16,128], index: 3, kind: output, shape index: {}]  }
   0x1   :  { %v54_v0 = vld [vmem:[%s1232_s1 + $0x80] sm:$0xff]  ;;  %v55_v1 = vld [vmem:[%s1232_s1 + $0x88] sm:$0xff]  ;;  %v56_v11 = vld [vmem:[%s1232_s1 + $0x90] sm:$0xff] }
   0x2   :  { %v86_v2 = vld [vmem:[%s1232_s1 + $0x180] sm:$0xff]  ;;  %v643_v3 = vpack.c.bf16 %v55_v1, %v54_v0  ;;  %v87_v4 = vld [vmem:[%s1232_s1 + $0x188] sm:$0xff]  ;;  %v57_v13 = vld [vmem:[%s1232_s1 + $0x98] sm:$0xff] }
   0x3   :  { %v38_v5 = vld [vmem:[%s1232_s1] sm:$0xff]  ;;  %v39_v6 = vld [vmem:[%s1232_s1 + $0x8] sm:$0xff]  ;;  %v675_v7 = vpack.c.bf16 %v87_v4, %v86_v2  ;;  %v88_v14 = vld [vmem:[%s1232_s1 + $0x190] sm:$0xff]  ;;  %v647_v16 = vpack.c.bf16 %v57_v13, %v56_v11 }
   0x4   :  { %v645_v8 = vpack.c.bf16 %v39_v6, %v38_v5  ;;  %v70_v9 = vld [vmem:[%s1232_s1 + $0x100] sm:$0xff]  ;;  %v71_v10 = vld [vmem:[%s1232_s1 + $0x108] sm:$0xff]  ;;  %644 = vmatprep.subr.bf16.mxu0 %v643_v3  ;;  %v89_v15 = vld [vmem:[%s1232_s1 + $0x198] sm:$0xff] }
   0x5   :  { %v677_v12 = vpack.c.bf16 %v71_v10, %v70_v9  ;;  %676 = vmatprep.subr.bf16.mxu1 %v675_v7  ;;  %v679_v17 = vpack.c.bf16 %v89_v15, %v88_v14  ;;  %v40_v18 = vld [vmem:[%s1232_s1 + $0x10] sm:$0xff]  ;;  %v41_v19 = vld [vmem:[%s1232_s1 + $0x18] sm:$0xff]  ;;  %v58_v23 = vld [vmem:[%s1232_s1 + $0xa0] sm:$0xff] }
   0x6   :  { %646 = vmatpush3.bf16.msra.mxu0 %v645_v8  ;;  %v72_v20 = vld [vmem:[%s1232_s1 + $0x110] sm:$0xff]  ;;  %v649_v21 = vpack.c.bf16 %v41_v19, %v40_v18  ;;  %v73_v22 = vld [vmem:[%s1232_s1 + $0x118] sm:$0xff]  ;;  %v59_v24 = vld [vmem:[%s1232_s1 + $0xa8] sm:$0xff] }
   0x7   :  { %678 = vmatpush3.bf16.msra.mxu1 %v677_v12  ;;  %648 = vmatprep.subr.bf16.mxu0 %v647_v16  ;;  %v681_v25 = vpack.c.bf16 %v73_v22, %v72_v20  ;;  %v651_v26 = vpack.c.bf16 %v59_v24, %v58_v23  ;;  %v90_v27 = vld [vmem:[%s1232_s1 + $0x1a0] sm:$0xff]  ;;  %v91_v28 = vld [vmem:[%s1232_s1 + $0x1a8] sm:$0xff]  ;;  %v60_v35 = vld [vmem:[%s1232_s1 + $0xb0] sm:$0xff] }
   0x8   :  { %680 = vmatprep.subr.bf16.mxu1 %v679_v17  ;;  %v42_v29 = vld [vmem:[%s1232_s1 + $0x20] sm:$0xff]  ;;  %v683_v30 = vpack.c.bf16 %v91_v28, %v90_v27  ;;  %v43_v31 = vld [vmem:[%s1232_s1 + $0x28] sm:$0xff]  ;;  %v61_v36 = vld [vmem:[%s1232_s1 + $0xb8] sm:$0xff] }
   0x9   :  { %v74_v32 = vld [vmem:[%s1232_s1 + $0x120] sm:$0xff]  ;;  %v75_v33 = vld [vmem:[%s1232_s1 + $0x128] sm:$0xff]  ;;  %v653_v34 = vpack.c.bf16 %v43_v31, %v42_v29  ;;  %v92_v37 = vld [vmem:[%s1232_s1 + $0x1b0] sm:$0xff]  ;;  %v655_v39 = vpack.c.bf16 %v61_v36, %v60_v35 }
   0xa   :  { %650 = vmatpush3.bf16.msra.mxu0 %v649_v21  ;;  %v685_v38 = vpack.c.bf16 %v75_v33, %v74_v32  ;;  %v93_v40 = vld [vmem:[%s1232_s1 + $0x1b8] sm:$0xff]  ;;  %v44_v41 = vld [vmem:[%s1232_s1 + $0x30] sm:$0xff]  ;;  %v62_v46 = vld [vmem:[%s1232_s1 + $0xc0] sm:$0xff] }
   0xb   :  { %682 = vmatpush3.bf16.msra.mxu1 %v681_v25  ;;  %652 = vmatprep.subr.bf16.mxu0 %v651_v26  ;;  %v45_v42 = vld [vmem:[%s1232_s1 + $0x38] sm:$0xff]  ;;  %v687_v43 = vpack.c.bf16 %v93_v40, %v92_v37  ;;  %v76_v44 = vld [vmem:[%s1232_s1 + $0x130] sm:$0xff]  ;;  %v63_v47 = vld [vmem:[%s1232_s1 + $0xc8] sm:$0xff] }
   0xc   :  { %684 = vmatprep.subr.bf16.mxu1 %v683_v30  ;;  %v77_v45 = vld [vmem:[%s1232_s1 + $0x138] sm:$0xff]  ;;  %v94_v48 = vld [vmem:[%s1232_s1 + $0x1c0] sm:$0xff]  ;;  %v95_v49 = vld [vmem:[%s1232_s1 + $0x1c8] sm:$0xff]  ;;  %v657_v50 = vpack.c.bf16 %v45_v42, %v44_v41  ;;  %v659_v52 = vpack.c.bf16 %v63_v47, %v62_v46 }
   0xd   :  { %v689_v51 = vpack.c.bf16 %v77_v45, %v76_v44  ;;  %v46_v53 = vld [vmem:[%s1232_s1 + $0x40] sm:$0xff]  ;;  %v47_v54 = vld [vmem:[%s1232_s1 + $0x48] sm:$0xff]  ;;  %v691_v56 = vpack.c.bf16 %v95_v49, %v94_v48  ;;  %v64_v58 = vld [vmem:[%s1232_s1 + $0xd0] sm:$0xff] }
   0xe   :  { %654 = vmatpush3.bf16.msra.mxu0 %v653_v34  ;;  %v78_v55 = vld [vmem:[%s1232_s1 + $0x140] sm:$0xff]  ;;  %v79_v57 = vld [vmem:[%s1232_s1 + $0x148] sm:$0xff]  ;;  %v65_v59 = vld [vmem:[%s1232_s1 + $0xd8] sm:$0xff]  ;;  %v661_v62 = vpack.c.bf16 %v47_v54, %v46_v53 }
   0xf   :  { %686 = vmatpush3.bf16.msra.mxu1 %v685_v38  ;;  %656 = vmatprep.subr.bf16.mxu0 %v655_v39  ;;  %v96_v60 = vld [vmem:[%s1232_s1 + $0x1d0] sm:$0xff]  ;;  %v97_v61 = vld [vmem:[%s1232_s1 + $0x1d8] sm:$0xff]  ;;  %v693_v63 = vpack.c.bf16 %v79_v57, %v78_v55  ;;  %v663_v0 = vpack.c.bf16 %v65_v59, %v64_v58  ;;  %v66_v6 = vld [vmem:[%s1232_s1 + $0xe0] sm:$0xff] }
  0x10   :  { %688 = vmatprep.subr.bf16.mxu1 %v687_v43  ;;  %v48_v1 = vld [vmem:[%s1232_s1 + $0x50] sm:$0xff]  ;;  %v49_v2 = vld [vmem:[%s1232_s1 + $0x58] sm:$0xff]  ;;  %v695_v4 = vpack.c.bf16 %v97_v61, %v96_v60  ;;  %v67_v7 = vld [vmem:[%s1232_s1 + $0xe8] sm:$0xff] }
  0x11   :  { %v80_v3 = vld [vmem:[%s1232_s1 + $0x150] sm:$0xff]  ;;  %v81_v5 = vld [vmem:[%s1232_s1 + $0x158] sm:$0xff]  ;;  %v98_v8 = vld [vmem:[%s1232_s1 + $0x1e0] sm:$0xff]  ;;  %v665_v10 = vpack.c.bf16 %v49_v2, %v48_v1  ;;  %v667_v14 = vpack.c.bf16 %v67_v7, %v66_v6 }
  0x12   :  { %658 = vmatpush3.bf16.msra.mxu0 %v657_v50  ;;  %v99_v9 = vld [vmem:[%s1232_s1 + $0x1e8] sm:$0xff]  ;;  %v50_v11 = vld [vmem:[%s1232_s1 + $0x60] sm:$0xff]  ;;  %v697_v13 = vpack.c.bf16 %v81_v5, %v80_v3  ;;  %v25_v17 = vld [vmem:[%s1233_s0 + $0x18] sm:$0xff] }
  0x13   :  { %690 = vmatpush3.bf16.msra.mxu1 %v689_v51  ;;  %660 = vmatprep.subr.bf16.mxu0 %v659_v52  ;;  %v51_v12 = vld [vmem:[%s1232_s1 + $0x68] sm:$0xff]  ;;  %v82_v15 = vld [vmem:[%s1232_s1 + $0x160] sm:$0xff]  ;;  %v699_v18 = vpack.c.bf16 %v99_v9, %v98_v8  ;;  %v68_v20 = vld [vmem:[%s1232_s1 + $0xf0] sm:$0xff] }
  0x14   :  { %692 = vmatprep.subr.bf16.mxu1 %v691_v56  ;;  %v23_v16 = vld [vmem:[%s1233_s0 + $0x8] sm:$0xff]  ;;  %v69_v21 = vld [vmem:[%s1232_s1 + $0xf8] sm:$0xff]  ;;  %v100_v22 = vld [vmem:[%s1232_s1 + $0x1f0] sm:$0xff]  ;;  %305 = vmatprep.mubr.f32.mxu1 %v25_v17  ;;  %v669_v24 = vpack.c.bf16 %v51_v12, %v50_v11 }
  0x15   :  { %v83_v19 = vld [vmem:[%s1232_s1 + $0x168] sm:$0xff]  ;;  %230 = vmatprep.mubr.f32.mxu0 %v23_v16  ;;  %v101_v23 = vld [vmem:[%s1232_s1 + $0x1f8] sm:$0xff]  ;;  %v671_v26 = vpack.c.bf16 %v69_v21, %v68_v20  ;;  %v52_v27 = vld [vmem:[%s1232_s1 + $0x70] sm:$0xff] }
  0x16   :  { %662 = vmatpush3.bf16.msra.mxu0 %v661_v62  ;;  %v701_v25 = vpack.c.bf16 %v83_v19, %v82_v15  ;;  %v53_v28 = vld [vmem:[%s1232_s1 + $0x78] sm:$0xff]  ;;  %v84_v29 = vld [vmem:[%s1232_s1 + $0x170] sm:$0xff]  ;;  %v703_v30 = vpack.c.bf16 %v101_v23, %v100_v22  ;;  %v118_v32 = vld [vmem:[%s1232_s1 + $0x280] sm:$0xff] }
  0x17   :  { %694 = vmatpush3.bf16.msra.mxu1 %v693_v63  ;;  %664 = vmatprep.subr.bf16.mxu0 %v663_v0  ;;  %v85_v31 = vld [vmem:[%s1232_s1 + $0x178] sm:$0xff]  ;;  %v119_v33 = vld [vmem:[%s1232_s1 + $0x288] sm:$0xff]  ;;  %v150_v34 = vld [vmem:[%s1232_s1 + $0x380] sm:$0xff]  ;;  %v673_v36 = vpack.c.bf16 %v53_v28, %v52_v27 }
  0x18   :  { %696 = vmatprep.subr.bf16.mxu1 %v695_v4  ;;  %v151_v35 = vld [vmem:[%s1232_s1 + $0x388] sm:$0xff]  ;;  %v705_v37 = vpack.c.bf16 %v85_v31, %v84_v29  ;;  %v707_v38 = vpack.c.bf16 %v119_v33, %v118_v32  ;;  %v102_v39 = vld [vmem:[%s1232_s1 + $0x200] sm:$0xff]  ;;  %v120_v44 = vld [vmem:[%s1232_s1 + $0x290] sm:$0xff] }
  0x19   :  { %v103_v40 = vld [vmem:[%s1232_s1 + $0x208] sm:$0xff]  ;;  %v134_v41 = vld [vmem:[%s1232_s1 + $0x300] sm:$0xff]  ;;  %v739_v42 = vpack.c.bf16 %v151_v35, %v150_v34  ;;  %v121_v45 = vld [vmem:[%s1232_s1 + $0x298] sm:$0xff] }
  0x1a   :  { %666 = vmatpush3.bf16.msra.mxu0 %v665_v10  ;;  %v135_v43 = vld [vmem:[%s1232_s1 + $0x308] sm:$0xff]  ;;  %v152_v46 = vld [vmem:[%s1232_s1 + $0x390] sm:$0xff]  ;;  %v153_v47 = vld [vmem:[%s1232_s1 + $0x398] sm:$0xff]  ;;  %v709_v50 = vpack.c.bf16 %v103_v40, %v102_v39  ;;  %v711_v52 = vpack.c.bf16 %v121_v45, %v120_v44 }
  0x1b   :  { %698 = vmatpush3.bf16.msra.mxu1 %v697_v13  ;;  %668 = vmatprep.subr.bf16.mxu0 %v667_v14  ;;  %v22_v48 = vld [vmem:[%s1233_s0] sm:$0xff]  ;;  %v24_v49 = vld [vmem:[%s1233_s0 + $0x10] sm:$0xff]  ;;  %v741_v51 = vpack.c.bf16 %v135_v43, %v134_v41  ;;  %v105_v54 = vld [vmem:[%s1232_s1 + $0x218] sm:$0xff]  ;;  %v743_v56 = vpack.c.bf16 %v153_v47, %v152_v46 }
  0x1c   :  { %700 = vmatprep.subr.bf16.mxu1 %v699_v18  ;;  %v104_v53 = vld [vmem:[%s1232_s1 + $0x210] sm:$0xff]  ;;  %v137_v57 = vld [vmem:[%s1232_s1 + $0x318] sm:$0xff]  ;;  %v122_v58 = vld [vmem:[%s1232_s1 + $0x2a0] sm:$0xff] }
  0x1d   :  { %v136_v55 = vld [vmem:[%s1232_s1 + $0x310] sm:$0xff]  ;;  %v123_v59 = vld [vmem:[%s1232_s1 + $0x2a8] sm:$0xff]  ;;  %v154_v60 = vld [vmem:[%s1232_s1 + $0x3a0] sm:$0xff]  ;;  %v713_v62 = vpack.c.bf16 %v105_v54, %v104_v53 }
  0x1e   :  { %670 = vmatpush3.bf16.msra.mxu0 %v669_v24  ;;  %v155_v61 = vld [vmem:[%s1232_s1 + $0x3a8] sm:$0xff]  ;;  %v745_v63 = vpack.c.bf16 %v137_v57, %v136_v55  ;;  %v715_v0 = vpack.c.bf16 %v123_v59, %v122_v58  ;;  %v106_v1 = vld [vmem:[%s1232_s1 + $0x220] sm:$0xff]  ;;  %v124_v6 = vld [vmem:[%s1232_s1 + $0x2b0] sm:$0xff] }
  0x1f   :  { %702 = vmatpush3.bf16.msra.mxu1 %v701_v25  ;;  %672 = vmatprep.subr.bf16.mxu0 %v671_v26  ;;  %v107_v2 = vld [vmem:[%s1232_s1 + $0x228] sm:$0xff]  ;;  %v138_v3 = vld [vmem:[%s1232_s1 + $0x320] sm:$0xff]  ;;  %v747_v4 = vpack.c.bf16 %v155_v61, %v154_v60  ;;  %v125_v7 = vld [vmem:[%s1232_s1 + $0x2b8] sm:$0xff] }
  0x20   :  { %704 = vmatprep.subr.bf16.mxu1 %v703_v30  ;;  %v139_v5 = vld [vmem:[%s1232_s1 + $0x328] sm:$0xff]  ;;  %v108_v8 = vld [vmem:[%s1232_s1 + $0x230] sm:$0xff]  ;;  %v157_v10 = vld [vmem:[%s1232_s1 + $0x3b8] sm:$0xff]  ;;  %v717_v11 = vpack.c.bf16 %v107_v2, %v106_v1  ;;  %v719_v16 = vpack.c.bf16 %v125_v7, %v124_v6 }
  0x21   :  { %v156_v9 = vld [vmem:[%s1232_s1 + $0x3b0] sm:$0xff]  ;;  %v109_v12 = vld [vmem:[%s1232_s1 + $0x238] sm:$0xff]  ;;  %v31_v14 = vld [vmem:[%s1233_s0 + $0x48] sm:$0xff]  ;;  %v749_v15 = vpack.c.bf16 %v139_v5, %v138_v3 }
  0x22   :  { %674 = vmatpush3.bf16.msra.mxu0 %v673_v36  ;;  %v140_v13 = vld [vmem:[%s1232_s1 + $0x330] sm:$0xff]  ;;  %v141_v17 = vld [vmem:[%s1232_s1 + $0x338] sm:$0xff]  ;;  %v126_v18 = vld [vmem:[%s1232_s1 + $0x2c0] sm:$0xff]  ;;  %v751_v20 = vpack.c.bf16 %v157_v10, %v156_v9  ;;  %v721_v26 = vpack.c.bf16 %v109_v12, %v108_v8 }
  0x23   :  { %706 = vmatpush3.bf16.msra.mxu1 %v705_v37  ;;  %708 = vmatprep.subr.bf16.mxu0 %v707_v38  ;;  %v33_v19 = vld [vmem:[%s1233_s0 + $0x58] sm:$0xff]  ;;  %v127_v21 = vld [vmem:[%s1232_s1 + $0x2c8] sm:$0xff]  ;;  %v30_v22 = vld [vmem:[%s1233_s0 + $0x40] sm:$0xff]  ;;  %v753_v29 = vpack.c.bf16 %v141_v17, %v140_v13 }
  0x24   :  { %740 = vmatprep.subr.bf16.mxu1 %v739_v42  ;;  %v32_v23 = vld [vmem:[%s1233_s0 + $0x50] sm:$0xff]  ;;  %v158_v24 = vld [vmem:[%s1232_s1 + $0x3c0] sm:$0xff]  ;;  %v159_v25 = vld [vmem:[%s1232_s1 + $0x3c8] sm:$0xff]  ;;  %v723_v30 = vpack.c.bf16 %v127_v21, %v126_v18 }
  0x25   :  { %231 = vmatmul.mubr.f32.vlgmr.msra.gmra.mrb[0].mxu0 %v22_v48  ;;  %v110_v27 = vld [vmem:[%s1232_s1 + $0x240] sm:$0xff]  ;;  %v111_v28 = vld [vmem:[%s1232_s1 + $0x248] sm:$0xff]  ;;  %v755_v34 = vpack.c.bf16 %v159_v25, %v158_v24  ;;  %v128_v35 = vld [vmem:[%s1232_s1 + $0x2d0] sm:$0xff] }
  0x26   :  { %306 = vmatmul.mubr.f32.vlgmr.msra.gmra.mrb[0].mxu1 %v24_v49  ;;  %710 = vmatpush3.bf16.msra.mxu0 %v709_v50  ;;  %v142_v31 = vld [vmem:[%s1232_s1 + $0x340] sm:$0xff]  ;;  %v143_v32 = vld [vmem:[%s1232_s1 + $0x348] sm:$0xff]  ;;  %v129_v36 = vld [vmem:[%s1232_s1 + $0x2d8] sm:$0xff]  ;;  %v725_v40 = vpack.c.bf16 %v111_v28, %v110_v27 }
  0x27   :  { %742 = vmatpush3.bf16.msra.mxu1 %v741_v51  ;;  %712 = vmatprep.subr.bf16.mxu0 %v711_v52  ;;  %v27_v33 = vld [vmem:[%s1233_s0 + $0x28] sm:$0xff]  ;;  %v29_v37 = vld [vmem:[%s1233_s0 + $0x38] sm:$0xff]  ;;  %v160_v38 = vld [vmem:[%s1232_s1 + $0x3d0] sm:$0xff]  ;;  %v757_v41 = vpack.c.bf16 %v143_v32, %v142_v31  ;;  %v727_v42 = vpack.c.bf16 %v129_v36, %v128_v35 }
  0x28   :  { %744 = vmatprep.subr.bf16.mxu1 %v743_v56  ;;  %235 = vmatprep.mubr.f32.mxu0 %v31_v14  ;;  %v161_v39 = vld [vmem:[%s1232_s1 + $0x3d8] sm:$0xff]  ;;  %v112_v43 = vld [vmem:[%s1232_s1 + $0x250] sm:$0xff]  ;;  %v130_v48 = vld [vmem:[%s1232_s1 + $0x2e0] sm:$0xff] }
  0x29   :  { %310 = vmatprep.mubr.f32.mxu1 %v33_v19  ;;  %236 = vmatmul.mubr.f32.gmra.mrb[2].mxu0 %v30_v22  ;;  %v113_v44 = vld [vmem:[%s1232_s1 + $0x258] sm:$0xff]  ;;  %v144_v45 = vld [vmem:[%s1232_s1 + $0x350] sm:$0xff]  ;;  %v759_v46 = vpack.c.bf16 %v161_v39, %v160_v38  ;;  %v131_v49 = vld [vmem:[%s1232_s1 + $0x2e8] sm:$0xff] }
  0x2a   :  { %714 = vmatpush3.bf16.msra.mxu0 %v713_v62  ;;  %311 = vmatmul.mubr.f32.gmra.mrb[2].mxu1 %v32_v23  ;;  %v145_v47 = vld [vmem:[%s1232_s1 + $0x358] sm:$0xff]  ;;  %v162_v50 = vld [vmem:[%s1232_s1 + $0x3e0] sm:$0xff]  ;;  %v163_v51 = vld [vmem:[%s1232_s1 + $0x3e8] sm:$0xff]  ;;  %v729_v52 = vpack.c.bf16 %v113_v44, %v112_v43  ;;  %v731_v54 = vpack.c.bf16 %v131_v49, %v130_v48 }
  0x2b   :  { %746 = vmatpush3.bf16.msra.mxu1 %v745_v63  ;;  %716 = vmatprep.subr.bf16.mxu0 %v715_v0  ;;  %v761_v53 = vpack.c.bf16 %v145_v47, %v144_v45  ;;  %v114_v55 = vld [vmem:[%s1232_s1 + $0x260] sm:$0xff]  ;;  %v115_v56 = vld [vmem:[%s1232_s1 + $0x268] sm:$0xff]  ;;  %v763_v58 = vpack.c.bf16 %v163_v51, %v162_v50  ;;  %v132_v60 = vld [vmem:[%s1232_s1 + $0x2f0] sm:$0xff] }
  0x2c   :  { %748 = vmatprep.subr.bf16.mxu1 %v747_v4  ;;  %380 = vmatprep.mubr.f32.mxu0 %v27_v33  ;;  %v146_v57 = vld [vmem:[%s1232_s1 + $0x360] sm:$0xff]  ;;  %v147_v59 = vld [vmem:[%s1232_s1 + $0x368] sm:$0xff]  ;;  %v133_v61 = vld [vmem:[%s1232_s1 + $0x2f8] sm:$0xff]  ;;  %v733_v0 = vpack.c.bf16 %v115_v56, %v114_v55 }
  0x2d   :  { %455 = vmatprep.mubr.f32.mxu1 %v29_v37  ;;  %v164_v62 = vld [vmem:[%s1232_s1 + $0x3f0] sm:$0xff]  ;;  %v165_v63 = vld [vmem:[%s1232_s1 + $0x3f8] sm:$0xff]  ;;  %v765_v1 = vpack.c.bf16 %v147_v59, %v146_v57  ;;  %v735_v2 = vpack.c.bf16 %v133_v61, %v132_v60  ;;  %v26_v10 = vld [vmem:[%s1233_s0 + $0x20] sm:$0xff] }
  0x2e   :  { %718 = vmatpush3.bf16.msra.mxu0 %v717_v11  ;;  %v116_v3 = vld [vmem:[%s1232_s1 + $0x270] sm:$0xff]  ;;  %v117_v4 = vld [vmem:[%s1232_s1 + $0x278] sm:$0xff]  ;;  %v767_v5 = vpack.c.bf16 %v165_v63, %v164_v62  ;;  %v35_v12 = vld [vmem:[%s1233_s0 + $0x68] sm:$0xff] }
  0x2f   :  { %750 = vmatpush3.bf16.msra.mxu1 %v749_v15  ;;  %720 = vmatprep.subr.bf16.mxu0 %v719_v16  ;;  %v148_v6 = vld [vmem:[%s1232_s1 + $0x370] sm:$0xff]  ;;  %v149_v7 = vld [vmem:[%s1232_s1 + $0x378] sm:$0xff]  ;;  %v737_v8 = vpack.c.bf16 %v117_v4, %v116_v3  ;;  %v34_v14 = vld [vmem:[%s1233_s0 + $0x60] sm:$0xff] }
  0x30   :  { %752 = vmatprep.subr.bf16.mxu1 %v751_v20  ;;  %v769_v9 = vpack.c.bf16 %v149_v7, %v148_v6  ;;  %v28_v11 = vld [vmem:[%s1233_s0 + $0x30] sm:$0xff]  ;;  %v37_v13 = vld [vmem:[%s1233_s0 + $0x78] sm:$0xff]  ;;  %v490_v38 = vld [vmem:[%s1234_s2] ss:$0 sm:$0xff] }
  0x31   :  { %v36_v15 = vld [vmem:[%s1233_s0 + $0x70] sm:$0xff] }
  0x32   :  { %722 = vmatpush3.bf16.msra.mxu0 %v721_v26 }
  0x33   :  { %754 = vmatpush3.bf16.msra.mxu1 %v753_v29  ;;  %724 = vmatprep.subr.bf16.mxu0 %v723_v30 }
  0x34   :  { %756 = vmatprep.subr.bf16.mxu1 %v755_v34 }
  0x36   :  { %726 = vmatpush3.bf16.msra.mxu0 %v725_v40 }
  0x37   :  { %758 = vmatpush3.bf16.msra.mxu1 %v757_v41  ;;  %728 = vmatprep.subr.bf16.mxu0 %v727_v42 }
  0x38   :  { %760 = vmatprep.subr.bf16.mxu1 %v759_v46 }
  0x3a   :  { %730 = vmatpush3.bf16.msra.mxu0 %v729_v52 }
  0x3b   :  { %762 = vmatpush3.bf16.msra.mxu1 %v761_v53  ;;  %732 = vmatprep.subr.bf16.mxu0 %v731_v54 }
  0x3c   :  { %764 = vmatprep.subr.bf16.mxu1 %v763_v58 }
  0x3e   :  { %734 = vmatpush3.bf16.msra.mxu0 %v733_v0 }
  0x3f   :  { %766 = vmatpush3.bf16.msra.mxu1 %v765_v1  ;;  %736 = vmatprep.subr.bf16.mxu0 %v735_v2 }
  0x40   :  { %768 = vmatprep.subr.bf16.mxu1 %v767_v5 }
  0x42   :  { %738 = vmatpush3.bf16.msra.mxu0 %v737_v8 }
  0x43   :  { %770 = vmatpush3.bf16.msra.mxu1 %v769_v9 }
  0x45   :  { %381 = vmatmul.mubr.f32.vlgmr.msra.gmra.mrb[4].mxu0 %v26_v10 }
  0x46   :  { %456 = vmatmul.mubr.f32.vlgmr.msra.gmra.mrb[4].mxu1 %v28_v11  ;;  %385 = vmatprep.mubr.f32.mxu0 %v35_v12 }
  0x47   :  { %460 = vmatprep.mubr.f32.mxu1 %v37_v13 }
  0x49   :  { %386 = vmatmul.mubr.f32.gmra.mrb[6].mxu0 %v34_v14 }
  0x4a   :  { %461 = vmatmul.mubr.f32.gmra.mrb[6].mxu1 %v36_v15 }
  0xf8   :  { %v523_v16 = vpop.f32.mrb[0].mxu0 }
  0xf9   :  { %v561_v17 = vpop.f32.mrb[0].mxu1  ;;  %v524_v18 = vpop.f32.mrb[1].mxu0 }
  0xfa   :  { %v525_v19 = vadd.f32 %v524_v18, %v523_v16  ;;  %v562_v20 = vpop.f32.mrb[1].mxu1 }
  0xfb   :  { %v563_v21 = vadd.f32 %v562_v20, %v561_v17 }
  0xfc   :  { %v526_v23 = vpop.f32.mrb[2].mxu0 }
  0xfd   :  { %v308_v22 = vadd.f32 %v563_v21, %v525_v19  ;;  %v564_v24 = vpop.f32.mrb[2].mxu1  ;;  %v527_v25 = vpop.f32.mrb[3].mxu0 }
  0xfe   :  { %v528_v26 = vadd.f32 %v527_v25, %v526_v23  ;;  %v565_v27 = vpop.f32.mrb[3].mxu1 }
  0xff   :  { %v566_v28 = vadd.f32 %v565_v27, %v564_v24 }
 0x101   :  { %v313_v29 = vadd.f32 %v566_v28, %v528_v26 }
 0x118   :  { %v599_v30 = vpop.f32.mrb[4].mxu0 }
 0x119   :  { %v600_v31 = vpop.f32.mrb[5].mxu0  ;;  %v637_v32 = vpop.f32.mrb[4].mxu1 }
 0x11a   :  { %v601_v33 = vadd.f32 %v600_v31, %v599_v30  ;;  %v638_v34 = vpop.f32.mrb[5].mxu1 }
 0x11b   :  { %v639_v35 = vadd.f32 %v638_v34, %v637_v32 }
 0x11c   :  { %v383_v36 = vadd.f32 %v601_v33, %v308_v22  ;;  %v602_v37 = vpop.f32.mrb[6].mxu0 }
 0x11d   :  { %v603_v39 = vpop.f32.mrb[7].mxu0  ;;  %v640_v40 = vpop.f32.mrb[6].mxu1 }
 0x11e   :  { %v458_v41 = vadd.f32 %v639_v35, %v383_v36  ;;  %v604_v42 = vadd.f32 %v603_v39, %v602_v37  ;;  %v641_v43 = vpop.f32.mrb[7].mxu1 }
 0x11f   :  { %v642_v44 = vadd.f32 %v641_v43, %v640_v40 }
 0x120   :  { %v482_v45 = vadd.f32 %v490_v38, %v458_v41  ;;  %v388_v46 = vadd.f32 %v604_v42, %v313_v29 }
 0x122   :  { %484 = vst [vmem:[%s1235_s3] sm:$0xff] %v482_v45  ;;  %v463_v47 = vadd.f32 %v642_v44, %v388_v46 }
 0x124   :  { %v483_v48 = vadd.f32 %v490_v38, %v463_v47 }
 0x126   :  { %485 = vst [vmem:[%s1235_s3 + $0x8] sm:$0xff] %v483_v48 }

</bundles_post_ra>
